<compile_context>
chip_gen: v7x
topology: tpu7x:2x2x1
jax: 0.10.0
libtpu: 0.0.40
codegen_flags: <defaults>
</compile_context>

<pallas_src>
import jax
import jax.numpy as jnp
from jax.experimental import pallas as pl
from jax.experimental.pallas import tpu as pltpu

EPS = 1e-5
NEG_SLOPE = 0.2
K = 4  # conv kernel size used everywhere in the Discriminator


def _round_up(x, m):
    return ((x + m - 1) // m) * m


def _make_conv_kernel(stride, c_in_pad, h_out, w_out, w_ph, l_out, l_out_pad,
                      use_bias, use_in, act):
    """Fused Conv2d(k=4, stride, reflect pad=1) [+InstanceNorm2d] [+activation] kernel.

    Grid = (batch, c_out_tiles).  refs:
      x_ref : (1, n_ph, c_in_pad, l_pad)  bf16  phase-decomposed, spatially-flattened input
      w_ref : (co_tile, 16*c_in_pad)      bf16  tap-stacked weights
      b_ref : (co_tile, 1)                f32   (only when use_bias)
      o_ref : (1, co_tile, l_out_pad)     bf16/f32
      stk   : (16*c_in_pad, l_out_pad)    bf16  VMEM scratch tap stack
    """
    inv_count = 1.0 / float(h_out * w_out)

    def kernel(*refs):
        if use_bias:
            x_ref, w_ref, b_ref, o_ref, stk_ref = refs
        else:
            x_ref, w_ref, o_ref, stk_ref = refs

        # Build the (16*C_in, L) tap stack once per sample (c_out-tile axis is "arbitrary",
        # so for a given batch index the j==0 step always runs first on the same core and the
        # scratch persists across the remaining c_out tiles).
        @pl.when(pl.program_id(1) == 0)
        def _build_tap_stack():
            for kh in range(K):
                for kw in range(K):
                    ph = (kh % stride) * stride + (kw % stride)       # stride phase
                    start = (kh // stride) * w_ph + (kw // stride)    # flat offset inside phase
                    t = kh * K + kw
                    stk_ref[t * c_in_pad:(t + 1) * c_in_pad, :] = (
                        x_ref[0, ph, :, start:start + l_out_pad])

        # One big MXU matmul with f32 accumulation.
        acc = jnp.dot(w_ref[...], stk_ref[...], preferred_element_type=jnp.float32)

        if use_bias:
            acc = acc + b_ref[...]                                    # (co_tile, 1) broadcast

        if use_in:
            # InstanceNorm2d (affine=False, biased var).  Stats are per channel over the valid
            # spatial positions only: columns with (l % w_ph) >= w_out are row halo, columns
            # >= l_out are lane padding -> both masked out.  Mask built from a (1, L) iota.
            col = jax.lax.broadcasted_iota(jnp.int32, (1, l_out_pad), 1)
            valid = jnp.logical_and(col % w_ph < w_out, col < l_out)
            y = jnp.where(valid, acc, 0.0)
            s1 = jnp.sum(y, axis=1, keepdims=True)
            s2 = jnp.sum(y * y, axis=1, keepdims=True)
            mean = s1 * inv_count
            var = jnp.maximum(s2 * inv_count - mean * mean, 0.0)      # clamp cancellation
            acc = (acc - mean) * jax.lax.rsqrt(var + EPS)

        if act == "leaky":
            acc = jnp.maximum(acc, NEG_SLOPE * acc)
        elif act == "sigmoid":
            acc = jax.nn.sigmoid(acc)

        o_ref[0] = acc.astype(o_ref.dtype)

    return kernel


def conv_block(x, weight, bias, *, stride, use_in, act, out_dtype=jnp.bfloat16):
    """x: (N, C_in, H, W).  weight: (C_out, C_in, 4, 4) f32.  bias: (C_out,) f32.
    Returns (N, C_out, H_out, W_out) in NCHW (like PyTorch), dtype `out_dtype`."""
    n, c_in, h, w = x.shape
    c_out = weight.shape[0]

    # Channel padding: bf16-friendly sublane multiples; 16*C_in_pad is a multiple of 128.
    c_in_pad = _round_up(c_in, 16)
    c_out_pad = _round_up(c_out, 16)
    if c_out_pad > 256:
        co_tile = 256
        c_out_pad = _round_up(c_out_pad, co_tile)
    else:
        co_tile = c_out_pad
    n_co = c_out_pad // co_tile

    # ---- input preprocessing (all in bf16; reflect pad only copies values, so exact) ----
    xb = x.astype(jnp.bfloat16)
    if c_in_pad > c_in:
        xb = jnp.pad(xb, ((0, 0), (0, c_in_pad - c_in), (0, 0), (0, 0)))
    xp = jnp.pad(xb, ((0, 0), (0, 0), (1, 1), (1, 1)), mode="reflect")
    hp, wp = h + 2, w + 2
    h_out = (hp - K) // stride + 1
    w_out = (wp - K) // stride + 1

    # Stride-phase decomposition: x_ph[n, rp*stride+cp, c, a, b] = xp[n, c, stride*a+rp, stride*b+cp]
    if stride == 1:
        n_ph, h_ph, w_ph = 1, hp, wp
        x_ph = xp[:, None]
    else:
        assert hp % stride == 0 and wp % stride == 0, "even spatial dims expected"
        n_ph, h_ph, w_ph = stride * stride, hp // stride, wp // stride
        x_ph = xp.reshape(n, c_in_pad, h_ph, stride, w_ph, stride)
        x_ph = x_ph.transpose(0, 3, 5, 1, 2, 4).reshape(n, n_ph, c_in_pad, h_ph, w_ph)

    # Flatten spatial per phase; pad so every shifted tap slice of width l_out_pad stays in bounds.
    l_flat = h_ph * w_ph
    l_out = h_out * w_ph
    l_out_pad = _round_up(l_out, 128)                 # lane-dense output stores
    r_max = (K - 1) // stride
    l_need = r_max * w_ph + r_max + l_out_pad
    l_pad = _round_up(max(l_flat, l_need), 128)
    x_fl = x_ph.reshape(n, n_ph, c_in_pad, l_flat)
    x_fl = jnp.pad(x_fl, ((0, 0), (0, 0), (0, 0), (0, l_pad - l_flat)))

    # Tap-stacked weight matrix: (C_out_pad, 16*C_in_pad), column index = (kh*K+kw)*C_in_pad + c.
    kkc = K * K * c_in_pad
    w_p = jnp.pad(weight.astype(jnp.float32),
                  ((0, c_out_pad - c_out), (0, c_in_pad - c_in), (0, 0), (0, 0)))
    w_stk = jnp.transpose(w_p, (0, 2, 3, 1)).reshape(c_out_pad, kkc).astype(jnp.bfloat16)

    use_bias = not use_in  # bias is exactly cancelled by InstanceNorm's mean subtraction
    args = [x_fl, w_stk]
    in_specs = [
        pl.BlockSpec((1, n_ph, c_in_pad, l_pad), lambda i, j: (i, 0, 0, 0)),
        pl.BlockSpec((co_tile, kkc), lambda i, j: (j, 0)),
    ]
    if use_bias:
        b_p = jnp.pad(bias.astype(jnp.float32), (0, c_out_pad - c_out)).reshape(c_out_pad, 1)
        args.append(b_p)
        in_specs.append(pl.BlockSpec((co_tile, 1), lambda i, j: (j, 0)))

    kernel = _make_conv_kernel(stride, c_in_pad, h_out, w_out, w_ph, l_out, l_out_pad,
                               use_bias, use_in, act)

    out = pl.pallas_call(
        kernel,
        out_shape=jax.ShapeDtypeStruct((n, c_out_pad, l_out_pad), out_dtype),
        grid_spec=pltpu.PrefetchScalarGridSpec(
            num_scalar_prefetch=0,
            grid=(n, n_co),
            in_specs=in_specs,
            out_specs=pl.BlockSpec((1, co_tile, l_out_pad), lambda i, j: (i, j, 0)),
            scratch_shapes=[pltpu.VMEM((kkc, l_out_pad), jnp.bfloat16)],
        ),
        compiler_params=pltpu.CompilerParams(
            dimension_semantics=("parallel", "arbitrary"),
            vmem_limit_bytes=32 * 1024 * 1024,
        ),
    )(*args)

    # (N, C_out_pad, L_pad) -> trim channel / lane padding and halo columns -> NCHW.
    out = out[:, :c_out, :l_out].reshape(n, c_out, h_out, w_ph)[:, :, :, :w_out]
    return out


# ----------------------------- Discriminator wiring ------------------------------------------

def init_discriminator_params(key, in_channels, features):
    def conv_init(k, co, ci):
        kw_, kb_ = jax.random.split(k)
        fan_in = ci * K * K
        bound = float(fan_in) ** -0.5
        wgt = jax.random.uniform(kw_, (co, ci, K, K), jnp.float32, -bound, bound)
        b = jax.random.uniform(kb_, (co,), jnp.float32, -bound, bound)
        return wgt, b

    keys = jax.random.split(key, len(features) + 1)
    params = {"initial": conv_init(keys[0], features[0], in_channels)}
    blocks, strides = [], []
    ci = features[0]
    for i, f in enumerate(features[1:]):
        blocks.append(conv_init(keys[1 + i], f, ci))
        strides.append(1 if f == features[-1] else 2)
        ci = f
    params["blocks"] = blocks
    params["block_strides"] = strides
    params["final"] = conv_init(keys[-1], 1, ci)
    return params


def discriminator_forward(x, params):
    w0, b0 = params["initial"]
    y = conv_block(x, w0, b0, stride=2, use_in=False, act="leaky", out_dtype=jnp.bfloat16)
    for (wb, bb), s in zip(params["blocks"], params["block_strides"]):
        y = conv_block(y, wb, bb, stride=s, use_in=True, act="leaky", out_dtype=jnp.bfloat16)
    wf, bf = params["final"]
    return conv_block(y, wf, bf, stride=1, use_in=False, act="sigmoid", out_dtype=jnp.float32)


# ----------------------------- Plain-JAX reference (sanity check) ----------------------------

def _ref_layer(x, weight, bias, stride, use_in, act):
    xp = jnp.pad(x.astype(jnp.float32), ((0, 0), (0, 0), (1, 1), (1, 1)), mode="reflect")
    y = jax.lax.conv_general_dilated(
        xp.astype(jnp.bfloat16), weight.astype(jnp.bfloat16),
        window_strides=(stride, stride), padding="VALID",
        dimension_numbers=("NCHW", "OIHW", "NCHW"),
        preferred_element_type=jnp.float32)
    y = y + bias.reshape(1, -1, 1, 1).astype(jnp.float32)
    if use_in:
        mean = jnp.mean(y, axis=(2, 3), keepdims=True)
        var = jnp.mean((y - mean) ** 2, axis=(2, 3), keepdims=True)
        y = (y - mean) * jax.lax.rsqrt(var + EPS)
    if act == "leaky":
        y = jnp.maximum(y, NEG_SLOPE * y)
    elif act == "sigmoid":
        y = jax.nn.sigmoid(y)
    return y


def _reference(x, params):
    w0, b0 = params["initial"]
    y = _ref_layer(x, w0, b0, 2, False, "leaky")
    for (wb, bb), s in zip(params["blocks"], params["block_strides"]):
        y = _ref_layer(y, wb, bb, s, True, "leaky")
    wf, bf = params["final"]
    return _ref_layer(y, wf, bf, 1, False, "sigmoid")


if __name__ == "__main__":
    # Small shapes consistent with the module: in_channels=3, features scaled down from
    # [64,128,256,512] to [8,16,32,64]; spatial=32 so the full 5-conv chain is non-empty.
    N, C_IN, H, W = 2, 3, 32, 32
    FEATURES = (8, 16, 32, 64)

    key = jax.random.PRNGKey(0)
    kx, kp = jax.random.split(key)
    x = jax.random.normal(kx, (N, C_IN, H, W), dtype=jnp.float32)
    params = init_discriminator_params(kp, C_IN, FEATURES)

    fwd = jax.jit(lambda inp: discriminator_forward(inp, params))
    out = jax.block_until_ready(fwd(x))
    ref = jax.block_until_ready(_reference(x, params))

    # Spatial chain: 32 -(s2)-> 16 -(s2)-> 8 -(s2)-> 4 -(s1)-> 3 -(s1)-> 2
    assert out.shape == (N, 1, 2, 2), out.shape
    assert bool(jnp.all(jnp.isfinite(out)))
    err = float(jnp.max(jnp.abs(out.astype(jnp.float32) - ref)))
    assert err < 3e-2, err

    print("KERNEL_OK")
</pallas_src>

<mosaic_0001>
module attributes {stable_mosaic.version = 11 : i64} {
  func.func @kernel(%arg0: i32, %arg1: i32, %arg2: memref<1x4x16x512xbf16, #tpu.memory_space<vmem>>, %arg3: memref<16x256xbf16, #tpu.memory_space<vmem>>, %arg4: memref<16x1xf32, #tpu.memory_space<vmem>>, %arg5: memref<1x16x384xbf16, #tpu.memory_space<vmem>>, %arg6: memref<256x384xbf16, #tpu.memory_space<vmem>>) attributes {dimension_semantics = [#tpu.dimension_semantics<parallel>, #tpu.dimension_semantics<arbitrary>], iteration_bounds = array<i64: 2, 1>, scalar_prefetch = 0 : i64, scratch_operands = 1 : i64, tpu.core_type = #tpu.core_type<tc>, window_params = [{transform_indices = @transform_0, window_bounds = array<i64: 1, 4, 16, 512>}, {transform_indices = @transform_1, window_bounds = array<i64: 16, 256>}, {transform_indices = @transform_2, window_bounds = array<i64: 16, 1>}, {transform_indices = @transform_3, window_bounds = array<i64: 1, 16, 384>}]} {
    %c0_i32 = arith.constant 0 : i32
    %0 = arith.cmpi eq, %arg1, %c0_i32 : i32
    %1 = arith.extui %0 : i1 to i32
    %c0_i32_0 = arith.constant 0 : i32
    %2 = arith.cmpi ne, %1, %c0_i32_0 : i32
    scf.if %2 {
      %c0_10 = arith.constant 0 : index
      %c0_11 = arith.constant 0 : index
      %c0_12 = arith.constant 0 : index
      %c0_13 = arith.constant 0 : index
      %16 = vector.load %arg2[%c0_10, %c0_11, %c0_12, %c0_13] : memref<1x4x16x512xbf16, #tpu.memory_space<vmem>>, vector<1x1x16x384xbf16>
      %17 = vector.shape_cast %16 : vector<1x1x16x384xbf16> to vector<16x384xbf16>
      %c0_14 = arith.constant 0 : index
      %c0_15 = arith.constant 0 : index
      %18 = vector.load %arg6[%c0_14, %c0_15] : memref<256x384xbf16, #tpu.memory_space<vmem>>, vector<16x384xbf16>
      tpu.vector_store %arg6[%c0_14, %c0_15], %17 {strides = array<i32>} : memref<256x384xbf16, #tpu.memory_space<vmem>>, vector<16x384xbf16>,
      %c0_16 = arith.constant 0 : index
      %c1 = arith.constant 1 : index
      %c0_17 = arith.constant 0 : index
      %c0_18 = arith.constant 0 : index
      %19 = vector.load %arg2[%c0_16, %c1, %c0_17, %c0_18] : memref<1x4x16x512xbf16, #tpu.memory_space<vmem>>, vector<1x1x16x384xbf16>
      %20 = vector.shape_cast %19 : vector<1x1x16x384xbf16> to vector<16x384xbf16>
      %c16 = arith.constant 16 : index
      %c0_19 = arith.constant 0 : index
      %21 = vector.load %arg6[%c16, %c0_19] : memref<256x384xbf16, #tpu.memory_space<vmem>>, vector<16x384xbf16>
      tpu.vector_store %arg6[%c16, %c0_19], %20 {strides = array<i32>} : memref<256x384xbf16, #tpu.memory_space<vmem>>, vector<16x384xbf16>,
      %c0_20 = arith.constant 0 : index
      %c0_21 = arith.constant 0 : index
      %c0_22 = arith.constant 0 : index
      %c1_23 = arith.constant 1 : index
      %22 = vector.load %arg2[%c0_20, %c0_21, %c0_22, %c1_23] : memref<1x4x16x512xbf16, #tpu.memory_space<vmem>>, vector<1x1x16x384xbf16>
      %23 = vector.shape_cast %22 : vector<1x1x16x384xbf16> to vector<16x384xbf16>
      %c32 = arith.constant 32 : index
      %c0_24 = arith.constant 0 : index
      %24 = vector.load %arg6[%c32, %c0_24] : memref<256x384xbf16, #tpu.memory_space<vmem>>, vector<16x384xbf16>
      tpu.vector_store %arg6[%c32, %c0_24], %23 {strides = array<i32>} : memref<256x384xbf16, #tpu.memory_space<vmem>>, vector<16x384xbf16>,
      %c0_25 = arith.constant 0 : index
      %c1_26 = arith.constant 1 : index
      %c0_27 = arith.constant 0 : index
      %c1_28 = arith.constant 1 : index
      %25 = vector.load %arg2[%c0_25, %c1_26, %c0_27, %c1_28] : memref<1x4x16x512xbf16, #tpu.memory_space<vmem>>, vector<1x1x16x384xbf16>
      %26 = vector.shape_cast %25 : vector<1x1x16x384xbf16> to vector<16x384xbf16>
      %c48 = arith.constant 48 : index
      %c0_29 = arith.constant 0 : index
      %27 = vector.load %arg6[%c48, %c0_29] : memref<256x384xbf16, #tpu.memory_space<vmem>>, vector<16x384xbf16>
      tpu.vector_store %arg6[%c48, %c0_29], %26 {strides = array<i32>} : memref<256x384xbf16, #tpu.memory_space<vmem>>, vector<16x384xbf16>,
      %c0_30 = arith.constant 0 : index
      %c2 = arith.constant 2 : index
      %c0_31 = arith.constant 0 : index
      %c0_32 = arith.constant 0 : index
      %28 = vector.load %arg2[%c0_30, %c2, %c0_31, %c0_32] : memref<1x4x16x512xbf16, #tpu.memory_space<vmem>>, vector<1x1x16x384xbf16>
      %29 = vector.shape_cast %28 : vector<1x1x16x384xbf16> to vector<16x384xbf16>
      %c64 = arith.constant 64 : index
      %c0_33 = arith.constant 0 : index
      %30 = vector.load %arg6[%c64, %c0_33] : memref<256x384xbf16, #tpu.memory_space<vmem>>, vector<16x384xbf16>
      tpu.vector_store %arg6[%c64, %c0_33], %29 {strides = array<i32>} : memref<256x384xbf16, #tpu.memory_space<vmem>>, vector<16x384xbf16>,
      %c0_34 = arith.constant 0 : index
      %c3 = arith.constant 3 : index
      %c0_35 = arith.constant 0 : index
      %c0_36 = arith.constant 0 : index
      %31 = vector.load %arg2[%c0_34, %c3, %c0_35, %c0_36] : memref<1x4x16x512xbf16, #tpu.memory_space<vmem>>, vector<1x1x16x384xbf16>
      %32 = vector.shape_cast %31 : vector<1x1x16x384xbf16> to vector<16x384xbf16>
      %c80 = arith.constant 80 : index
      %c0_37 = arith.constant 0 : index
      %33 = vector.load %arg6[%c80, %c0_37] : memref<256x384xbf16, #tpu.memory_space<vmem>>, vector<16x384xbf16>
      tpu.vector_store %arg6[%c80, %c0_37], %32 {strides = array<i32>} : memref<256x384xbf16, #tpu.memory_space<vmem>>, vector<16x384xbf16>,
      %c0_38 = arith.constant 0 : index
      %c2_39 = arith.constant 2 : index
      %c0_40 = arith.constant 0 : index
      %c1_41 = arith.constant 1 : index
      %34 = vector.load %arg2[%c0_38, %c2_39, %c0_40, %c1_41] : memref<1x4x16x512xbf16, #tpu.memory_space<vmem>>, vector<1x1x16x384xbf16>
      %35 = vector.shape_cast %34 : vector<1x1x16x384xbf16> to vector<16x384xbf16>
      %c96 = arith.constant 96 : index
      %c0_42 = arith.constant 0 : index
      %36 = vector.load %arg6[%c96, %c0_42] : memref<256x384xbf16, #tpu.memory_space<vmem>>, vector<16x384xbf16>
      tpu.vector_store %arg6[%c96, %c0_42], %35 {strides = array<i32>} : memref<256x384xbf16, #tpu.memory_space<vmem>>, vector<16x384xbf16>,
      %c0_43 = arith.constant 0 : index
      %c3_44 = arith.constant 3 : index
      %c0_45 = arith.constant 0 : index
      %c1_46 = arith.constant 1 : index
      %37 = vector.load %arg2[%c0_43, %c3_44, %c0_45, %c1_46] : memref<1x4x16x512xbf16, #tpu.memory_space<vmem>>, vector<1x1x16x384xbf16>
      %38 = vector.shape_cast %37 : vector<1x1x16x384xbf16> to vector<16x384xbf16>
      %c112 = arith.constant 112 : index
      %c0_47 = arith.constant 0 : index
      %39 = vector.load %arg6[%c112, %c0_47] : memref<256x384xbf16, #tpu.memory_space<vmem>>, vector<16x384xbf16>
      tpu.vector_store %arg6[%c112, %c0_47], %38 {strides = array<i32>} : memref<256x384xbf16, #tpu.memory_space<vmem>>, vector<16x384xbf16>,
      %c0_48 = arith.constant 0 : index
      %c0_49 = arith.constant 0 : index
      %c0_50 = arith.constant 0 : index
      %c17 = arith.constant 17 : index
      %40 = vector.load %arg2[%c0_48, %c0_49, %c0_50, %c17] : memref<1x4x16x512xbf16, #tpu.memory_space<vmem>>, vector<1x1x16x384xbf16>
      %41 = vector.shape_cast %40 : vector<1x1x16x384xbf16> to vector<16x384xbf16>
      %c128 = arith.constant 128 : index
      %c0_51 = arith.constant 0 : index
      %42 = vector.load %arg6[%c128, %c0_51] : memref<256x384xbf16, #tpu.memory_space<vmem>>, vector<16x384xbf16>
      tpu.vector_store %arg6[%c128, %c0_51], %41 {strides = array<i32>} : memref<256x384xbf16, #tpu.memory_space<vmem>>, vector<16x384xbf16>,
      %c0_52 = arith.constant 0 : index
      %c1_53 = arith.constant 1 : index
      %c0_54 = arith.constant 0 : index
      %c17_55 = arith.constant 17 : index
      %43 = vector.load %arg2[%c0_52, %c1_53, %c0_54, %c17_55] : memref<1x4x16x512xbf16, #tpu.memory_space<vmem>>, vector<1x1x16x384xbf16>
      %44 = vector.shape_cast %43 : vector<1x1x16x384xbf16> to vector<16x384xbf16>
      %c144 = arith.constant 144 : index
      %c0_56 = arith.constant 0 : index
      %45 = vector.load %arg6[%c144, %c0_56] : memref<256x384xbf16, #tpu.memory_space<vmem>>, vector<16x384xbf16>
      tpu.vector_store %arg6[%c144, %c0_56], %44 {strides = array<i32>} : memref<256x384xbf16, #tpu.memory_space<vmem>>, vector<16x384xbf16>,
      %c0_57 = arith.constant 0 : index
      %c0_58 = arith.constant 0 : index
      %c0_59 = arith.constant 0 : index
      %c18 = arith.constant 18 : index
      %46 = vector.load %arg2[%c0_57, %c0_58, %c0_59, %c18] : memref<1x4x16x512xbf16, #tpu.memory_space<vmem>>, vector<1x1x16x384xbf16>
      %47 = vector.shape_cast %46 : vector<1x1x16x384xbf16> to vector<16x384xbf16>
      %c160 = arith.constant 160 : index
      %c0_60 = arith.constant 0 : index
      %48 = vector.load %arg6[%c160, %c0_60] : memref<256x384xbf16, #tpu.memory_space<vmem>>, vector<16x384xbf16>
      tpu.vector_store %arg6[%c160, %c0_60], %47 {strides = array<i32>} : memref<256x384xbf16, #tpu.memory_space<vmem>>, vector<16x384xbf16>,
      %c0_61 = arith.constant 0 : index
      %c1_62 = arith.constant 1 : index
      %c0_63 = arith.constant 0 : index
      %c18_64 = arith.constant 18 : index
      %49 = vector.load %arg2[%c0_61, %c1_62, %c0_63, %c18_64] : memref<1x4x16x512xbf16, #tpu.memory_space<vmem>>, vector<1x1x16x384xbf16>
      %50 = vector.shape_cast %49 : vector<1x1x16x384xbf16> to vector<16x384xbf16>
      %c176 = arith.constant 176 : index
      %c0_65 = arith.constant 0 : index
      %51 = vector.load %arg6[%c176, %c0_65] : memref<256x384xbf16, #tpu.memory_space<vmem>>, vector<16x384xbf16>
      tpu.vector_store %arg6[%c176, %c0_65], %50 {strides = array<i32>} : memref<256x384xbf16, #tpu.memory_space<vmem>>, vector<16x384xbf16>,
      %c0_66 = arith.constant 0 : index
      %c2_67 = arith.constant 2 : index
      %c0_68 = arith.constant 0 : index
      %c17_69 = arith.constant 17 : index
      %52 = vector.load %arg2[%c0_66, %c2_67, %c0_68, %c17_69] : memref<1x4x16x512xbf16, #tpu.memory_space<vmem>>, vector<1x1x16x384xbf16>
      %53 = vector.shape_cast %52 : vector<1x1x16x384xbf16> to vector<16x384xbf16>
      %c192 = arith.constant 192 : index
      %c0_70 = arith.constant 0 : index
      %54 = vector.load %arg6[%c192, %c0_70] : memref<256x384xbf16, #tpu.memory_space<vmem>>, vector<16x384xbf16>
      tpu.vector_store %arg6[%c192, %c0_70], %53 {strides = array<i32>} : memref<256x384xbf16, #tpu.memory_space<vmem>>, vector<16x384xbf16>,
      %c0_71 = arith.constant 0 : index
      %c3_72 = arith.constant 3 : index
      %c0_73 = arith.constant 0 : index
      %c17_74 = arith.constant 17 : index
      %55 = vector.load %arg2[%c0_71, %c3_72, %c0_73, %c17_74] : memref<1x4x16x512xbf16, #tpu.memory_space<vmem>>, vector<1x1x16x384xbf16>
      %56 = vector.shape_cast %55 : vector<1x1x16x384xbf16> to vector<16x384xbf16>
      %c208 = arith.constant 208 : index
      %c0_75 = arith.constant 0 : index
      %57 = vector.load %arg6[%c208, %c0_75] : memref<256x384xbf16, #tpu.memory_space<vmem>>, vector<16x384xbf16>
      tpu.vector_store %arg6[%c208, %c0_75], %56 {strides = array<i32>} : memref<256x384xbf16, #tpu.memory_space<vmem>>, vector<16x384xbf16>,
      %c0_76 = arith.constant 0 : index
      %c2_77 = arith.constant 2 : index
      %c0_78 = arith.constant 0 : index
      %c18_79 = arith.constant 18 : index
      %58 = vector.load %arg2[%c0_76, %c2_77, %c0_78, %c18_79] : memref<1x4x16x512xbf16, #tpu.memory_space<vmem>>, vector<1x1x16x384xbf16>
      %59 = vector.shape_cast %58 : vector<1x1x16x384xbf16> to vector<16x384xbf16>
      %c224 = arith.constant 224 : index
      %c0_80 = arith.constant 0 : index
      %60 = vector.load %arg6[%c224, %c0_80] : memref<256x384xbf16, #tpu.memory_space<vmem>>, vector<16x384xbf16>
      tpu.vector_store %arg6[%c224, %c0_80], %59 {strides = array<i32>} : memref<256x384xbf16, #tpu.memory_space<vmem>>, vector<16x384xbf16>,
      %c0_81 = arith.constant 0 : index
      %c3_82 = arith.constant 3 : index
      %c0_83 = arith.constant 0 : index
      %c18_84 = arith.constant 18 : index
      %61 = vector.load %arg2[%c0_81, %c3_82, %c0_83, %c18_84] : memref<1x4x16x512xbf16, #tpu.memory_space<vmem>>, vector<1x1x16x384xbf16>
      %62 = vector.shape_cast %61 : vector<1x1x16x384xbf16> to vector<16x384xbf16>
      %c240 = arith.constant 240 : index
      %c0_85 = arith.constant 0 : index
      %63 = vector.load %arg6[%c240, %c0_85] : memref<256x384xbf16, #tpu.memory_space<vmem>>, vector<16x384xbf16>
      tpu.vector_store %arg6[%c240, %c0_85], %62 {strides = array<i32>} : memref<256x384xbf16, #tpu.memory_space<vmem>>, vector<16x384xbf16>,
    } else {
    }
    %c0 = arith.constant 0 : index
    %c0_1 = arith.constant 0 : index
    %3 = vector.load %arg3[%c0, %c0_1] : memref<16x256xbf16, #tpu.memory_space<vmem>>, vector<16x256xbf16>
    %c0_2 = arith.constant 0 : index
    %c0_3 = arith.constant 0 : index
    %4 = vector.load %arg6[%c0_2, %c0_3] : memref<256x384xbf16, #tpu.memory_space<vmem>>, vector<256x384xbf16>
    %cst = arith.constant dense<0.000000e+00> : vector<16x384xf32>
    %5 = tpu.matmul %3, %4, %cst {dimension_numbers = #tpu.dot_dimension_numbers<[1], [0], [0], [1], [0, 0, 1, 1], [], []>} : vector<16x256xbf16>, vector<256x384xbf16>, vector<16x384xf32> -> vector<16x384xf32>
    %c0_4 = arith.constant 0 : index
    %c0_5 = arith.constant 0 : index
    %6 = vector.load %arg4[%c0_4, %c0_5] : memref<16x1xf32, #tpu.memory_space<vmem>>, vector<16x1xf32>
    %7 = vector.broadcast %6 : vector<16x1xf32> to vector<16x384xf32>
    %8 = arith.addf %5, %7 : vector<16x384xf32>
    %cst_6 = arith.constant 2.000000e-01 : f32
    %9 = vector.broadcast %cst_6 : f32 to vector<16x384xf32>
    %10 = arith.mulf %9, %8 : vector<16x384xf32>
    %11 = arith.maximumf %8, %10 : vector<16x384xf32>
    %12 = arith.truncf %11 : vector<16x384xf32> to vector<16x384xbf16>
    %c0_7 = arith.constant 0 : index
    %c0_8 = arith.constant 0 : index
    %c0_9 = arith.constant 0 : index
    %13 = vector.load %arg5[%c0_7, %c0_8, %c0_9] : memref<1x16x384xbf16, #tpu.memory_space<vmem>>, vector<1x16x384xbf16>
    %14 = vector.shape_cast %13 : vector<1x16x384xbf16> to vector<16x384xbf16>
    %15 = vector.shape_cast %12 : vector<16x384xbf16> to vector<1x16x384xbf16>
    tpu.vector_store %arg5[%c0_7, %c0_8, %c0_9], %15 {strides = array<i32>} : memref<1x16x384xbf16, #tpu.memory_space<vmem>>, vector<1x16x384xbf16>,
    return
  }
  func.func @transform_0(%arg0: i32, %arg1: i32) -> (i32, i32, i32, i32) {
    %c0_i32 = arith.constant 0 : i32
    %c0_i32_0 = arith.constant 0 : i32
    %c0_i32_1 = arith.constant 0 : i32
    %c0_i32_2 = arith.constant 0 : i32
    return %arg0, %c0_i32, %c0_i32_0, %c0_i32_1 : i32, i32, i32, i32
  }
  func.func @transform_1(%arg0: i32, %arg1: i32) -> (i32, i32) {
    %c0_i32 = arith.constant 0 : i32
    %c0_i32_0 = arith.constant 0 : i32
    return %arg1, %c0_i32 : i32, i32
  }
  func.func @transform_2(%arg0: i32, %arg1: i32) -> (i32, i32) {
    %c0_i32 = arith.constant 0 : i32
    %c0_i32_0 = arith.constant 0 : i32
    return %arg1, %c0_i32 : i32, i32
  }
  func.func @transform_3(%arg0: i32, %arg1: i32) -> (i32, i32, i32) {
    %c0_i32 = arith.constant 0 : i32
    %c0_i32_0 = arith.constant 0 : i32
    return %arg0, %arg1, %c0_i32 : i32, i32, i32
  }
}

module attributes {stable_mosaic.version = 11 : i64} {
  func.func @kernel(%arg0: i32, %arg1: i32, %arg2: memref<1x4x16x256xbf16, #tpu.memory_space<vmem>>, %arg3: memref<16x256xbf16, #tpu.memory_space<vmem>>, %arg4: memref<1x16x128xbf16, #tpu.memory_space<vmem>>, %arg5: memref<256x128xbf16, #tpu.memory_space<vmem>>) attributes {dimension_semantics = [#tpu.dimension_semantics<parallel>, #tpu.dimension_semantics<arbitrary>], iteration_bounds = array<i64: 2, 1>, scalar_prefetch = 0 : i64, scratch_operands = 1 : i64, tpu.core_type = #tpu.core_type<tc>, window_params = [{transform_indices = @transform_0, window_bounds = array<i64: 1, 4, 16, 256>}, {transform_indices = @transform_1, window_bounds = array<i64: 16, 256>}, {transform_indices = @transform_2, window_bounds = array<i64: 1, 16, 128>}]} {
    %c0_i32 = arith.constant 0 : i32
    %0 = arith.cmpi eq, %arg1, %c0_i32 : i32
    %1 = arith.extui %0 : i1 to i32
    %c0_i32_0 = arith.constant 0 : i32
    %2 = arith.cmpi ne, %1, %c0_i32_0 : i32
    scf.if %2 {
      %c0_19 = arith.constant 0 : index
      %c0_20 = arith.constant 0 : index
      %c0_21 = arith.constant 0 : index
      %c0_22 = arith.constant 0 : index
      %59 = vector.load %arg2[%c0_19, %c0_20, %c0_21, %c0_22] : memref<1x4x16x256xbf16, #tpu.memory_space<vmem>>, vector<1x1x16x128xbf16>
      %60 = vector.shape_cast %59 : vector<1x1x16x128xbf16> to vector<16x128xbf16>
      %c0_23 = arith.constant 0 : index
      %c0_24 = arith.constant 0 : index
      %61 = vector.load %arg5[%c0_23, %c0_24] : memref<256x128xbf16, #tpu.memory_space<vmem>>, vector<16x128xbf16>
      tpu.vector_store %arg5[%c0_23, %c0_24], %60 {strides = array<i32>} : memref<256x128xbf16, #tpu.memory_space<vmem>>, vector<16x128xbf16>,
      %c0_25 = arith.constant 0 : index
      %c1 = arith.constant 1 : index
      %c0_26 = arith.constant 0 : index
      %c0_27 = arith.constant 0 : index
      %62 = vector.load %arg2[%c0_25, %c1, %c0_26, %c0_27] : memref<1x4x16x256xbf16, #tpu.memory_space<vmem>>, vector<1x1x16x128xbf16>
      %63 = vector.shape_cast %62 : vector<1x1x16x128xbf16> to vector<16x128xbf16>
      %c16 = arith.constant 16 : index
      %c0_28 = arith.constant 0 : index
      %64 = vector.load %arg5[%c16, %c0_28] : memref<256x128xbf16, #tpu.memory_space<vmem>>, vector<16x128xbf16>
      tpu.vector_store %arg5[%c16, %c0_28], %63 {strides = array<i32>} : memref<256x128xbf16, #tpu.memory_space<vmem>>, vector<16x128xbf16>,
      %c0_29 = arith.constant 0 : index
      %c0_30 = arith.constant 0 : index
      %c0_31 = arith.constant 0 : index
      %c1_32 = arith.constant 1 : index
      %65 = vector.load %arg2[%c0_29, %c0_30, %c0_31, %c1_32] : memref<1x4x16x256xbf16, #tpu.memory_space<vmem>>, vector<1x1x16x128xbf16>
      %66 = vector.shape_cast %65 : vector<1x1x16x128xbf16> to vector<16x128xbf16>
      %c32 = arith.constant 32 : index
      %c0_33 = arith.constant 0 : index
      %67 = vector.load %arg5[%c32, %c0_33] : memref<256x128xbf16, #tpu.memory_space<vmem>>, vector<16x128xbf16>
      tpu.vector_store %arg5[%c32, %c0_33], %66 {strides = array<i32>} : memref<256x128xbf16, #tpu.memory_space<vmem>>, vector<16x128xbf16>,
      %c0_34 = arith.constant 0 : index
      %c1_35 = arith.constant 1 : index
      %c0_36 = arith.constant 0 : index
      %c1_37 = arith.constant 1 : index
      %68 = vector.load %arg2[%c0_34, %c1_35, %c0_36, %c1_37] : memref<1x4x16x256xbf16, #tpu.memory_space<vmem>>, vector<1x1x16x128xbf16>
      %69 = vector.shape_cast %68 : vector<1x1x16x128xbf16> to vector<16x128xbf16>
      %c48 = arith.constant 48 : index
      %c0_38 = arith.constant 0 : index
      %70 = vector.load %arg5[%c48, %c0_38] : memref<256x128xbf16, #tpu.memory_space<vmem>>, vector<16x128xbf16>
      tpu.vector_store %arg5[%c48, %c0_38], %69 {strides = array<i32>} : memref<256x128xbf16, #tpu.memory_space<vmem>>, vector<16x128xbf16>,
      %c0_39 = arith.constant 0 : index
      %c2 = arith.constant 2 : index
      %c0_40 = arith.constant 0 : index
      %c0_41 = arith.constant 0 : index
      %71 = vector.load %arg2[%c0_39, %c2, %c0_40, %c0_41] : memref<1x4x16x256xbf16, #tpu.memory_space<vmem>>, vector<1x1x16x128xbf16>
      %72 = vector.shape_cast %71 : vector<1x1x16x128xbf16> to vector<16x128xbf16>
      %c64 = arith.constant 64 : index
      %c0_42 = arith.constant 0 : index
      %73 = vector.load %arg5[%c64, %c0_42] : memref<256x128xbf16, #tpu.memory_space<vmem>>, vector<16x128xbf16>
      tpu.vector_store %arg5[%c64, %c0_42], %72 {strides = array<i32>} : memref<256x128xbf16, #tpu.memory_space<vmem>>, vector<16x128xbf16>,
      %c0_43 = arith.constant 0 : index
      %c3 = arith.constant 3 : index
      %c0_44 = arith.constant 0 : index
      %c0_45 = arith.constant 0 : index
      %74 = vector.load %arg2[%c0_43, %c3, %c0_44, %c0_45] : memref<1x4x16x256xbf16, #tpu.memory_space<vmem>>, vector<1x1x16x128xbf16>
      %75 = vector.shape_cast %74 : vector<1x1x16x128xbf16> to vector<16x128xbf16>
      %c80 = arith.constant 80 : index
      %c0_46 = arith.constant 0 : index
      %76 = vector.load %arg5[%c80, %c0_46] : memref<256x128xbf16, #tpu.memory_space<vmem>>, vector<16x128xbf16>
      tpu.vector_store %arg5[%c80, %c0_46], %75 {strides = array<i32>} : memref<256x128xbf16, #tpu.memory_space<vmem>>, vector<16x128xbf16>,
      %c0_47 = arith.constant 0 : index
      %c2_48 = arith.constant 2 : index
      %c0_49 = arith.constant 0 : index
      %c1_50 = arith.constant 1 : index
      %77 = vector.load %arg2[%c0_47, %c2_48, %c0_49, %c1_50] : memref<1x4x16x256xbf16, #tpu.memory_space<vmem>>, vector<1x1x16x128xbf16>
      %78 = vector.shape_cast %77 : vector<1x1x16x128xbf16> to vector<16x128xbf16>
      %c96 = arith.constant 96 : index
      %c0_51 = arith.constant 0 : index
      %79 = vector.load %arg5[%c96, %c0_51] : memref<256x128xbf16, #tpu.memory_space<vmem>>, vector<16x128xbf16>
      tpu.vector_store %arg5[%c96, %c0_51], %78 {strides = array<i32>} : memref<256x128xbf16, #tpu.memory_space<vmem>>, vector<16x128xbf16>,
      %c0_52 = arith.constant 0 : index
      %c3_53 = arith.constant 3 : index
      %c0_54 = arith.constant 0 : index
      %c1_55 = arith.constant 1 : index
      %80 = vector.load %arg2[%c0_52, %c3_53, %c0_54, %c1_55] : memref<1x4x16x256xbf16, #tpu.memory_space<vmem>>, vector<1x1x16x128xbf16>
      %81 = vector.shape_cast %80 : vector<1x1x16x128xbf16> to vector<16x128xbf16>
      %c112 = arith.constant 112 : index
      %c0_56 = arith.constant 0 : index
      %82 = vector.load %arg5[%c112, %c0_56] : memref<256x128xbf16, #tpu.memory_space<vmem>>, vector<16x128xbf16>
      tpu.vector_store %arg5[%c112, %c0_56], %81 {strides = array<i32>} : memref<256x128xbf16, #tpu.memory_space<vmem>>, vector<16x128xbf16>,
      %c0_57 = arith.constant 0 : index
      %c0_58 = arith.constant 0 : index
      %c0_59 = arith.constant 0 : index
      %c9 = arith.constant 9 : index
      %83 = vector.load %arg2[%c0_57, %c0_58, %c0_59, %c9] : memref<1x4x16x256xbf16, #tpu.memory_space<vmem>>, vector<1x1x16x128xbf16>
      %84 = vector.shape_cast %83 : vector<1x1x16x128xbf16> to vector<16x128xbf16>
      %c128 = arith.constant 128 : index
      %c0_60 = arith.constant 0 : index
      %85 = vector.load %arg5[%c128, %c0_60] : memref<256x128xbf16, #tpu.memory_space<vmem>>, vector<16x128xbf16>
      tpu.vector_store %arg5[%c128, %c0_60], %84 {strides = array<i32>} : memref<256x128xbf16, #tpu.memory_space<vmem>>, vector<16x128xbf16>,
      %c0_61 = arith.constant 0 : index
      %c1_62 = arith.constant 1 : index
      %c0_63 = arith.constant 0 : index
      %c9_64 = arith.constant 9 : index
      %86 = vector.load %arg2[%c0_61, %c1_62, %c0_63, %c9_64] : memref<1x4x16x256xbf16, #tpu.memory_space<vmem>>, vector<1x1x16x128xbf16>
      %87 = vector.shape_cast %86 : vector<1x1x16x128xbf16> to vector<16x128xbf16>
      %c144 = arith.constant 144 : index
      %c0_65 = arith.constant 0 : index
      %88 = vector.load %arg5[%c144, %c0_65] : memref<256x128xbf16, #tpu.memory_space<vmem>>, vector<16x128xbf16>
      tpu.vector_store %arg5[%c144, %c0_65], %87 {strides = array<i32>} : memref<256x128xbf16, #tpu.memory_space<vmem>>, vector<16x128xbf16>,
      %c0_66 = arith.constant 0 : index
      %c0_67 = arith.constant 0 : index
      %c0_68 = arith.constant 0 : index
      %c10 = arith.constant 10 : index
      %89 = vector.load %arg2[%c0_66, %c0_67, %c0_68, %c10] : memref<1x4x16x256xbf16, #tpu.memory_space<vmem>>, vector<1x1x16x128xbf16>
      %90 = vector.shape_cast %89 : vector<1x1x16x128xbf16> to vector<16x128xbf16>
      %c160 = arith.constant 160 : index
      %c0_69 = arith.constant 0 : index
      %91 = vector.load %arg5[%c160, %c0_69] : memref<256x128xbf16, #tpu.memory_space<vmem>>, vector<16x128xbf16>
      tpu.vector_store %arg5[%c160, %c0_69], %90 {strides = array<i32>} : memref<256x128xbf16, #tpu.memory_space<vmem>>, vector<16x128xbf16>,
      %c0_70 = arith.constant 0 : index
      %c1_71 = arith.constant 1 : index
      %c0_72 = arith.constant 0 : index
      %c10_73 = arith.constant 10 : index
      %92 = vector.load %arg2[%c0_70, %c1_71, %c0_72, %c10_73] : memref<1x4x16x256xbf16, #tpu.memory_space<vmem>>, vector<1x1x16x128xbf16>
      %93 = vector.shape_cast %92 : vector<1x1x16x128xbf16> to vector<16x128xbf16>
      %c176 = arith.constant 176 : index
      %c0_74 = arith.constant 0 : index
      %94 = vector.load %arg5[%c176, %c0_74] : memref<256x128xbf16, #tpu.memory_space<vmem>>, vector<16x128xbf16>
      tpu.vector_store %arg5[%c176, %c0_74], %93 {strides = array<i32>} : memref<256x128xbf16, #tpu.memory_space<vmem>>, vector<16x128xbf16>,
      %c0_75 = arith.constant 0 : index
      %c2_76 = arith.constant 2 : index
      %c0_77 = arith.constant 0 : index
      %c9_78 = arith.constant 9 : index
      %95 = vector.load %arg2[%c0_75, %c2_76, %c0_77, %c9_78] : memref<1x4x16x256xbf16, #tpu.memory_space<vmem>>, vector<1x1x16x128xbf16>
      %96 = vector.shape_cast %95 : vector<1x1x16x128xbf16> to vector<16x128xbf16>
      %c192 = arith.constant 192 : index
      %c0_79 = arith.constant 0 : index
      %97 = vector.load %arg5[%c192, %c0_79] : memref<256x128xbf16, #tpu.memory_space<vmem>>, vector<16x128xbf16>
      tpu.vector_store %arg5[%c192, %c0_79], %96 {strides = array<i32>} : memref<256x128xbf16, #tpu.memory_space<vmem>>, vector<16x128xbf16>,
      %c0_80 = arith.constant 0 : index
      %c3_81 = arith.constant 3 : index
      %c0_82 = arith.constant 0 : index
      %c9_83 = arith.constant 9 : index
      %98 = vector.load %arg2[%c0_80, %c3_81, %c0_82, %c9_83] : memref<1x4x16x256xbf16, #tpu.memory_space<vmem>>, vector<1x1x16x128xbf16>
      %99 = vector.shape_cast %98 : vector<1x1x16x128xbf16> to vector<16x128xbf16>
      %c208 = arith.constant 208 : index
      %c0_84 = arith.constant 0 : index
      %100 = vector.load %arg5[%c208, %c0_84] : memref<256x128xbf16, #tpu.memory_space<vmem>>, vector<16x128xbf16>
      tpu.vector_store %arg5[%c208, %c0_84], %99 {strides = array<i32>} : memref<256x128xbf16, #tpu.memory_space<vmem>>, vector<16x128xbf16>,
      %c0_85 = arith.constant 0 : index
      %c2_86 = arith.constant 2 : index
      %c0_87 = arith.constant 0 : index
      %c10_88 = arith.constant 10 : index
      %101 = vector.load %arg2[%c0_85, %c2_86, %c0_87, %c10_88] : memref<1x4x16x256xbf16, #tpu.memory_space<vmem>>, vector<1x1x16x128xbf16>
      %102 = vector.shape_cast %101 : vector<1x1x16x128xbf16> to vector<16x128xbf16>
      %c224 = arith.constant 224 : index
      %c0_89 = arith.constant 0 : index
      %103 = vector.load %arg5[%c224, %c0_89] : memref<256x128xbf16, #tpu.memory_space<vmem>>, vector<16x128xbf16>
      tpu.vector_store %arg5[%c224, %c0_89], %102 {strides = array<i32>} : memref<256x128xbf16, #tpu.memory_space<vmem>>, vector<16x128xbf16>,
      %c0_90 = arith.constant 0 : index
      %c3_91 = arith.constant 3 : index
      %c0_92 = arith.constant 0 : index
      %c10_93 = arith.constant 10 : index
      %104 = vector.load %arg2[%c0_90, %c3_91, %c0_92, %c10_93] : memref<1x4x16x256xbf16, #tpu.memory_space<vmem>>, vector<1x1x16x128xbf16>
      %105 = vector.shape_cast %104 : vector<1x1x16x128xbf16> to vector<16x128xbf16>
      %c240 = arith.constant 240 : index
      %c0_94 = arith.constant 0 : index
      %106 = vector.load %arg5[%c240, %c0_94] : memref<256x128xbf16, #tpu.memory_space<vmem>>, vector<16x128xbf16>
      tpu.vector_store %arg5[%c240, %c0_94], %105 {strides = array<i32>} : memref<256x128xbf16, #tpu.memory_space<vmem>>, vector<16x128xbf16>,
    } else {
    }
    %c0 = arith.constant 0 : index
    %c0_1 = arith.constant 0 : index
    %3 = vector.load %arg3[%c0, %c0_1] : memref<16x256xbf16, #tpu.memory_space<vmem>>, vector<16x256xbf16>
    %c0_2 = arith.constant 0 : index
    %c0_3 = arith.constant 0 : index
    %4 = vector.load %arg5[%c0_2, %c0_3] : memref<256x128xbf16, #tpu.memory_space<vmem>>, vector<256x128xbf16>
    %cst = arith.constant dense<0.000000e+00> : vector<16x128xf32>
    %5 = tpu.matmul %3, %4, %cst {dimension_numbers = #tpu.dot_dimension_numbers<[1], [0], [0], [1], [0, 0, 1, 1], [], []>} : vector<16x256xbf16>, vector<256x128xbf16>, vector<16x128xf32> -> vector<16x128xf32>
    %6 = tpu.iota {dimensions = array<i32: 1>} : vector<1x128xi32>
    %c9_i32 = arith.constant 9 : i32
    %c0_i32_4 = arith.constant 0 : i32
    %7 = arith.cmpi eq, %c9_i32, %c0_i32_4 : i32
    %c1_i32 = arith.constant 1 : i32
    %8 = arith.select %7, %c1_i32, %c9_i32 : i32
    %9 = vector.broadcast %8 : i32 to vector<1x128xi32>
    %10 = arith.remsi %6, %9 : vector<1x128xi32>
    %c0_i32_5 = arith.constant 0 : i32
    %11 = vector.broadcast %c0_i32_5 : i32 to vector<1x128xi32>
    %12 = arith.cmpi ne, %10, %11 : vector<1x128xi32>
    %c0_i32_6 = arith.constant 0 : i32
    %13 = vector.broadcast %c0_i32_6 : i32 to vector<1x128xi32>
    %14 = arith.cmpi slt, %10, %13 : vector<1x128xi32>
    %c0_i32_7 = arith.constant 0 : i32
    %15 = arith.cmpi slt, %8, %c0_i32_7 : i32
    %16 = vector.broadcast %15 : i1 to vector<1x128xi1>
    %17 = vector.broadcast %16 : vector<1x128xi1> to vector<1x128xi1>
    %18 = arith.xori %14, %17 : vector<1x128xi1>
    %19 = arith.andi %18, %12 : vector<1x128xi1>
    %20 = vector.broadcast %8 : i32 to vector<1x128xi32>
    %21 = arith.addi %10, %20 : vector<1x128xi32>
    %22 = arith.select %19, %21, %10 : vector<1x128xi1>, vector<1x128xi32>
    %c8_i32 = arith.constant 8 : i32
    %23 = vector.broadcast %c8_i32 : i32 to vector<1x128xi32>
    %24 = arith.cmpi slt, %22, %23 : vector<1x128xi32>
    %c72_i32 = arith.constant 72 : i32
    %25 = vector.broadcast %c72_i32 : i32 to vector<1x128xi32>
    %26 = arith.cmpi slt, %6, %25 : vector<1x128xi32>
    %27 = arith.andi %24, %26 : vector<1x128xi1>
    %cst_8 = arith.constant 0.000000e+00 : f32
    %28 = vector.shape_cast %27 : vector<1x128xi1> to vector<1x128xi1>
    %29 = vector.broadcast %28 : vector<1x128xi1> to vector<16x128xi1>
    %30 = vector.broadcast %cst_8 : f32 to vector<16x128xf32>
    %31 = arith.select %29, %5, %30 : vector<16x128xi1>, vector<16x128xf32>
    %cst_9 = arith.constant dense<0.000000e+00> : vector<16xf32>
    %32 = vector.multi_reduction <add>, %31, %cst_9 [1] : vector<16x128xf32> to vector<16xf32>
    %33 = vector.shape_cast %32 : vector<16xf32> to vector<16x1xf32>
    %34 = arith.mulf %31, %31 : vector<16x128xf32>
    %cst_10 = arith.constant dense<0.000000e+00> : vector<16xf32>
    %35 = vector.multi_reduction <add>, %34, %cst_10 [1] : vector<16x128xf32> to vector<16xf32>
    %36 = vector.shape_cast %35 : vector<16xf32> to vector<16x1xf32>
    %cst_11 = arith.constant 1.562500e-02 : f32
    %37 = vector.broadcast %cst_11 : f32 to vector<16x1xf32>
    %38 = arith.mulf %33, %37 : vector<16x1xf32>
    %cst_12 = arith.constant 1.562500e-02 : f32
    %39 = vector.broadcast %cst_12 : f32 to vector<16x1xf32>
    %40 = arith.mulf %36, %39 : vector<16x1xf32>
    %41 = arith.mulf %38, %38 : vector<16x1xf32>
    %42 = arith.subf %40, %41 : vector<16x1xf32>
    %cst_13 = arith.constant 0.000000e+00 : f32
    %43 = vector.broadcast %cst_13 : f32 to vector<16x1xf32>
    %44 = arith.maximumf %42, %43 : vector<16x1xf32>
    %45 = vector.broadcast %38 : vector<16x1xf32> to vector<16x128xf32>
    %46 = arith.subf %5, %45 : vector<16x128xf32>
    %cst_14 = arith.constant 9.99999974E-6 : f32
    %47 = vector.broadcast %cst_14 : f32 to vector<16x1xf32>
    %48 = arith.addf %44, %47 : vector<16x1xf32>
    %49 = math.rsqrt %48 : vector<16x1xf32>
    %50 = vector.broadcast %49 : vector<16x1xf32> to vector<16x128xf32>
    %51 = arith.mulf %46, %50 : vector<16x128xf32>
    %cst_15 = arith.constant 2.000000e-01 : f32
    %52 = vector.broadcast %cst_15 : f32 to vector<16x128xf32>
    %53 = arith.mulf %52, %51 : vector<16x128xf32>
    %54 = arith.maximumf %51, %53 : vector<16x128xf32>
    %55 = arith.truncf %54 : vector<16x128xf32> to vector<16x128xbf16>
    %c0_16 = arith.constant 0 : index
    %c0_17 = arith.constant 0 : index
    %c0_18 = arith.constant 0 : index
    %56 = vector.load %arg4[%c0_16, %c0_17, %c0_18] : memref<1x16x128xbf16, #tpu.memory_space<vmem>>, vector<1x16x128xbf16>
    %57 = vector.shape_cast %56 : vector<1x16x128xbf16> to vector<16x128xbf16>
    %58 = vector.shape_cast %55 : vector<16x128xbf16> to vector<1x16x128xbf16>
    tpu.vector_store %arg4[%c0_16, %c0_17, %c0_18], %58 {strides = array<i32>} : memref<1x16x128xbf16, #tpu.memory_space<vmem>>, vector<1x16x128xbf16>,
    return
  }
  func.func @transform_0(%arg0: i32, %arg1: i32) -> (i32, i32, i32, i32) {
    %c0_i32 = arith.constant 0 : i32
    %c0_i32_0 = arith.constant 0 : i32
    %c0_i32_1 = arith.constant 0 : i32
    %c0_i32_2 = arith.constant 0 : i32
    return %arg0, %c0_i32, %c0_i32_0, %c0_i32_1 : i32, i32, i32, i32
  }
  func.func @transform_1(%arg0: i32, %arg1: i32) -> (i32, i32) {
    %c0_i32 = arith.constant 0 : i32
    %c0_i32_0 = arith.constant 0 : i32
    return %arg1, %c0_i32 : i32, i32
  }
  func.func @transform_2(%arg0: i32, %arg1: i32) -> (i32, i32, i32) {
    %c0_i32 = arith.constant 0 : i32
    %c0_i32_0 = arith.constant 0 : i32
    return %arg0, %arg1, %c0_i32 : i32, i32, i32
  }
}

module attributes {stable_mosaic.version = 11 : i64} {
  func.func @kernel(%arg0: i32, %arg1: i32, %arg2: memref<1x4x16x256xbf16, #tpu.memory_space<vmem>>, %arg3: memref<32x256xbf16, #tpu.memory_space<vmem>>, %arg4: memref<1x32x128xbf16, #tpu.memory_space<vmem>>, %arg5: memref<256x128xbf16, #tpu.memory_space<vmem>>) attributes {dimension_semantics = [#tpu.dimension_semantics<parallel>, #tpu.dimension_semantics<arbitrary>], iteration_bounds = array<i64: 2, 1>, scalar_prefetch = 0 : i64, scratch_operands = 1 : i64, tpu.core_type = #tpu.core_type<tc>, window_params = [{transform_indices = @transform_0, window_bounds = array<i64: 1, 4, 16, 256>}, {transform_indices = @transform_1, window_bounds = array<i64: 32, 256>}, {transform_indices = @transform_2, window_bounds = array<i64: 1, 32, 128>}]} {
    %c0_i32 = arith.constant 0 : i32
    %0 = arith.cmpi eq, %arg1, %c0_i32 : i32
    %1 = arith.extui %0 : i1 to i32
    %c0_i32_0 = arith.constant 0 : i32
    %2 = arith.cmpi ne, %1, %c0_i32_0 : i32
    scf.if %2 {
      %c0_19 = arith.constant 0 : index
      %c0_20 = arith.constant 0 : index
      %c0_21 = arith.constant 0 : index
      %c0_22 = arith.constant 0 : index
      %59 = vector.load %arg2[%c0_19, %c0_20, %c0_21, %c0_22] : memref<1x4x16x256xbf16, #tpu.memory_space<vmem>>, vector<1x1x16x128xbf16>
      %60 = vector.shape_cast %59 : vector<1x1x16x128xbf16> to vector<16x128xbf16>
      %c0_23 = arith.constant 0 : index
      %c0_24 = arith.constant 0 : index
      %61 = vector.load %arg5[%c0_23, %c0_24] : memref<256x128xbf16, #tpu.memory_space<vmem>>, vector<16x128xbf16>
      tpu.vector_store %arg5[%c0_23, %c0_24], %60 {strides = array<i32>} : memref<256x128xbf16, #tpu.memory_space<vmem>>, vector<16x128xbf16>,
      %c0_25 = arith.constant 0 : index
      %c1 = arith.constant 1 : index
      %c0_26 = arith.constant 0 : index
      %c0_27 = arith.constant 0 : index
      %62 = vector.load %arg2[%c0_25, %c1, %c0_26, %c0_27] : memref<1x4x16x256xbf16, #tpu.memory_space<vmem>>, vector<1x1x16x128xbf16>
      %63 = vector.shape_cast %62 : vector<1x1x16x128xbf16> to vector<16x128xbf16>
      %c16 = arith.constant 16 : index
      %c0_28 = arith.constant 0 : index
      %64 = vector.load %arg5[%c16, %c0_28] : memref<256x128xbf16, #tpu.memory_space<vmem>>, vector<16x128xbf16>
      tpu.vector_store %arg5[%c16, %c0_28], %63 {strides = array<i32>} : memref<256x128xbf16, #tpu.memory_space<vmem>>, vector<16x128xbf16>,
      %c0_29 = arith.constant 0 : index
      %c0_30 = arith.constant 0 : index
      %c0_31 = arith.constant 0 : index
      %c1_32 = arith.constant 1 : index
      %65 = vector.load %arg2[%c0_29, %c0_30, %c0_31, %c1_32] : memref<1x4x16x256xbf16, #tpu.memory_space<vmem>>, vector<1x1x16x128xbf16>
      %66 = vector.shape_cast %65 : vector<1x1x16x128xbf16> to vector<16x128xbf16>
      %c32 = arith.constant 32 : index
      %c0_33 = arith.constant 0 : index
      %67 = vector.load %arg5[%c32, %c0_33] : memref<256x128xbf16, #tpu.memory_space<vmem>>, vector<16x128xbf16>
      tpu.vector_store %arg5[%c32, %c0_33], %66 {strides = array<i32>} : memref<256x128xbf16, #tpu.memory_space<vmem>>, vector<16x128xbf16>,
      %c0_34 = arith.constant 0 : index
      %c1_35 = arith.constant 1 : index
      %c0_36 = arith.constant 0 : index
      %c1_37 = arith.constant 1 : index
      %68 = vector.load %arg2[%c0_34, %c1_35, %c0_36, %c1_37] : memref<1x4x16x256xbf16, #tpu.memory_space<vmem>>, vector<1x1x16x128xbf16>
      %69 = vector.shape_cast %68 : vector<1x1x16x128xbf16> to vector<16x128xbf16>
      %c48 = arith.constant 48 : index
      %c0_38 = arith.constant 0 : index
      %70 = vector.load %arg5[%c48, %c0_38] : memref<256x128xbf16, #tpu.memory_space<vmem>>, vector<16x128xbf16>
      tpu.vector_store %arg5[%c48, %c0_38], %69 {strides = array<i32>} : memref<256x128xbf16, #tpu.memory_space<vmem>>, vector<16x128xbf16>,
      %c0_39 = arith.constant 0 : index
      %c2 = arith.constant 2 : index
      %c0_40 = arith.constant 0 : index
      %c0_41 = arith.constant 0 : index
      %71 = vector.load %arg2[%c0_39, %c2, %c0_40, %c0_41] : memref<1x4x16x256xbf16, #tpu.memory_space<vmem>>, vector<1x1x16x128xbf16>
      %72 = vector.shape_cast %71 : vector<1x1x16x128xbf16> to vector<16x128xbf16>
      %c64 = arith.constant 64 : index
      %c0_42 = arith.constant 0 : index
      %73 = vector.load %arg5[%c64, %c0_42] : memref<256x128xbf16, #tpu.memory_space<vmem>>, vector<16x128xbf16>
      tpu.vector_store %arg5[%c64, %c0_42], %72 {strides = array<i32>} : memref<256x128xbf16, #tpu.memory_space<vmem>>, vector<16x128xbf16>,
      %c0_43 = arith.constant 0 : index
      %c3 = arith.constant 3 : index
      %c0_44 = arith.constant 0 : index
      %c0_45 = arith.constant 0 : index
      %74 = vector.load %arg2[%c0_43, %c3, %c0_44, %c0_45] : memref<1x4x16x256xbf16, #tpu.memory_space<vmem>>, vector<1x1x16x128xbf16>
      %75 = vector.shape_cast %74 : vector<1x1x16x128xbf16> to vector<16x128xbf16>
      %c80 = arith.constant 80 : index
      %c0_46 = arith.constant 0 : index
      %76 = vector.load %arg5[%c80, %c0_46] : memref<256x128xbf16, #tpu.memory_space<vmem>>, vector<16x128xbf16>
      tpu.vector_store %arg5[%c80, %c0_46], %75 {strides = array<i32>} : memref<256x128xbf16, #tpu.memory_space<vmem>>, vector<16x128xbf16>,
      %c0_47 = arith.constant 0 : index
      %c2_48 = arith.constant 2 : index
      %c0_49 = arith.constant 0 : index
      %c1_50 = arith.constant 1 : index
      %77 = vector.load %arg2[%c0_47, %c2_48, %c0_49, %c1_50] : memref<1x4x16x256xbf16, #tpu.memory_space<vmem>>, vector<1x1x16x128xbf16>
      %78 = vector.shape_cast %77 : vector<1x1x16x128xbf16> to vector<16x128xbf16>
      %c96 = arith.constant 96 : index
      %c0_51 = arith.constant 0 : index
      %79 = vector.load %arg5[%c96, %c0_51] : memref<256x128xbf16, #tpu.memory_space<vmem>>, vector<16x128xbf16>
      tpu.vector_store %arg5[%c96, %c0_51], %78 {strides = array<i32>} : memref<256x128xbf16, #tpu.memory_space<vmem>>, vector<16x128xbf16>,
      %c0_52 = arith.constant 0 : index
      %c3_53 = arith.constant 3 : index
      %c0_54 = arith.constant 0 : index
      %c1_55 = arith.constant 1 : index
      %80 = vector.load %arg2[%c0_52, %c3_53, %c0_54, %c1_55] : memref<1x4x16x256xbf16, #tpu.memory_space<vmem>>, vector<1x1x16x128xbf16>
      %81 = vector.shape_cast %80 : vector<1x1x16x128xbf16> to vector<16x128xbf16>
      %c112 = arith.constant 112 : index
      %c0_56 = arith.constant 0 : index
      %82 = vector.load %arg5[%c112, %c0_56] : memref<256x128xbf16, #tpu.memory_space<vmem>>, vector<16x128xbf16>
      tpu.vector_store %arg5[%c112, %c0_56], %81 {strides = array<i32>} : memref<256x128xbf16, #tpu.memory_space<vmem>>, vector<16x128xbf16>,
      %c0_57 = arith.constant 0 : index
      %c0_58 = arith.constant 0 : index
      %c0_59 = arith.constant 0 : index
      %c5 = arith.constant 5 : index
      %83 = vector.load %arg2[%c0_57, %c0_58, %c0_59, %c5] : memref<1x4x16x256xbf16, #tpu.memory_space<vmem>>, vector<1x1x16x128xbf16>
      %84 = vector.shape_cast %83 : vector<1x1x16x128xbf16> to vector<16x128xbf16>
      %c128 = arith.constant 128 : index
      %c0_60 = arith.constant 0 : index
      %85 = vector.load %arg5[%c128, %c0_60] : memref<256x128xbf16, #tpu.memory_space<vmem>>, vector<16x128xbf16>
      tpu.vector_store %arg5[%c128, %c0_60], %84 {strides = array<i32>} : memref<256x128xbf16, #tpu.memory_space<vmem>>, vector<16x128xbf16>,
      %c0_61 = arith.constant 0 : index
      %c1_62 = arith.constant 1 : index
      %c0_63 = arith.constant 0 : index
      %c5_64 = arith.constant 5 : index
      %86 = vector.load %arg2[%c0_61, %c1_62, %c0_63, %c5_64] : memref<1x4x16x256xbf16, #tpu.memory_space<vmem>>, vector<1x1x16x128xbf16>
      %87 = vector.shape_cast %86 : vector<1x1x16x128xbf16> to vector<16x128xbf16>
      %c144 = arith.constant 144 : index
      %c0_65 = arith.constant 0 : index
      %88 = vector.load %arg5[%c144, %c0_65] : memref<256x128xbf16, #tpu.memory_space<vmem>>, vector<16x128xbf16>
      tpu.vector_store %arg5[%c144, %c0_65], %87 {strides = array<i32>} : memref<256x128xbf16, #tpu.memory_space<vmem>>, vector<16x128xbf16>,
      %c0_66 = arith.constant 0 : index
      %c0_67 = arith.constant 0 : index
      %c0_68 = arith.constant 0 : index
      %c6 = arith.constant 6 : index
      %89 = vector.load %arg2[%c0_66, %c0_67, %c0_68, %c6] : memref<1x4x16x256xbf16, #tpu.memory_space<vmem>>, vector<1x1x16x128xbf16>
      %90 = vector.shape_cast %89 : vector<1x1x16x128xbf16> to vector<16x128xbf16>
      %c160 = arith.constant 160 : index
      %c0_69 = arith.constant 0 : index
      %91 = vector.load %arg5[%c160, %c0_69] : memref<256x128xbf16, #tpu.memory_space<vmem>>, vector<16x128xbf16>
      tpu.vector_store %arg5[%c160, %c0_69], %90 {strides = array<i32>} : memref<256x128xbf16, #tpu.memory_space<vmem>>, vector<16x128xbf16>,
      %c0_70 = arith.constant 0 : index
      %c1_71 = arith.constant 1 : index
      %c0_72 = arith.constant 0 : index
      %c6_73 = arith.constant 6 : index
      %92 = vector.load %arg2[%c0_70, %c1_71, %c0_72, %c6_73] : memref<1x4x16x256xbf16, #tpu.memory_space<vmem>>, vector<1x1x16x128xbf16>
      %93 = vector.shape_cast %92 : vector<1x1x16x128xbf16> to vector<16x128xbf16>
      %c176 = arith.constant 176 : index
      %c0_74 = arith.constant 0 : index
      %94 = vector.load %arg5[%c176, %c0_74] : memref<256x128xbf16, #tpu.memory_space<vmem>>, vector<16x128xbf16>
      tpu.vector_store %arg5[%c176, %c0_74], %93 {strides = array<i32>} : memref<256x128xbf16, #tpu.memory_space<vmem>>, vector<16x128xbf16>,
      %c0_75 = arith.constant 0 : index
      %c2_76 = arith.constant 2 : index
      %c0_77 = arith.constant 0 : index
      %c5_78 = arith.constant 5 : index
      %95 = vector.load %arg2[%c0_75, %c2_76, %c0_77, %c5_78] : memref<1x4x16x256xbf16, #tpu.memory_space<vmem>>, vector<1x1x16x128xbf16>
      %96 = vector.shape_cast %95 : vector<1x1x16x128xbf16> to vector<16x128xbf16>
      %c192 = arith.constant 192 : index
      %c0_79 = arith.constant 0 : index
      %97 = vector.load %arg5[%c192, %c0_79] : memref<256x128xbf16, #tpu.memory_space<vmem>>, vector<16x128xbf16>
      tpu.vector_store %arg5[%c192, %c0_79], %96 {strides = array<i32>} : memref<256x128xbf16, #tpu.memory_space<vmem>>, vector<16x128xbf16>,
      %c0_80 = arith.constant 0 : index
      %c3_81 = arith.constant 3 : index
      %c0_82 = arith.constant 0 : index
      %c5_83 = arith.constant 5 : index
      %98 = vector.load %arg2[%c0_80, %c3_81, %c0_82, %c5_83] : memref<1x4x16x256xbf16, #tpu.memory_space<vmem>>, vector<1x1x16x128xbf16>
      %99 = vector.shape_cast %98 : vector<1x1x16x128xbf16> to vector<16x128xbf16>
      %c208 = arith.constant 208 : index
      %c0_84 = arith.constant 0 : index
      %100 = vector.load %arg5[%c208, %c0_84] : memref<256x128xbf16, #tpu.memory_space<vmem>>, vector<16x128xbf16>
      tpu.vector_store %arg5[%c208, %c0_84], %99 {strides = array<i32>} : memref<256x128xbf16, #tpu.memory_space<vmem>>, vector<16x128xbf16>,
      %c0_85 = arith.constant 0 : index
      %c2_86 = arith.constant 2 : index
      %c0_87 = arith.constant 0 : index
      %c6_88 = arith.constant 6 : index
      %101 = vector.load %arg2[%c0_85, %c2_86, %c0_87, %c6_88] : memref<1x4x16x256xbf16, #tpu.memory_space<vmem>>, vector<1x1x16x128xbf16>
      %102 = vector.shape_cast %101 : vector<1x1x16x128xbf16> to vector<16x128xbf16>
      %c224 = arith.constant 224 : index
      %c0_89 = arith.constant 0 : index
      %103 = vector.load %arg5[%c224, %c0_89] : memref<256x128xbf16, #tpu.memory_space<vmem>>, vector<16x128xbf16>
      tpu.vector_store %arg5[%c224, %c0_89], %102 {strides = array<i32>} : memref<256x128xbf16, #tpu.memory_space<vmem>>, vector<16x128xbf16>,
      %c0_90 = arith.constant 0 : index
      %c3_91 = arith.constant 3 : index
      %c0_92 = arith.constant 0 : index
      %c6_93 = arith.constant 6 : index
      %104 = vector.load %arg2[%c0_90, %c3_91, %c0_92, %c6_93] : memref<1x4x16x256xbf16, #tpu.memory_space<vmem>>, vector<1x1x16x128xbf16>
      %105 = vector.shape_cast %104 : vector<1x1x16x128xbf16> to vector<16x128xbf16>
      %c240 = arith.constant 240 : index
      %c0_94 = arith.constant 0 : index
      %106 = vector.load %arg5[%c240, %c0_94] : memref<256x128xbf16, #tpu.memory_space<vmem>>, vector<16x128xbf16>
      tpu.vector_store %arg5[%c240, %c0_94], %105 {strides = array<i32>} : memref<256x128xbf16, #tpu.memory_space<vmem>>, vector<16x128xbf16>,
    } else {
    }
    %c0 = arith.constant 0 : index
    %c0_1 = arith.constant 0 : index
    %3 = vector.load %arg3[%c0, %c0_1] : memref<32x256xbf16, #tpu.memory_space<vmem>>, vector<32x256xbf16>
    %c0_2 = arith.constant 0 : index
    %c0_3 = arith.constant 0 : index
    %4 = vector.load %arg5[%c0_2, %c0_3] : memref<256x128xbf16, #tpu.memory_space<vmem>>, vector<256x128xbf16>
    %cst = arith.constant dense<0.000000e+00> : vector<32x128xf32>
    %5 = tpu.matmul %3, %4, %cst {dimension_numbers = #tpu.dot_dimension_numbers<[1], [0], [0], [1], [0, 0, 1, 1], [], []>} : vector<32x256xbf16>, vector<256x128xbf16>, vector<32x128xf32> -> vector<32x128xf32>
    %6 = tpu.iota {dimensions = array<i32: 1>} : vector<1x128xi32>
    %c5_i32 = arith.constant 5 : i32
    %c0_i32_4 = arith.constant 0 : i32
    %7 = arith.cmpi eq, %c5_i32, %c0_i32_4 : i32
    %c1_i32 = arith.constant 1 : i32
    %8 = arith.select %7, %c1_i32, %c5_i32 : i32
    %9 = vector.broadcast %8 : i32 to vector<1x128xi32>
    %10 = arith.remsi %6, %9 : vector<1x128xi32>
    %c0_i32_5 = arith.constant 0 : i32
    %11 = vector.broadcast %c0_i32_5 : i32 to vector<1x128xi32>
    %12 = arith.cmpi ne, %10, %11 : vector<1x128xi32>
    %c0_i32_6 = arith.constant 0 : i32
    %13 = vector.broadcast %c0_i32_6 : i32 to vector<1x128xi32>
    %14 = arith.cmpi slt, %10, %13 : vector<1x128xi32>
    %c0_i32_7 = arith.constant 0 : i32
    %15 = arith.cmpi slt, %8, %c0_i32_7 : i32
    %16 = vector.broadcast %15 : i1 to vector<1x128xi1>
    %17 = vector.broadcast %16 : vector<1x128xi1> to vector<1x128xi1>
    %18 = arith.xori %14, %17 : vector<1x128xi1>
    %19 = arith.andi %18, %12 : vector<1x128xi1>
    %20 = vector.broadcast %8 : i32 to vector<1x128xi32>
    %21 = arith.addi %10, %20 : vector<1x128xi32>
    %22 = arith.select %19, %21, %10 : vector<1x128xi1>, vector<1x128xi32>
    %c4_i32 = arith.constant 4 : i32
    %23 = vector.broadcast %c4_i32 : i32 to vector<1x128xi32>
    %24 = arith.cmpi slt, %22, %23 : vector<1x128xi32>
    %c20_i32 = arith.constant 20 : i32
    %25 = vector.broadcast %c20_i32 : i32 to vector<1x128xi32>
    %26 = arith.cmpi slt, %6, %25 : vector<1x128xi32>
    %27 = arith.andi %24, %26 : vector<1x128xi1>
    %cst_8 = arith.constant 0.000000e+00 : f32
    %28 = vector.shape_cast %27 : vector<1x128xi1> to vector<1x128xi1>
    %29 = vector.broadcast %28 : vector<1x128xi1> to vector<32x128xi1>
    %30 = vector.broadcast %cst_8 : f32 to vector<32x128xf32>
    %31 = arith.select %29, %5, %30 : vector<32x128xi1>, vector<32x128xf32>
    %cst_9 = arith.constant dense<0.000000e+00> : vector<32xf32>
    %32 = vector.multi_reduction <add>, %31, %cst_9 [1] : vector<32x128xf32> to vector<32xf32>
    %33 = vector.shape_cast %32 : vector<32xf32> to vector<32x1xf32>
    %34 = arith.mulf %31, %31 : vector<32x128xf32>
    %cst_10 = arith.constant dense<0.000000e+00> : vector<32xf32>
    %35 = vector.multi_reduction <add>, %34, %cst_10 [1] : vector<32x128xf32> to vector<32xf32>
    %36 = vector.shape_cast %35 : vector<32xf32> to vector<32x1xf32>
    %cst_11 = arith.constant 6.250000e-02 : f32
    %37 = vector.broadcast %cst_11 : f32 to vector<32x1xf32>
    %38 = arith.mulf %33, %37 : vector<32x1xf32>
    %cst_12 = arith.constant 6.250000e-02 : f32
    %39 = vector.broadcast %cst_12 : f32 to vector<32x1xf32>
    %40 = arith.mulf %36, %39 : vector<32x1xf32>
    %41 = arith.mulf %38, %38 : vector<32x1xf32>
    %42 = arith.subf %40, %41 : vector<32x1xf32>
    %cst_13 = arith.constant 0.000000e+00 : f32
    %43 = vector.broadcast %cst_13 : f32 to vector<32x1xf32>
    %44 = arith.maximumf %42, %43 : vector<32x1xf32>
    %45 = vector.broadcast %38 : vector<32x1xf32> to vector<32x128xf32>
    %46 = arith.subf %5, %45 : vector<32x128xf32>
    %cst_14 = arith.constant 9.99999974E-6 : f32
    %47 = vector.broadcast %cst_14 : f32 to vector<32x1xf32>
    %48 = arith.addf %44, %47 : vector<32x1xf32>
    %49 = math.rsqrt %48 : vector<32x1xf32>
    %50 = vector.broadcast %49 : vector<32x1xf32> to vector<32x128xf32>
    %51 = arith.mulf %46, %50 : vector<32x128xf32>
    %cst_15 = arith.constant 2.000000e-01 : f32
    %52 = vector.broadcast %cst_15 : f32 to vector<32x128xf32>
    %53 = arith.mulf %52, %51 : vector<32x128xf32>
    %54 = arith.maximumf %51, %53 : vector<32x128xf32>
    %55 = arith.truncf %54 : vector<32x128xf32> to vector<32x128xbf16>
    %c0_16 = arith.constant 0 : index
    %c0_17 = arith.constant 0 : index
    %c0_18 = arith.constant 0 : index
    %56 = vector.load %arg4[%c0_16, %c0_17, %c0_18] : memref<1x32x128xbf16, #tpu.memory_space<vmem>>, vector<1x32x128xbf16>
    %57 = vector.shape_cast %56 : vector<1x32x128xbf16> to vector<32x128xbf16>
    %58 = vector.shape_cast %55 : vector<32x128xbf16> to vector<1x32x128xbf16>
    tpu.vector_store %arg4[%c0_16, %c0_17, %c0_18], %58 {strides = array<i32>} : memref<1x32x128xbf16, #tpu.memory_space<vmem>>, vector<1x32x128xbf16>,
    return
  }
  func.func @transform_0(%arg0: i32, %arg1: i32) -> (i32, i32, i32, i32) {
    %c0_i32 = arith.constant 0 : i32
    %c0_i32_0 = arith.constant 0 : i32
    %c0_i32_1 = arith.constant 0 : i32
    %c0_i32_2 = arith.constant 0 : i32
    return %arg0, %c0_i32, %c0_i32_0, %c0_i32_1 : i32, i32, i32, i32
  }
  func.func @transform_1(%arg0: i32, %arg1: i32) -> (i32, i32) {
    %c0_i32 = arith.constant 0 : i32
    %c0_i32_0 = arith.constant 0 : i32
    return %arg1, %c0_i32 : i32, i32
  }
  func.func @transform_2(%arg0: i32, %arg1: i32) -> (i32, i32, i32) {
    %c0_i32 = arith.constant 0 : i32
    %c0_i32_0 = arith.constant 0 : i32
    return %arg0, %arg1, %c0_i32 : i32, i32, i32
  }
}

module attributes {stable_mosaic.version = 11 : i64} {
  func.func @kernel(%arg0: i32, %arg1: i32, %arg2: memref<1x1x32x256xbf16, #tpu.memory_space<vmem>>, %arg3: memref<64x512xbf16, #tpu.memory_space<vmem>>, %arg4: memref<1x64x128xbf16, #tpu.memory_space<vmem>>, %arg5: memref<512x128xbf16, #tpu.memory_space<vmem>>) attributes {dimension_semantics = [#tpu.dimension_semantics<parallel>, #tpu.dimension_semantics<arbitrary>], iteration_bounds = array<i64: 2, 1>, scalar_prefetch = 0 : i64, scratch_operands = 1 : i64, tpu.core_type = #tpu.core_type<tc>, window_params = [{transform_indices = @transform_0, window_bounds = array<i64: 1, 1, 32, 256>}, {transform_indices = @transform_1, window_bounds = array<i64: 64, 512>}, {transform_indices = @transform_2, window_bounds = array<i64: 1, 64, 128>}]} {
    %c0_i32 = arith.constant 0 : i32
    %0 = arith.cmpi eq, %arg1, %c0_i32 : i32
    %1 = arith.extui %0 : i1 to i32
    %c0_i32_0 = arith.constant 0 : i32
    %2 = arith.cmpi ne, %1, %c0_i32_0 : i32
    scf.if %2 {
      %c0_19 = arith.constant 0 : index
      %c0_20 = arith.constant 0 : index
      %c0_21 = arith.constant 0 : index
      %c0_22 = arith.constant 0 : index
      %59 = vector.load %arg2[%c0_19, %c0_20, %c0_21, %c0_22] : memref<1x1x32x256xbf16, #tpu.memory_space<vmem>>, vector<1x1x32x128xbf16>
      %60 = vector.shape_cast %59 : vector<1x1x32x128xbf16> to vector<32x128xbf16>
      %c0_23 = arith.constant 0 : index
      %c0_24 = arith.constant 0 : index
      %61 = vector.load %arg5[%c0_23, %c0_24] : memref<512x128xbf16, #tpu.memory_space<vmem>>, vector<32x128xbf16>
      tpu.vector_store %arg5[%c0_23, %c0_24], %60 {strides = array<i32>} : memref<512x128xbf16, #tpu.memory_space<vmem>>, vector<32x128xbf16>,
      %c0_25 = arith.constant 0 : index
      %c0_26 = arith.constant 0 : index
      %c0_27 = arith.constant 0 : index
      %c1 = arith.constant 1 : index
      %62 = vector.load %arg2[%c0_25, %c0_26, %c0_27, %c1] : memref<1x1x32x256xbf16, #tpu.memory_space<vmem>>, vector<1x1x32x128xbf16>
      %63 = vector.shape_cast %62 : vector<1x1x32x128xbf16> to vector<32x128xbf16>
      %c32 = arith.constant 32 : index
      %c0_28 = arith.constant 0 : index
      %64 = vector.load %arg5[%c32, %c0_28] : memref<512x128xbf16, #tpu.memory_space<vmem>>, vector<32x128xbf16>
      tpu.vector_store %arg5[%c32, %c0_28], %63 {strides = array<i32>} : memref<512x128xbf16, #tpu.memory_space<vmem>>, vector<32x128xbf16>,
      %c0_29 = arith.constant 0 : index
      %c0_30 = arith.constant 0 : index
      %c0_31 = arith.constant 0 : index
      %c2 = arith.constant 2 : index
      %65 = vector.load %arg2[%c0_29, %c0_30, %c0_31, %c2] : memref<1x1x32x256xbf16, #tpu.memory_space<vmem>>, vector<1x1x32x128xbf16>
      %66 = vector.shape_cast %65 : vector<1x1x32x128xbf16> to vector<32x128xbf16>
      %c64 = arith.constant 64 : index
      %c0_32 = arith.constant 0 : index
      %67 = vector.load %arg5[%c64, %c0_32] : memref<512x128xbf16, #tpu.memory_space<vmem>>, vector<32x128xbf16>
      tpu.vector_store %arg5[%c64, %c0_32], %66 {strides = array<i32>} : memref<512x128xbf16, #tpu.memory_space<vmem>>, vector<32x128xbf16>,
      %c0_33 = arith.constant 0 : index
      %c0_34 = arith.constant 0 : index
      %c0_35 = arith.constant 0 : index
      %c3 = arith.constant 3 : index
      %68 = vector.load %arg2[%c0_33, %c0_34, %c0_35, %c3] : memref<1x1x32x256xbf16, #tpu.memory_space<vmem>>, vector<1x1x32x128xbf16>
      %69 = vector.shape_cast %68 : vector<1x1x32x128xbf16> to vector<32x128xbf16>
      %c96 = arith.constant 96 : index
      %c0_36 = arith.constant 0 : index
      %70 = vector.load %arg5[%c96, %c0_36] : memref<512x128xbf16, #tpu.memory_space<vmem>>, vector<32x128xbf16>
      tpu.vector_store %arg5[%c96, %c0_36], %69 {strides = array<i32>} : memref<512x128xbf16, #tpu.memory_space<vmem>>, vector<32x128xbf16>,
      %c0_37 = arith.constant 0 : index
      %c0_38 = arith.constant 0 : index
      %c0_39 = arith.constant 0 : index
      %c6 = arith.constant 6 : index
      %71 = vector.load %arg2[%c0_37, %c0_38, %c0_39, %c6] : memref<1x1x32x256xbf16, #tpu.memory_space<vmem>>, vector<1x1x32x128xbf16>
      %72 = vector.shape_cast %71 : vector<1x1x32x128xbf16> to vector<32x128xbf16>
      %c128 = arith.constant 128 : index
      %c0_40 = arith.constant 0 : index
      %73 = vector.load %arg5[%c128, %c0_40] : memref<512x128xbf16, #tpu.memory_space<vmem>>, vector<32x128xbf16>
      tpu.vector_store %arg5[%c128, %c0_40], %72 {strides = array<i32>} : memref<512x128xbf16, #tpu.memory_space<vmem>>, vector<32x128xbf16>,
      %c0_41 = arith.constant 0 : index
      %c0_42 = arith.constant 0 : index
      %c0_43 = arith.constant 0 : index
      %c7 = arith.constant 7 : index
      %74 = vector.load %arg2[%c0_41, %c0_42, %c0_43, %c7] : memref<1x1x32x256xbf16, #tpu.memory_space<vmem>>, vector<1x1x32x128xbf16>
      %75 = vector.shape_cast %74 : vector<1x1x32x128xbf16> to vector<32x128xbf16>
      %c160 = arith.constant 160 : index
      %c0_44 = arith.constant 0 : index
      %76 = vector.load %arg5[%c160, %c0_44] : memref<512x128xbf16, #tpu.memory_space<vmem>>, vector<32x128xbf16>
      tpu.vector_store %arg5[%c160, %c0_44], %75 {strides = array<i32>} : memref<512x128xbf16, #tpu.memory_space<vmem>>, vector<32x128xbf16>,
      %c0_45 = arith.constant 0 : index
      %c0_46 = arith.constant 0 : index
      %c0_47 = arith.constant 0 : index
      %c8 = arith.constant 8 : index
      %77 = vector.load %arg2[%c0_45, %c0_46, %c0_47, %c8] : memref<1x1x32x256xbf16, #tpu.memory_space<vmem>>, vector<1x1x32x128xbf16>
      %78 = vector.shape_cast %77 : vector<1x1x32x128xbf16> to vector<32x128xbf16>
      %c192 = arith.constant 192 : index
      %c0_48 = arith.constant 0 : index
      %79 = vector.load %arg5[%c192, %c0_48] : memref<512x128xbf16, #tpu.memory_space<vmem>>, vector<32x128xbf16>
      tpu.vector_store %arg5[%c192, %c0_48], %78 {strides = array<i32>} : memref<512x128xbf16, #tpu.memory_space<vmem>>, vector<32x128xbf16>,
      %c0_49 = arith.constant 0 : index
      %c0_50 = arith.constant 0 : index
      %c0_51 = arith.constant 0 : index
      %c9 = arith.constant 9 : index
      %80 = vector.load %arg2[%c0_49, %c0_50, %c0_51, %c9] : memref<1x1x32x256xbf16, #tpu.memory_space<vmem>>, vector<1x1x32x128xbf16>
      %81 = vector.shape_cast %80 : vector<1x1x32x128xbf16> to vector<32x128xbf16>
      %c224 = arith.constant 224 : index
      %c0_52 = arith.constant 0 : index
      %82 = vector.load %arg5[%c224, %c0_52] : memref<512x128xbf16, #tpu.memory_space<vmem>>, vector<32x128xbf16>
      tpu.vector_store %arg5[%c224, %c0_52], %81 {strides = array<i32>} : memref<512x128xbf16, #tpu.memory_space<vmem>>, vector<32x128xbf16>,
      %c0_53 = arith.constant 0 : index
      %c0_54 = arith.constant 0 : index
      %c0_55 = arith.constant 0 : index
      %c12 = arith.constant 12 : index
      %83 = vector.load %arg2[%c0_53, %c0_54, %c0_55, %c12] : memref<1x1x32x256xbf16, #tpu.memory_space<vmem>>, vector<1x1x32x128xbf16>
      %84 = vector.shape_cast %83 : vector<1x1x32x128xbf16> to vector<32x128xbf16>
      %c256 = arith.constant 256 : index
      %c0_56 = arith.constant 0 : index
      %85 = vector.load %arg5[%c256, %c0_56] : memref<512x128xbf16, #tpu.memory_space<vmem>>, vector<32x128xbf16>
      tpu.vector_store %arg5[%c256, %c0_56], %84 {strides = array<i32>} : memref<512x128xbf16, #tpu.memory_space<vmem>>, vector<32x128xbf16>,
      %c0_57 = arith.constant 0 : index
      %c0_58 = arith.constant 0 : index
      %c0_59 = arith.constant 0 : index
      %c13 = arith.constant 13 : index
      %86 = vector.load %arg2[%c0_57, %c0_58, %c0_59, %c13] : memref<1x1x32x256xbf16, #tpu.memory_space<vmem>>, vector<1x1x32x128xbf16>
      %87 = vector.shape_cast %86 : vector<1x1x32x128xbf16> to vector<32x128xbf16>
      %c288 = arith.constant 288 : index
      %c0_60 = arith.constant 0 : index
      %88 = vector.load %arg5[%c288, %c0_60] : memref<512x128xbf16, #tpu.memory_space<vmem>>, vector<32x128xbf16>
      tpu.vector_store %arg5[%c288, %c0_60], %87 {strides = array<i32>} : memref<512x128xbf16, #tpu.memory_space<vmem>>, vector<32x128xbf16>,
      %c0_61 = arith.constant 0 : index
      %c0_62 = arith.constant 0 : index
      %c0_63 = arith.constant 0 : index
      %c14 = arith.constant 14 : index
      %89 = vector.load %arg2[%c0_61, %c0_62, %c0_63, %c14] : memref<1x1x32x256xbf16, #tpu.memory_space<vmem>>, vector<1x1x32x128xbf16>
      %90 = vector.shape_cast %89 : vector<1x1x32x128xbf16> to vector<32x128xbf16>
      %c320 = arith.constant 320 : index
      %c0_64 = arith.constant 0 : index
      %91 = vector.load %arg5[%c320, %c0_64] : memref<512x128xbf16, #tpu.memory_space<vmem>>, vector<32x128xbf16>
      tpu.vector_store %arg5[%c320, %c0_64], %90 {strides = array<i32>} : memref<512x128xbf16, #tpu.memory_space<vmem>>, vector<32x128xbf16>,
      %c0_65 = arith.constant 0 : index
      %c0_66 = arith.constant 0 : index
      %c0_67 = arith.constant 0 : index
      %c15 = arith.constant 15 : index
      %92 = vector.load %arg2[%c0_65, %c0_66, %c0_67, %c15] : memref<1x1x32x256xbf16, #tpu.memory_space<vmem>>, vector<1x1x32x128xbf16>
      %93 = vector.shape_cast %92 : vector<1x1x32x128xbf16> to vector<32x128xbf16>
      %c352 = arith.constant 352 : index
      %c0_68 = arith.constant 0 : index
      %94 = vector.load %arg5[%c352, %c0_68] : memref<512x128xbf16, #tpu.memory_space<vmem>>, vector<32x128xbf16>
      tpu.vector_store %arg5[%c352, %c0_68], %93 {strides = array<i32>} : memref<512x128xbf16, #tpu.memory_space<vmem>>, vector<32x128xbf16>,
      %c0_69 = arith.constant 0 : index
      %c0_70 = arith.constant 0 : index
      %c0_71 = arith.constant 0 : index
      %c18 = arith.constant 18 : index
      %95 = vector.load %arg2[%c0_69, %c0_70, %c0_71, %c18] : memref<1x1x32x256xbf16, #tpu.memory_space<vmem>>, vector<1x1x32x128xbf16>
      %96 = vector.shape_cast %95 : vector<1x1x32x128xbf16> to vector<32x128xbf16>
      %c384 = arith.constant 384 : index
      %c0_72 = arith.constant 0 : index
      %97 = vector.load %arg5[%c384, %c0_72] : memref<512x128xbf16, #tpu.memory_space<vmem>>, vector<32x128xbf16>
      tpu.vector_store %arg5[%c384, %c0_72], %96 {strides = array<i32>} : memref<512x128xbf16, #tpu.memory_space<vmem>>, vector<32x128xbf16>,
      %c0_73 = arith.constant 0 : index
      %c0_74 = arith.constant 0 : index
      %c0_75 = arith.constant 0 : index
      %c19 = arith.constant 19 : index
      %98 = vector.load %arg2[%c0_73, %c0_74, %c0_75, %c19] : memref<1x1x32x256xbf16, #tpu.memory_space<vmem>>, vector<1x1x32x128xbf16>
      %99 = vector.shape_cast %98 : vector<1x1x32x128xbf16> to vector<32x128xbf16>
      %c416 = arith.constant 416 : index
      %c0_76 = arith.constant 0 : index
      %100 = vector.load %arg5[%c416, %c0_76] : memref<512x128xbf16, #tpu.memory_space<vmem>>, vector<32x128xbf16>
      tpu.vector_store %arg5[%c416, %c0_76], %99 {strides = array<i32>} : memref<512x128xbf16, #tpu.memory_space<vmem>>, vector<32x128xbf16>,
      %c0_77 = arith.constant 0 : index
      %c0_78 = arith.constant 0 : index
      %c0_79 = arith.constant 0 : index
      %c20 = arith.constant 20 : index
      %101 = vector.load %arg2[%c0_77, %c0_78, %c0_79, %c20] : memref<1x1x32x256xbf16, #tpu.memory_space<vmem>>, vector<1x1x32x128xbf16>
      %102 = vector.shape_cast %101 : vector<1x1x32x128xbf16> to vector<32x128xbf16>
      %c448 = arith.constant 448 : index
      %c0_80 = arith.constant 0 : index
      %103 = vector.load %arg5[%c448, %c0_80] : memref<512x128xbf16, #tpu.memory_space<vmem>>, vector<32x128xbf16>
      tpu.vector_store %arg5[%c448, %c0_80], %102 {strides = array<i32>} : memref<512x128xbf16, #tpu.memory_space<vmem>>, vector<32x128xbf16>,
      %c0_81 = arith.constant 0 : index
      %c0_82 = arith.constant 0 : index
      %c0_83 = arith.constant 0 : index
      %c21 = arith.constant 21 : index
      %104 = vector.load %arg2[%c0_81, %c0_82, %c0_83, %c21] : memref<1x1x32x256xbf16, #tpu.memory_space<vmem>>, vector<1x1x32x128xbf16>
      %105 = vector.shape_cast %104 : vector<1x1x32x128xbf16> to vector<32x128xbf16>
      %c480 = arith.constant 480 : index
      %c0_84 = arith.constant 0 : index
      %106 = vector.load %arg5[%c480, %c0_84] : memref<512x128xbf16, #tpu.memory_space<vmem>>, vector<32x128xbf16>
      tpu.vector_store %arg5[%c480, %c0_84], %105 {strides = array<i32>} : memref<512x128xbf16, #tpu.memory_space<vmem>>, vector<32x128xbf16>,
    } else {
    }
    %c0 = arith.constant 0 : index
    %c0_1 = arith.constant 0 : index
    %3 = vector.load %arg3[%c0, %c0_1] : memref<64x512xbf16, #tpu.memory_space<vmem>>, vector<64x512xbf16>
    %c0_2 = arith.constant 0 : index
    %c0_3 = arith.constant 0 : index
    %4 = vector.load %arg5[%c0_2, %c0_3] : memref<512x128xbf16, #tpu.memory_space<vmem>>, vector<512x128xbf16>
    %cst = arith.constant dense<0.000000e+00> : vector<64x128xf32>
    %5 = tpu.matmul %3, %4, %cst {dimension_numbers = #tpu.dot_dimension_numbers<[1], [0], [0], [1], [0, 0, 1, 1], [], []>} : vector<64x512xbf16>, vector<512x128xbf16>, vector<64x128xf32> -> vector<64x128xf32>
    %6 = tpu.iota {dimensions = array<i32: 1>} : vector<1x128xi32>
    %c6_i32 = arith.constant 6 : i32
    %c0_i32_4 = arith.constant 0 : i32
    %7 = arith.cmpi eq, %c6_i32, %c0_i32_4 : i32
    %c1_i32 = arith.constant 1 : i32
    %8 = arith.select %7, %c1_i32, %c6_i32 : i32
    %9 = vector.broadcast %8 : i32 to vector<1x128xi32>
    %10 = arith.remsi %6, %9 : vector<1x128xi32>
    %c0_i32_5 = arith.constant 0 : i32
    %11 = vector.broadcast %c0_i32_5 : i32 to vector<1x128xi32>
    %12 = arith.cmpi ne, %10, %11 : vector<1x128xi32>
    %c0_i32_6 = arith.constant 0 : i32
    %13 = vector.broadcast %c0_i32_6 : i32 to vector<1x128xi32>
    %14 = arith.cmpi slt, %10, %13 : vector<1x128xi32>
    %c0_i32_7 = arith.constant 0 : i32
    %15 = arith.cmpi slt, %8, %c0_i32_7 : i32
    %16 = vector.broadcast %15 : i1 to vector<1x128xi1>
    %17 = vector.broadcast %16 : vector<1x128xi1> to vector<1x128xi1>
    %18 = arith.xori %14, %17 : vector<1x128xi1>
    %19 = arith.andi %18, %12 : vector<1x128xi1>
    %20 = vector.broadcast %8 : i32 to vector<1x128xi32>
    %21 = arith.addi %10, %20 : vector<1x128xi32>
    %22 = arith.select %19, %21, %10 : vector<1x128xi1>, vector<1x128xi32>
    %c3_i32 = arith.constant 3 : i32
    %23 = vector.broadcast %c3_i32 : i32 to vector<1x128xi32>
    %24 = arith.cmpi slt, %22, %23 : vector<1x128xi32>
    %c18_i32 = arith.constant 18 : i32
    %25 = vector.broadcast %c18_i32 : i32 to vector<1x128xi32>
    %26 = arith.cmpi slt, %6, %25 : vector<1x128xi32>
    %27 = arith.andi %24, %26 : vector<1x128xi1>
    %cst_8 = arith.constant 0.000000e+00 : f32
    %28 = vector.shape_cast %27 : vector<1x128xi1> to vector<1x128xi1>
    %29 = vector.broadcast %28 : vector<1x128xi1> to vector<64x128xi1>
    %30 = vector.broadcast %cst_8 : f32 to vector<64x128xf32>
    %31 = arith.select %29, %5, %30 : vector<64x128xi1>, vector<64x128xf32>
    %cst_9 = arith.constant dense<0.000000e+00> : vector<64xf32>
    %32 = vector.multi_reduction <add>, %31, %cst_9 [1] : vector<64x128xf32> to vector<64xf32>
    %33 = vector.shape_cast %32 : vector<64xf32> to vector<64x1xf32>
    %34 = arith.mulf %31, %31 : vector<64x128xf32>
    %cst_10 = arith.constant dense<0.000000e+00> : vector<64xf32>
    %35 = vector.multi_reduction <add>, %34, %cst_10 [1] : vector<64x128xf32> to vector<64xf32>
    %36 = vector.shape_cast %35 : vector<64xf32> to vector<64x1xf32>
    %cst_11 = arith.constant 0.111111112 : f32
    %37 = vector.broadcast %cst_11 : f32 to vector<64x1xf32>
    %38 = arith.mulf %33, %37 : vector<64x1xf32>
    %cst_12 = arith.constant 0.111111112 : f32
    %39 = vector.broadcast %cst_12 : f32 to vector<64x1xf32>
    %40 = arith.mulf %36, %39 : vector<64x1xf32>
    %41 = arith.mulf %38, %38 : vector<64x1xf32>
    %42 = arith.subf %40, %41 : vector<64x1xf32>
    %cst_13 = arith.constant 0.000000e+00 : f32
    %43 = vector.broadcast %cst_13 : f32 to vector<64x1xf32>
    %44 = arith.maximumf %42, %43 : vector<64x1xf32>
    %45 = vector.broadcast %38 : vector<64x1xf32> to vector<64x128xf32>
    %46 = arith.subf %5, %45 : vector<64x128xf32>
    %cst_14 = arith.constant 9.99999974E-6 : f32
    %47 = vector.broadcast %cst_14 : f32 to vector<64x1xf32>
    %48 = arith.addf %44, %47 : vector<64x1xf32>
    %49 = math.rsqrt %48 : vector<64x1xf32>
    %50 = vector.broadcast %49 : vector<64x1xf32> to vector<64x128xf32>
    %51 = arith.mulf %46, %50 : vector<64x128xf32>
    %cst_15 = arith.constant 2.000000e-01 : f32
    %52 = vector.broadcast %cst_15 : f32 to vector<64x128xf32>
    %53 = arith.mulf %52, %51 : vector<64x128xf32>
    %54 = arith.maximumf %51, %53 : vector<64x128xf32>
    %55 = arith.truncf %54 : vector<64x128xf32> to vector<64x128xbf16>
    %c0_16 = arith.constant 0 : index
    %c0_17 = arith.constant 0 : index
    %c0_18 = arith.constant 0 : index
    %56 = vector.load %arg4[%c0_16, %c0_17, %c0_18] : memref<1x64x128xbf16, #tpu.memory_space<vmem>>, vector<1x64x128xbf16>
    %57 = vector.shape_cast %56 : vector<1x64x128xbf16> to vector<64x128xbf16>
    %58 = vector.shape_cast %55 : vector<64x128xbf16> to vector<1x64x128xbf16>
    tpu.vector_store %arg4[%c0_16, %c0_17, %c0_18], %58 {strides = array<i32>} : memref<1x64x128xbf16, #tpu.memory_space<vmem>>, vector<1x64x128xbf16>,
    return
  }
  func.func @transform_0(%arg0: i32, %arg1: i32) -> (i32, i32, i32, i32) {
    %c0_i32 = arith.constant 0 : i32
    %c0_i32_0 = arith.constant 0 : i32
    %c0_i32_1 = arith.constant 0 : i32
    %c0_i32_2 = arith.constant 0 : i32
    return %arg0, %c0_i32, %c0_i32_0, %c0_i32_1 : i32, i32, i32, i32
  }
  func.func @transform_1(%arg0: i32, %arg1: i32) -> (i32, i32) {
    %c0_i32 = arith.constant 0 : i32
    %c0_i32_0 = arith.constant 0 : i32
    return %arg1, %c0_i32 : i32, i32
  }
  func.func @transform_2(%arg0: i32, %arg1: i32) -> (i32, i32, i32) {
    %c0_i32 = arith.constant 0 : i32
    %c0_i32_0 = arith.constant 0 : i32
    return %arg0, %arg1, %c0_i32 : i32, i32, i32
  }
}

module attributes {stable_mosaic.version = 11 : i64} {
  func.func @kernel(%arg0: i32, %arg1: i32, %arg2: memref<1x1x64x256xbf16, #tpu.memory_space<vmem>>, %arg3: memref<16x1024xbf16, #tpu.memory_space<vmem>>, %arg4: memref<16x1xf32, #tpu.memory_space<vmem>>, %arg5: memref<1x16x128xf32, #tpu.memory_space<vmem>>, %arg6: memref<1024x128xbf16, #tpu.memory_space<vmem>>) attributes {dimension_semantics = [#tpu.dimension_semantics<parallel>, #tpu.dimension_semantics<arbitrary>], iteration_bounds = array<i64: 2, 1>, scalar_prefetch = 0 : i64, scratch_operands = 1 : i64, tpu.core_type = #tpu.core_type<tc>, window_params = [{transform_indices = @transform_0, window_bounds = array<i64: 1, 1, 64, 256>}, {transform_indices = @transform_1, window_bounds = array<i64: 16, 1024>}, {transform_indices = @transform_2, window_bounds = array<i64: 16, 1>}, {transform_indices = @transform_3, window_bounds = array<i64: 1, 16, 128>}]} {
    %c0_i32 = arith.constant 0 : i32
    %0 = arith.cmpi eq, %arg1, %c0_i32 : i32
    %1 = arith.extui %0 : i1 to i32
    %c0_i32_0 = arith.constant 0 : i32
    %2 = arith.cmpi ne, %1, %c0_i32_0 : i32
    scf.if %2 {
      %c0_10 = arith.constant 0 : index
      %c0_11 = arith.constant 0 : index
      %c0_12 = arith.constant 0 : index
      %c0_13 = arith.constant 0 : index
      %17 = vector.load %arg2[%c0_10, %c0_11, %c0_12, %c0_13] : memref<1x1x64x256xbf16, #tpu.memory_space<vmem>>, vector<1x1x64x128xbf16>
      %18 = vector.shape_cast %17 : vector<1x1x64x128xbf16> to vector<64x128xbf16>
      %c0_14 = arith.constant 0 : index
      %c0_15 = arith.constant 0 : index
      %19 = vector.load %arg6[%c0_14, %c0_15] : memref<1024x128xbf16, #tpu.memory_space<vmem>>, vector<64x128xbf16>
      tpu.vector_store %arg6[%c0_14, %c0_15], %18 {strides = array<i32>} : memref<1024x128xbf16, #tpu.memory_space<vmem>>, vector<64x128xbf16>,
      %c0_16 = arith.constant 0 : index
      %c0_17 = arith.constant 0 : index
      %c0_18 = arith.constant 0 : index
      %c1 = arith.constant 1 : index
      %20 = vector.load %arg2[%c0_16, %c0_17, %c0_18, %c1] : memref<1x1x64x256xbf16, #tpu.memory_space<vmem>>, vector<1x1x64x128xbf16>
      %21 = vector.shape_cast %20 : vector<1x1x64x128xbf16> to vector<64x128xbf16>
      %c64 = arith.constant 64 : index
      %c0_19 = arith.constant 0 : index
      %22 = vector.load %arg6[%c64, %c0_19] : memref<1024x128xbf16, #tpu.memory_space<vmem>>, vector<64x128xbf16>
      tpu.vector_store %arg6[%c64, %c0_19], %21 {strides = array<i32>} : memref<1024x128xbf16, #tpu.memory_space<vmem>>, vector<64x128xbf16>,
      %c0_20 = arith.constant 0 : index
      %c0_21 = arith.constant 0 : index
      %c0_22 = arith.constant 0 : index
      %c2 = arith.constant 2 : index
      %23 = vector.load %arg2[%c0_20, %c0_21, %c0_22, %c2] : memref<1x1x64x256xbf16, #tpu.memory_space<vmem>>, vector<1x1x64x128xbf16>
      %24 = vector.shape_cast %23 : vector<1x1x64x128xbf16> to vector<64x128xbf16>
      %c128 = arith.constant 128 : index
      %c0_23 = arith.constant 0 : index
      %25 = vector.load %arg6[%c128, %c0_23] : memref<1024x128xbf16, #tpu.memory_space<vmem>>, vector<64x128xbf16>
      tpu.vector_store %arg6[%c128, %c0_23], %24 {strides = array<i32>} : memref<1024x128xbf16, #tpu.memory_space<vmem>>, vector<64x128xbf16>,
      %c0_24 = arith.constant 0 : index
      %c0_25 = arith.constant 0 : index
      %c0_26 = arith.constant 0 : index
      %c3 = arith.constant 3 : index
      %26 = vector.load %arg2[%c0_24, %c0_25, %c0_26, %c3] : memref<1x1x64x256xbf16, #tpu.memory_space<vmem>>, vector<1x1x64x128xbf16>
      %27 = vector.shape_cast %26 : vector<1x1x64x128xbf16> to vector<64x128xbf16>
      %c192 = arith.constant 192 : index
      %c0_27 = arith.constant 0 : index
      %28 = vector.load %arg6[%c192, %c0_27] : memref<1024x128xbf16, #tpu.memory_space<vmem>>, vector<64x128xbf16>
      tpu.vector_store %arg6[%c192, %c0_27], %27 {strides = array<i32>} : memref<1024x128xbf16, #tpu.memory_space<vmem>>, vector<64x128xbf16>,
      %c0_28 = arith.constant 0 : index
      %c0_29 = arith.constant 0 : index
      %c0_30 = arith.constant 0 : index
      %c5 = arith.constant 5 : index
      %29 = vector.load %arg2[%c0_28, %c0_29, %c0_30, %c5] : memref<1x1x64x256xbf16, #tpu.memory_space<vmem>>, vector<1x1x64x128xbf16>
      %30 = vector.shape_cast %29 : vector<1x1x64x128xbf16> to vector<64x128xbf16>
      %c256 = arith.constant 256 : index
      %c0_31 = arith.constant 0 : index
      %31 = vector.load %arg6[%c256, %c0_31] : memref<1024x128xbf16, #tpu.memory_space<vmem>>, vector<64x128xbf16>
      tpu.vector_store %arg6[%c256, %c0_31], %30 {strides = array<i32>} : memref<1024x128xbf16, #tpu.memory_space<vmem>>, vector<64x128xbf16>,
      %c0_32 = arith.constant 0 : index
      %c0_33 = arith.constant 0 : index
      %c0_34 = arith.constant 0 : index
      %c6 = arith.constant 6 : index
      %32 = vector.load %arg2[%c0_32, %c0_33, %c0_34, %c6] : memref<1x1x64x256xbf16, #tpu.memory_space<vmem>>, vector<1x1x64x128xbf16>
      %33 = vector.shape_cast %32 : vector<1x1x64x128xbf16> to vector<64x128xbf16>
      %c320 = arith.constant 320 : index
      %c0_35 = arith.constant 0 : index
      %34 = vector.load %arg6[%c320, %c0_35] : memref<1024x128xbf16, #tpu.memory_space<vmem>>, vector<64x128xbf16>
      tpu.vector_store %arg6[%c320, %c0_35], %33 {strides = array<i32>} : memref<1024x128xbf16, #tpu.memory_space<vmem>>, vector<64x128xbf16>,
      %c0_36 = arith.constant 0 : index
      %c0_37 = arith.constant 0 : index
      %c0_38 = arith.constant 0 : index
      %c7 = arith.constant 7 : index
      %35 = vector.load %arg2[%c0_36, %c0_37, %c0_38, %c7] : memref<1x1x64x256xbf16, #tpu.memory_space<vmem>>, vector<1x1x64x128xbf16>
      %36 = vector.shape_cast %35 : vector<1x1x64x128xbf16> to vector<64x128xbf16>
      %c384 = arith.constant 384 : index
      %c0_39 = arith.constant 0 : index
      %37 = vector.load %arg6[%c384, %c0_39] : memref<1024x128xbf16, #tpu.memory_space<vmem>>, vector<64x128xbf16>
      tpu.vector_store %arg6[%c384, %c0_39], %36 {strides = array<i32>} : memref<1024x128xbf16, #tpu.memory_space<vmem>>, vector<64x128xbf16>,
      %c0_40 = arith.constant 0 : index
      %c0_41 = arith.constant 0 : index
      %c0_42 = arith.constant 0 : index
      %c8 = arith.constant 8 : index
      %38 = vector.load %arg2[%c0_40, %c0_41, %c0_42, %c8] : memref<1x1x64x256xbf16, #tpu.memory_space<vmem>>, vector<1x1x64x128xbf16>
      %39 = vector.shape_cast %38 : vector<1x1x64x128xbf16> to vector<64x128xbf16>
      %c448 = arith.constant 448 : index
      %c0_43 = arith.constant 0 : index
      %40 = vector.load %arg6[%c448, %c0_43] : memref<1024x128xbf16, #tpu.memory_space<vmem>>, vector<64x128xbf16>
      tpu.vector_store %arg6[%c448, %c0_43], %39 {strides = array<i32>} : memref<1024x128xbf16, #tpu.memory_space<vmem>>, vector<64x128xbf16>,
      %c0_44 = arith.constant 0 : index
      %c0_45 = arith.constant 0 : index
      %c0_46 = arith.constant 0 : index
      %c10 = arith.constant 10 : index
      %41 = vector.load %arg2[%c0_44, %c0_45, %c0_46, %c10] : memref<1x1x64x256xbf16, #tpu.memory_space<vmem>>, vector<1x1x64x128xbf16>
      %42 = vector.shape_cast %41 : vector<1x1x64x128xbf16> to vector<64x128xbf16>
      %c512 = arith.constant 512 : index
      %c0_47 = arith.constant 0 : index
      %43 = vector.load %arg6[%c512, %c0_47] : memref<1024x128xbf16, #tpu.memory_space<vmem>>, vector<64x128xbf16>
      tpu.vector_store %arg6[%c512, %c0_47], %42 {strides = array<i32>} : memref<1024x128xbf16, #tpu.memory_space<vmem>>, vector<64x128xbf16>,
      %c0_48 = arith.constant 0 : index
      %c0_49 = arith.constant 0 : index
      %c0_50 = arith.constant 0 : index
      %c11 = arith.constant 11 : index
      %44 = vector.load %arg2[%c0_48, %c0_49, %c0_50, %c11] : memref<1x1x64x256xbf16, #tpu.memory_space<vmem>>, vector<1x1x64x128xbf16>
      %45 = vector.shape_cast %44 : vector<1x1x64x128xbf16> to vector<64x128xbf16>
      %c576 = arith.constant 576 : index
      %c0_51 = arith.constant 0 : index
      %46 = vector.load %arg6[%c576, %c0_51] : memref<1024x128xbf16, #tpu.memory_space<vmem>>, vector<64x128xbf16>
      tpu.vector_store %arg6[%c576, %c0_51], %45 {strides = array<i32>} : memref<1024x128xbf16, #tpu.memory_space<vmem>>, vector<64x128xbf16>,
      %c0_52 = arith.constant 0 : index
      %c0_53 = arith.constant 0 : index
      %c0_54 = arith.constant 0 : index
      %c12 = arith.constant 12 : index
      %47 = vector.load %arg2[%c0_52, %c0_53, %c0_54, %c12] : memref<1x1x64x256xbf16, #tpu.memory_space<vmem>>, vector<1x1x64x128xbf16>
      %48 = vector.shape_cast %47 : vector<1x1x64x128xbf16> to vector<64x128xbf16>
      %c640 = arith.constant 640 : index
      %c0_55 = arith.constant 0 : index
      %49 = vector.load %arg6[%c640, %c0_55] : memref<1024x128xbf16, #tpu.memory_space<vmem>>, vector<64x128xbf16>
      tpu.vector_store %arg6[%c640, %c0_55], %48 {strides = array<i32>} : memref<1024x128xbf16, #tpu.memory_space<vmem>>, vector<64x128xbf16>,
      %c0_56 = arith.constant 0 : index
      %c0_57 = arith.constant 0 : index
      %c0_58 = arith.constant 0 : index
      %c13 = arith.constant 13 : index
      %50 = vector.load %arg2[%c0_56, %c0_57, %c0_58, %c13] : memref<1x1x64x256xbf16, #tpu.memory_space<vmem>>, vector<1x1x64x128xbf16>
      %51 = vector.shape_cast %50 : vector<1x1x64x128xbf16> to vector<64x128xbf16>
      %c704 = arith.constant 704 : index
      %c0_59 = arith.constant 0 : index
      %52 = vector.load %arg6[%c704, %c0_59] : memref<1024x128xbf16, #tpu.memory_space<vmem>>, vector<64x128xbf16>
      tpu.vector_store %arg6[%c704, %c0_59], %51 {strides = array<i32>} : memref<1024x128xbf16, #tpu.memory_space<vmem>>, vector<64x128xbf16>,
      %c0_60 = arith.constant 0 : index
      %c0_61 = arith.constant 0 : index
      %c0_62 = arith.constant 0 : index
      %c15 = arith.constant 15 : index
      %53 = vector.load %arg2[%c0_60, %c0_61, %c0_62, %c15] : memref<1x1x64x256xbf16, #tpu.memory_space<vmem>>, vector<1x1x64x128xbf16>
      %54 = vector.shape_cast %53 : vector<1x1x64x128xbf16> to vector<64x128xbf16>
      %c768 = arith.constant 768 : index
      %c0_63 = arith.constant 0 : index
      %55 = vector.load %arg6[%c768, %c0_63] : memref<1024x128xbf16, #tpu.memory_space<vmem>>, vector<64x128xbf16>
      tpu.vector_store %arg6[%c768, %c0_63], %54 {strides = array<i32>} : memref<1024x128xbf16, #tpu.memory_space<vmem>>, vector<64x128xbf16>,
      %c0_64 = arith.constant 0 : index
      %c0_65 = arith.constant 0 : index
      %c0_66 = arith.constant 0 : index
      %c16 = arith.constant 16 : index
      %56 = vector.load %arg2[%c0_64, %c0_65, %c0_66, %c16] : memref<1x1x64x256xbf16, #tpu.memory_space<vmem>>, vector<1x1x64x128xbf16>
      %57 = vector.shape_cast %56 : vector<1x1x64x128xbf16> to vector<64x128xbf16>
      %c832 = arith.constant 832 : index
      %c0_67 = arith.constant 0 : index
      %58 = vector.load %arg6[%c832, %c0_67] : memref<1024x128xbf16, #tpu.memory_space<vmem>>, vector<64x128xbf16>
      tpu.vector_store %arg6[%c832, %c0_67], %57 {strides = array<i32>} : memref<1024x128xbf16, #tpu.memory_space<vmem>>, vector<64x128xbf16>,
      %c0_68 = arith.constant 0 : index
      %c0_69 = arith.constant 0 : index
      %c0_70 = arith.constant 0 : index
      %c17 = arith.constant 17 : index
      %59 = vector.load %arg2[%c0_68, %c0_69, %c0_70, %c17] : memref<1x1x64x256xbf16, #tpu.memory_space<vmem>>, vector<1x1x64x128xbf16>
      %60 = vector.shape_cast %59 : vector<1x1x64x128xbf16> to vector<64x128xbf16>
      %c896 = arith.constant 896 : index
      %c0_71 = arith.constant 0 : index
      %61 = vector.load %arg6[%c896, %c0_71] : memref<1024x128xbf16, #tpu.memory_space<vmem>>, vector<64x128xbf16>
      tpu.vector_store %arg6[%c896, %c0_71], %60 {strides = array<i32>} : memref<1024x128xbf16, #tpu.memory_space<vmem>>, vector<64x128xbf16>,
      %c0_72 = arith.constant 0 : index
      %c0_73 = arith.constant 0 : index
      %c0_74 = arith.constant 0 : index
      %c18 = arith.constant 18 : index
      %62 = vector.load %arg2[%c0_72, %c0_73, %c0_74, %c18] : memref<1x1x64x256xbf16, #tpu.memory_space<vmem>>, vector<1x1x64x128xbf16>
      %63 = vector.shape_cast %62 : vector<1x1x64x128xbf16> to vector<64x128xbf16>
      %c960 = arith.constant 960 : index
      %c0_75 = arith.constant 0 : index
      %64 = vector.load %arg6[%c960, %c0_75] : memref<1024x128xbf16, #tpu.memory_space<vmem>>, vector<64x128xbf16>
      tpu.vector_store %arg6[%c960, %c0_75], %63 {strides = array<i32>} : memref<1024x128xbf16, #tpu.memory_space<vmem>>, vector<64x128xbf16>,
    } else {
    }
    %c0 = arith.constant 0 : index
    %c0_1 = arith.constant 0 : index
    %3 = vector.load %arg3[%c0, %c0_1] : memref<16x1024xbf16, #tpu.memory_space<vmem>>, vector<16x1024xbf16>
    %c0_2 = arith.constant 0 : index
    %c0_3 = arith.constant 0 : index
    %4 = vector.load %arg6[%c0_2, %c0_3] : memref<1024x128xbf16, #tpu.memory_space<vmem>>, vector<1024x128xbf16>
    %cst = arith.constant dense<0.000000e+00> : vector<16x128xf32>
    %5 = tpu.matmul %3, %4, %cst {dimension_numbers = #tpu.dot_dimension_numbers<[1], [0], [0], [1], [0, 0, 1, 1], [], []>} : vector<16x1024xbf16>, vector<1024x128xbf16>, vector<16x128xf32> -> vector<16x128xf32>
    %c0_4 = arith.constant 0 : index
    %c0_5 = arith.constant 0 : index
    %6 = vector.load %arg4[%c0_4, %c0_5] : memref<16x1xf32, #tpu.memory_space<vmem>>, vector<16x1xf32>
    %7 = vector.broadcast %6 : vector<16x1xf32> to vector<16x128xf32>
    %8 = arith.addf %5, %7 : vector<16x128xf32>
    %9 = arith.negf %8 : vector<16x128xf32>
    %10 = math.exp %9 : vector<16x128xf32>
    %cst_6 = arith.constant 1.000000e+00 : f32
    %11 = vector.broadcast %cst_6 : f32 to vector<16x128xf32>
    %12 = arith.addf %11, %10 : vector<16x128xf32>
    %13 = arith.divf %11, %12 : vector<16x128xf32>
    %c0_7 = arith.constant 0 : index
    %c0_8 = arith.constant 0 : index
    %c0_9 = arith.constant 0 : index
    %14 = vector.load %arg5[%c0_7, %c0_8, %c0_9] : memref<1x16x128xf32, #tpu.memory_space<vmem>>, vector<1x16x128xf32>
    %15 = vector.shape_cast %14 : vector<1x16x128xf32> to vector<16x128xf32>
    %16 = vector.shape_cast %13 : vector<16x128xf32> to vector<1x16x128xf32>
    tpu.vector_store %arg5[%c0_7, %c0_8, %c0_9], %16 {strides = array<i32>} : memref<1x16x128xf32, #tpu.memory_space<vmem>>, vector<1x16x128xf32>,
    return
  }
  func.func @transform_0(%arg0: i32, %arg1: i32) -> (i32, i32, i32, i32) {
    %c0_i32 = arith.constant 0 : i32
    %c0_i32_0 = arith.constant 0 : i32
    %c0_i32_1 = arith.constant 0 : i32
    %c0_i32_2 = arith.constant 0 : i32
    return %arg0, %c0_i32, %c0_i32_0, %c0_i32_1 : i32, i32, i32, i32
  }
  func.func @transform_1(%arg0: i32, %arg1: i32) -> (i32, i32) {
    %c0_i32 = arith.constant 0 : i32
    %c0_i32_0 = arith.constant 0 : i32
    return %arg1, %c0_i32 : i32, i32
  }
  func.func @transform_2(%arg0: i32, %arg1: i32) -> (i32, i32) {
    %c0_i32 = arith.constant 0 : i32
    %c0_i32_0 = arith.constant 0 : i32
    return %arg1, %c0_i32 : i32, i32
  }
  func.func @transform_3(%arg0: i32, %arg1: i32) -> (i32, i32, i32) {
    %c0_i32 = arith.constant 0 : i32
    %c0_i32_0 = arith.constant 0 : i32
    return %arg0, %arg1, %c0_i32 : i32, i32, i32
  }
}

</mosaic_0001>

<bundles_post_ra>
// kernel: _lambda_.5
= control target key start
LH: loop header
LB: loop body
LE: loop exit
PB: predicated region body
PF: predicated region fallthrough
CT: control target
= control target key end

     0   :  { %s1362_s12 = smov 0   ;;  %s1364_s13 = smov 0   ;;  %s1541_s0 = inlined_call_operand.vmem [shape: bf16[2,4,16,512], index: 0, kind: input, shape index: {}]   ;;  %s1542_s1 = inlined_call_operand.vmem [shape: bf16[16,256], index: 1, kind: input, shape index: {}]   ;;  %s1543_s2 = inlined_call_operand.vmem [shape: f32[16,1], index: 2, kind: input, shape index: {}]   ;;  %s1544_s3 = inlined_call_operand.vmem [shape: bf16[2,16,384], index: 3, kind: output, shape index: {}]  }
   0x1   :  { %s1366_s14 = smov 0  }
   0x2 LB: > { %s25_s15 = sadd.s32 1, %s1332_s13  ;;  %p1105_p0 = scmp.ge.s32.totalorder %s1336_s14, 1  ;;  %s1336_s14 = sphi %s1366_s14, %s13_s14   ;;  %s1332_s13 = sphi %s1364_s13, %s1546_s13   ;;  %s1328_s12 = sphi %s1362_s12, %s1545_s12  }
   0x3   : > { %p27_p1 = scmp.ge.s32.totalorder %s25_s15, 2  ;;  %p174_p2 = scmp.lt.s32.totalorder %s1336_s14, 3 }
   0x5   : > { %s1548_s15 = smov (%p27_p1, %s25_s15), 0  ;;  %p175_p3 = pnand %p1105_p0, %p174_p2 }
   0x6   : > { %p214_p4 = scmp.lt.s32.totalorder (!%p175_p3), %s1328_s12, 1  ;;  %s1338_s20 = smov (!%p175_p3), 127   ;;  %v1313_v16 = vld [vmem:[%s1542_s1 + $0x4] ss:$8 sps:$4 sm:$0xff] (!%p175_p3)   ;;  %v1341_v17 = vmov (!%p175_p3), 0   ;;  %vm323_vm0 = vcmask (!%p175_p3), 1039360  }
   0x7   : > { %178 = sbr.rel (%p175_p3) target bundleno = 454 (0x1c6), region = 32  ;;  %s1339_s21 = smov (!%p175_p3), 111   ;;  %937 = vmatprep.mubr.bf16.mxu1 (!%p175_p3), %v1313_v16  ;;  %894 = vmatprep.mubr.bf16.mxu0 (!%p175_p3), %v1313_v16  ;;  %v840_v18 = vld [vmem:[%s1543_s2] sm:$0xff] (!%p175_p3)  ;;  %v841_v19 = vld [vmem:[%s1543_s2 + $0x8] sm:$0xff] (!%p175_p3)  ;;  %vm520_vm1 = vcmask (!%p175_p3), 908288   ;;  %vm595_vm2 = vcmask (!%p175_p3), 900096  }
   0x8   : > { %s1340_s22 = smov (!%p175_p3), 110   ;;  %1281 = vset.pattern.permute.xlu0 (!%p175_p3), %v1341_v17  ;;  %1282 = vset.pattern.permute.xlu1 (!%p175_p3), %v1341_v17 }
   0xe   : > { %s1550_s12 = smov (!%p214_p4, %s1328_s12), 1 }
   0xf   : > { %s1225_s16 = sshll.u32 %s1550_s12, 7  ;;  %s1252_s4 = smul.u32 24, %s1550_s12 }
  0x10   : > { %s1386_s19 = scalar_lea.vmem %s1541_s0, %s1225_s16 }
  0x11   : > { %v1283_v0 = vld [vmem:[%s1386_s19 + $0x4] ss:$16 sps:$4 sm:$0xff]   ;;  %v1285_v1 = vld [vmem:[%s1386_s19] ss:$16 sps:$4 sm:$0xff]   ;;  %v1286_v2 = vld [vmem:[%s1386_s19 + $0x8] ss:$16 sps:$4 sm:$0xff]   ;;  %s241_s7 = scalar_lea.vmem %s1544_s3, %s1252_s4 }
  0x12   : > { %317 = vrot.lane.b32.xlu0 %v1283_v0, %s1338_s20  ;;  %862 = vmatprep.subr.bf16.mxu0 %v1283_v0  ;;  %v1288_v3 = vld [vmem:[%s1386_s19 + $0x24] ss:$16 sps:$4 sm:$0xff]   ;;  %v1292_v4 = vld [vmem:[%s1386_s19 + $0x20] ss:$16 sps:$4 sm:$0xff]   ;;  %v1290_v5 = vld [vmem:[%s1386_s19 + $0x28] ss:$16 sps:$4 sm:$0xff]  }
  0x13   : > { %315 = vrot.lane.b32.xlu1 %v1285_v1, %s1338_s20  ;;  %863 = vmatpush1.bf16.msra.mxu0 %v1285_v1  ;;  %v1400_v6 = vld [vmem:[%s1386_s19 + $0x44] ss:$16 sps:$4 sm:$0xff]   ;;  %v1295_v7 = vld [vmem:[%s1386_s19 + $0x48] ss:$16 sps:$4 sm:$0xff]   ;;  %v1407_v8 = vld [vmem:[%s1386_s19 + $0x40] ss:$16 sps:$4 sm:$0xff]  }
  0x14   : > { %864 = vmatprep.subr.bf16.mxu0 %v1288_v3  ;;  %v1411_v9 = vld [vmem:[%s1386_s19 + $0x64] ss:$16 sps:$4 sm:$0xff]   ;;  %v1300_v10 = vld [vmem:[%s1386_s19 + $0x68] ss:$16 sps:$4 sm:$0xff]   ;;  %v1419_v11 = vld [vmem:[%s1386_s19 + $0x60] ss:$16 sps:$4 sm:$0xff]  }
  0x15   : > { %v1303_v12 = vld [vmem:[%s1386_s19 + $0xc] ss:$16 sps:$4 sm:$0xff]   ;;  %v1307_v40 = vld [vmem:[%s1386_s19 + $0x8] ss:$16 sps:$4 sm:$0xff]  }
  0x16   : > { %319 = vrot.lane.b32.xlu0 %v1286_v2, %s1338_s20  ;;  %v1304_v13 = vld [vmem:[%s1386_s19 + $0x2c] ss:$16 sps:$4 sm:$0xff]   ;;  %v1308_v49 = vld [vmem:[%s1386_s19 + $0x28] ss:$16 sps:$4 sm:$0xff]  }
  0x17   : > { %355 = vrot.lane.b32.xlu1 %v1288_v3, %s1338_s20  ;;  %865 = vmatpush1.bf16.msra.mxu0 %v1292_v4  ;;  %v1305_v14 = vld [vmem:[%s1386_s19 + $0x4c] ss:$16 sps:$4 sm:$0xff]  }
  0x18   : > { %v1306_v15 = vld [vmem:[%s1386_s19 + $0x6c] ss:$16 sps:$4 sm:$0xff]  }
  0x1a   : > { %357 = vrot.lane.b32.xlu0 %v1290_v5, %s1338_s20 }
  0x1b   : > { %353 = vrot.lane.b32.xlu1 %v1292_v4, %s1338_s20 }
  0x1e   : > { %440 = vrot.lane.b32.xlu0 %v1400_v6, %s1338_s20 }
  0x1f   : > { %442 = vrot.lane.b32.xlu1 %v1295_v7, %s1338_s20 }
  0x22   : > { %438 = vrot.lane.b32.xlu0 %v1407_v8, %s1338_s20 }
  0x23   : > { %477 = vrot.lane.b32.xlu1 %v1411_v9, %s1338_s20 }
  0x26   : > { %479 = vrot.lane.b32.xlu0 %v1300_v10, %s1338_s20 }
  0x27   : > { %475 = vrot.lane.b32.xlu1 %v1419_v11, %s1338_s20 }
  0x2a   : > { %516 = vrot.lane.b32.xlu0 %v1286_v2, %s1339_s21 }
  0x2b   : > { %518 = vrot.lane.b32.xlu1 %v1303_v12, %s1339_s21 }
  0x2e   : > { %514 = vrot.lane.b32.xlu0 %v1283_v0, %s1339_s21 }
  0x2f   : > { %512 = vrot.lane.b32.xlu1 %v1285_v1, %s1339_s21 }
  0x32   : > { %554 = vrot.lane.b32.xlu0 %v1290_v5, %s1339_s21 }
  0x33   : > { %556 = vrot.lane.b32.xlu1 %v1304_v13, %s1339_s21 }
  0x36   : > { %552 = vrot.lane.b32.xlu0 %v1288_v3, %s1339_s21 }
  0x37   : > { %550 = vrot.lane.b32.xlu1 %v1292_v4, %s1339_s21 }
  0x3a   : > { %591 = vrot.lane.b32.xlu0 %v1286_v2, %s1340_s22 }
  0x3b   : > { %593 = vrot.lane.b32.xlu1 %v1303_v12, %s1340_s22 }
  0x3e   : > { %321 = vrot.lane.b32.xlu0 %v1303_v12, %s1338_s20 }
  0x3f   : > { %589 = vrot.lane.b32.xlu1 %v1283_v0, %s1340_s22 }
  0x42   : > { %587 = vrot.lane.b32.xlu0 %v1285_v1, %s1340_s22 }
  0x43   : > { %629 = vrot.lane.b32.xlu1 %v1290_v5, %s1340_s22 }
  0x46   : > { %631 = vrot.lane.b32.xlu0 %v1304_v13, %s1340_s22 }
  0x47   : > { %359 = vrot.lane.b32.xlu1 %v1304_v13, %s1338_s20 }
  0x4a   : > { %627 = vrot.lane.b32.xlu0 %v1288_v3, %s1340_s22 }
  0x4b   : > { %625 = vrot.lane.b32.xlu1 %v1292_v4, %s1340_s22 }
  0x4e   : > { %666 = vrot.lane.b32.xlu0 %v1295_v7, %s1339_s21 }
  0x4f   : > { %668 = vrot.lane.b32.xlu1 %v1305_v14, %s1339_s21 }
  0x52   : > { %664 = vrot.lane.b32.xlu0 %v1400_v6, %s1339_s21 }
  0x53   : > { %662 = vrot.lane.b32.xlu1 %v1407_v8, %s1339_s21 }
  0x56   : > { %703 = vrot.lane.b32.xlu0 %v1300_v10, %s1339_s21 }
  0x57   : > { %705 = vrot.lane.b32.xlu1 %v1306_v15, %s1339_s21 }
  0x5a   : > { %701 = vrot.lane.b32.xlu0 %v1411_v9, %s1339_s21 }
  0x5b   : > { %699 = vrot.lane.b32.xlu1 %v1419_v11, %s1339_s21 }
  0x5e   : > { %740 = vrot.lane.b32.xlu0 %v1295_v7, %s1340_s22 }
  0x5f   : > { %742 = vrot.lane.b32.xlu1 %v1305_v14, %s1340_s22 }
  0x62   : > { %444 = vrot.lane.b32.xlu0 %v1305_v14, %s1338_s20 }
  0x63   : > { %738 = vrot.lane.b32.xlu1 %v1400_v6, %s1340_s22 }
  0x66   : > { %736 = vrot.lane.b32.xlu0 %v1407_v8, %s1340_s22 }
  0x67   : > { %777 = vrot.lane.b32.xlu1 %v1300_v10, %s1340_s22 }
  0x6a   : > { %779 = vrot.lane.b32.xlu0 %v1306_v15, %s1340_s22 }
  0x6b   : > { %481 = vrot.lane.b32.xlu1 %v1306_v15, %s1338_s20 }
  0x6e   : > { %775 = vrot.lane.b32.xlu0 %v1411_v9, %s1340_s22 }
  0x6f   : > { %773 = vrot.lane.b32.xlu1 %v1419_v11, %s1340_s22 }
  0x72   : > { %844 = vperm.xlu0 %1281, %v840_v18  }
  0x73   : > { %849 = vperm.xlu1 %1282, %v841_v19   ;;  %v1310_v19 = vld [vmem:[%s1386_s19 + $0x68] ss:$16 sps:$4 sm:$0xff]  }
  0x84   : > { %v318_v20 = vpop.permute.xlu0 %317 }
  0x85   : > { %v316_v21 = vpop.permute.xlu1 %315 }
  0x86   : > { %v324_v25 = vsel %vm323_vm0, %v316_v21, %v318_v20 }
  0x88   : > { %v1465_v22 = vpop.permute.xlu0 %319 }
  0x89   : > { %v356_v23 = vpop.permute.xlu1 %355  ;;  %v325_v24 = vsel %vm323_vm0, %v318_v20, %v1465_v22 }
  0x8a   : > { %866 = vmatprep.subr.bf16.mxu0 %v325_v24 }
  0x8b   : > { %867 = vmatpush1.bf16.msra.mxu0 %v324_v25 }
  0x8c   : > { %v1470_v26 = vpop.permute.xlu0 %357 }
  0x8d   : > { %v354_v27 = vpop.permute.xlu1 %353  ;;  %v362_v28 = vsel %vm323_vm0, %v356_v23, %v1470_v26 }
  0x8e   : > { %868 = vmatprep.subr.bf16.mxu0 %v362_v28  ;;  %v361_v29 = vsel %vm323_vm0, %v354_v27, %v356_v23 }
  0x8f   : > { %869 = vmatpush1.bf16.msra.mxu0 %v361_v29 }
  0x90   : > { %v441_v30 = vpop.permute.xlu0 %440  ;;  %870 = vmatprep.subr.bf16.mxu0 %v1400_v6 }
  0x91   : > { %v1476_v31 = vpop.permute.xlu1 %442 }
  0x92   : > { %v447_v34 = vsel %vm323_vm0, %v441_v30, %v1476_v31 }
  0x93   : > { %871 = vmatpush1.bf16.msra.mxu0 %v1407_v8 }
  0x94   : > { %v439_v32 = vpop.permute.xlu0 %438  ;;  %872 = vmatprep.subr.bf16.mxu0 %v1411_v9 }
  0x95   : > { %v478_v33 = vpop.permute.xlu1 %477  ;;  %v446_v37 = vsel %vm323_vm0, %v439_v32, %v441_v30 }
  0x97   : > { %873 = vmatpush1.bf16.msra.mxu0 %v1419_v11  ;;  %v1309_v11 = vld [vmem:[%s1386_s19 + $0x48] ss:$16 sps:$4 sm:$0xff]  }
  0x98   : > { %v1483_v35 = vpop.permute.xlu0 %479  ;;  %874 = vmatprep.subr.bf16.mxu0 %v447_v34 }
  0x99   : > { %v476_v36 = vpop.permute.xlu1 %475  ;;  %v484_v38 = vsel %vm323_vm0, %v478_v33, %v1483_v35 }
  0x9a   : > { %v483_v43 = vsel %vm323_vm0, %v476_v36, %v478_v33 }
  0x9b   : > { %875 = vmatpush1.bf16.msra.mxu0 %v446_v37 }
  0x9c   : > { %v517_v39 = vpop.permute.xlu0 %516  ;;  %876 = vmatprep.subr.bf16.mxu0 %v484_v38 }
  0x9d   : > { %v519_v41 = vpop.permute.xlu1 %518 }
  0x9e   : > { %v523_v42 = vsel %vm520_vm1, %v517_v39, %v519_v41 }
  0x9f   : > { %1230 = vmatprep.subr.bf16.mxu1 %v523_v42  ;;  %877 = vmatpush1.bf16.msra.mxu0 %v483_v43 }
  0xa0   : > { %v515_v44 = vpop.permute.xlu0 %514  ;;  %1231 = vmatpush3.bf16.msra.mxu1 %v1307_v40 }
  0xa1   : > { %v513_v45 = vpop.permute.xlu1 %512  ;;  %v522_v46 = vsel %vm520_vm1, %v515_v44, %v517_v39 }
  0xa2   : > { %878 = vmatprep.subr.bf16.mxu0 %v522_v46  ;;  %v521_v47 = vsel %vm520_vm1, %v513_v45, %v515_v44 }
  0xa3   : > { %879 = vmatpush1.bf16.msra.mxu0 %v521_v47 }
  0xa4   : > { %v555_v48 = vpop.permute.xlu0 %554 }
  0xa5   : > { %v557_v50 = vpop.permute.xlu1 %556 }
  0xa6   : > { %v560_v51 = vsel %vm520_vm1, %v555_v48, %v557_v50 }
  0xa7   : > { %1232 = vmatprep.subr.bf16.mxu1 %v560_v51 }
  0xa8   : > { %v553_v52 = vpop.permute.xlu0 %552  ;;  %1233 = vmatpush3.bf16.msra.mxu1 %v1308_v49 }
  0xa9   : > { %v551_v53 = vpop.permute.xlu1 %550  ;;  %v559_v54 = vsel %vm520_vm1, %v553_v52, %v555_v48 }
  0xaa   : > { %880 = vmatprep.subr.bf16.mxu0 %v559_v54  ;;  %v558_v55 = vsel %vm520_vm1, %v551_v53, %v553_v52 }
  0xab   : > { %881 = vmatpush1.bf16.msra.mxu0 %v558_v55 }
  0xac   : > { %v592_v56 = vpop.permute.xlu0 %591 }
  0xad   : > { %v594_v57 = vpop.permute.xlu1 %593 }
  0xae   : > { %v598_v58 = vsel %vm595_vm2, %v592_v56, %v594_v57 }
  0xaf   : > { %1234 = vmatprep.subr.bf16.mxu1 %v598_v58 }
  0xb0   : > { %v322_v59 = vpop.permute.xlu0 %321 }
  0xb1   : > { %v590_v60 = vpop.permute.xlu1 %589  ;;  %v326_v61 = vsel %vm323_vm0, %v1465_v22, %v322_v59 }
  0xb2   : > { %v597_v62 = vsel %vm595_vm2, %v590_v60, %v592_v56  ;;  %1235 = vmatpush3.bf16.msra.mxu1 %v326_v61 }
  0xb3   : > { %882 = vmatprep.subr.bf16.mxu0 %v597_v62 }
  0xb4   : > { %v588_v63 = vpop.permute.xlu0 %587 }
  0xb5   : > { %v630_v0 = vpop.permute.xlu1 %629  ;;  %v596_v1 = vsel %vm595_vm2, %v588_v63, %v590_v60 }
  0xb6   : > { %883 = vmatpush1.bf16.msra.mxu0 %v596_v1 }
  0xb8   : > { %v632_v2 = vpop.permute.xlu0 %631 }
  0xb9   : > { %v360_v3 = vpop.permute.xlu1 %359  ;;  %v635_v4 = vsel %vm595_vm2, %v630_v0, %v632_v2 }
  0xba   : > { %1236 = vmatprep.subr.bf16.mxu1 %v635_v4  ;;  %v363_v5 = vsel %vm323_vm0, %v1470_v26, %v360_v3 }
  0xbb   : > { %1237 = vmatpush3.bf16.msra.mxu1 %v363_v5 }
  0xbc   : > { %v628_v6 = vpop.permute.xlu0 %627 }
  0xbd   : > { %v626_v7 = vpop.permute.xlu1 %625  ;;  %v634_v8 = vsel %vm595_vm2, %v628_v6, %v630_v0 }
  0xbe   : > { %884 = vmatprep.subr.bf16.mxu0 %v634_v8  ;;  %v633_v9 = vsel %vm595_vm2, %v626_v7, %v628_v6 }
  0xbf   : > { %885 = vmatpush1.bf16.msra.mxu0 %v633_v9 }
  0xc0   : > { %v667_v10 = vpop.permute.xlu0 %666 }
  0xc1   : > { %v669_v12 = vpop.permute.xlu1 %668 }
  0xc2   : > { %v672_v13 = vsel %vm520_vm1, %v667_v10, %v669_v12 }
  0xc3   : > { %1238 = vmatprep.subr.bf16.mxu1 %v672_v13 }
  0xc4   : > { %v665_v14 = vpop.permute.xlu0 %664  ;;  %1239 = vmatpush3.bf16.msra.mxu1 %v1309_v11 }
  0xc5   : > { %v663_v15 = vpop.permute.xlu1 %662  ;;  %v671_v16 = vsel %vm520_vm1, %v665_v14, %v667_v10 }
  0xc6   : > { %886 = vmatprep.subr.bf16.mxu0 %v671_v16  ;;  %v670_v17 = vsel %vm520_vm1, %v663_v15, %v665_v14 }
  0xc7   : > { %887 = vmatpush1.bf16.msra.mxu0 %v670_v17 }
  0xc8   : > { %v704_v18 = vpop.permute.xlu0 %703 }
  0xc9   : > { %v706_v20 = vpop.permute.xlu1 %705 }
  0xca   : > { %v709_v21 = vsel %vm520_vm1, %v704_v18, %v706_v20 }
  0xcb   : > { %1240 = vmatprep.subr.bf16.mxu1 %v709_v21 }
  0xcc   : > { %v702_v22 = vpop.permute.xlu0 %701  ;;  %1241 = vmatpush3.bf16.msra.mxu1 %v1310_v19 }
  0xcd   : > { %v700_v23 = vpop.permute.xlu1 %699  ;;  %v708_v24 = vsel %vm520_vm1, %v702_v22, %v704_v18 }
  0xce   : > { %888 = vmatprep.subr.bf16.mxu0 %v708_v24  ;;  %v707_v25 = vsel %vm520_vm1, %v700_v23, %v702_v22 }
  0xcf   : > { %889 = vmatpush1.bf16.msra.mxu0 %v707_v25 }
  0xd0   : > { %v741_v26 = vpop.permute.xlu0 %740 }
  0xd1   : > { %v743_v27 = vpop.permute.xlu1 %742 }
  0xd2   : > { %v746_v28 = vsel %vm595_vm2, %v741_v26, %v743_v27 }
  0xd3   : > { %1242 = vmatprep.subr.bf16.mxu1 %v746_v28 }
  0xd4   : > { %v445_v29 = vpop.permute.xlu0 %444 }
  0xd5   : > { %v739_v30 = vpop.permute.xlu1 %738  ;;  %v448_v32 = vsel %vm323_vm0, %v1476_v31, %v445_v29  ;;  %v1311_v31 = vld [vmem:[%s1542_s1] ss:$8 sps:$4 sm:$0xff]  }
  0xd6   : > { %v745_v33 = vsel %vm595_vm2, %v739_v30, %v741_v26  ;;  %1243 = vmatpush3.bf16.msra.mxu1 %v448_v32 }
  0xd7   : > { %890 = vmatprep.subr.bf16.mxu0 %v745_v33 }
  0xd8   : > { %v737_v34 = vpop.permute.xlu0 %736 }
  0xd9   : > { %v778_v36 = vpop.permute.xlu1 %777  ;;  %v744_v37 = vsel %vm595_vm2, %v737_v34, %v739_v30 }
  0xda   : > { %891 = vmatpush1.bf16.msra.mxu0 %v744_v37 }
  0xdc   : > { %v780_v38 = vpop.permute.xlu0 %779 }
  0xdd   : > { %v482_v39 = vpop.permute.xlu1 %481  ;;  %v783_v40 = vsel %vm595_vm2, %v778_v36, %v780_v38 }
  0xde   : > { %1244 = vmatprep.subr.bf16.mxu1 %v783_v40  ;;  %v485_v41 = vsel %vm323_vm0, %v1483_v35, %v482_v39 }
  0xdf   : > { %1245 = vmatpush3.bf16.msra.mxu1 %v485_v41 }
  0xe0   : > { %v776_v42 = vpop.permute.xlu0 %775 }
  0xe1   : > { %v774_v43 = vpop.permute.xlu1 %773  ;;  %v782_v44 = vsel %vm595_vm2, %v776_v42, %v778_v36 }
  0xe2   : > { %892 = vmatprep.subr.bf16.mxu0 %v782_v44  ;;  %938 = vmatmul.mubr.bf16.vlgmr.msra.gmra.mrb[0].mxu1 %v1311_v31  ;;  %v781_v45 = vsel %vm595_vm2, %v774_v43, %v776_v42 }
  0xe3   : > { %893 = vmatpush1.bf16.msra.mxu0 %v781_v45 }
  0xe6   : > { %895 = vmatmul.mubr.bf16.vlgmr.msra.gmra.mrb[0].mxu0 %v1311_v31 }
  0xf1   : > { %v845_v48 = vpop.permute.xlu0 %844 }
  0xf2   : > { %v850_v51 = vpop.permute.xlu1 %849 }
 0x1b5   : > { %v1246_v46 = vpop.f32.mrb[0].mxu1 }
 0x1b6   : > { %v1247_v47 = vpop.f32.mrb[1].mxu1 }
 0x1b7   : > { %v1248_v35 = vadd.f32 %v1247_v47, %v1246_v46  ;;  %v1249_v49 = vpop.f32.mrb[2].mxu1 }
 0x1b8   : > { %v1250_v50 = vpop.f32.mrb[3].mxu1 }
 0x1b9   : > { %v940_v52 = vadd.f32 %v1248_v35, %v845_v48  ;;  %v1251_v53 = vadd.f32 %v1250_v50, %v1249_v49  ;;  %v896_v54 = vpop.f32.mrb[0].mxu0 }
 0x1ba   : > { %v897_v55 = vadd.f32 %v896_v54, %v845_v48  ;;  %v898_v56 = vpop.f32.mrb[1].mxu0 }
 0x1bb   : > { %v948_v57 = vmul.f32 0.2, %v940_v52  ;;  %v943_v58 = vadd.f32 %v1251_v53, %v850_v51  ;;  %v899_v59 = vadd.f32 %v898_v56, %v845_v48  ;;  %v900_v60 = vpop.f32.mrb[2].mxu0 }
 0x1bc   : > { %v946_v61 = vmul.f32 0.2, %v897_v55  ;;  %v901_v62 = vadd.f32 %v900_v60, %v850_v51  ;;  %v902_v63 = vpop.f32.mrb[3].mxu0 }
 0x1bd   : > { %v954_v0 = vmax.f32 %v940_v52, %v948_v57  ;;  %v951_v1 = vmul.f32 0.2, %v943_v58  ;;  %v947_v2 = vmul.f32 0.2, %v899_v59  ;;  %v903_v3 = vadd.f32 %v902_v63, %v850_v51 }
 0x1be   : > { %v952_v4 = vmax.f32 %v897_v55, %v946_v61  ;;  %v949_v5 = vmul.f32 0.2, %v901_v62 }
 0x1bf   : > { %v1227_v6 = vpack.c.bf16 %v954_v0, %v954_v0  ;;  %v957_v7 = vmax.f32 %v943_v58, %v951_v1  ;;  %v953_v8 = vmax.f32 %v899_v59, %v947_v2  ;;  %v950_v9 = vmul.f32 0.2, %v903_v3 }
 0x1c0   : > { %v955_v10 = vmax.f32 %v901_v62, %v949_v5 }
 0x1c1   : > { %979 = vst [vmem:[%s241_s7 + $0x8] sm:$0xf] %v1227_v6  ;;  %v1229_v11 = vpack.c.bf16 %v957_v7, %v957_v7  ;;  %v1226_v12 = vpack.c.bf16 %v953_v8, %v952_v4  ;;  %v956_v13 = vmax.f32 %v903_v3, %v950_v9 }
 0x1c3   : > { %981 = vst [vmem:[%s241_s7 + $0x14] sm:$0xf] %v1229_v11  ;;  %978 = vst [vmem:[%s241_s7] sm:$0xff] %v1226_v12  ;;  %v1228_v14 = vpack.c.bf16 %v956_v13, %v955_v10 }
 0x1c5   : > { %980 = vst [vmem:[%s241_s7 + $0xc] sm:$0xff] %v1228_v14 }
 0x1c6 PF: > { %s13_s14 = sadd.s32 1, %s1336_s14   ;;  %s1545_s12 = smov %s1332_s13 }
 0x1c7   : > { %p10_p5 = scmp.ge.s32.totalorder %s13_s14, 4   ;;  %s1546_s13 = smov %s1548_s15 }
 0x1c9   :  { %12 = sbr.rel (!%p10_p5) target bundleno = 2 (0x2), region = 75 }

// kernel: _lambda_.6
= control target key start
LH: loop header
LB: loop body
LE: loop exit
PB: predicated region body
PF: predicated region fallthrough
CT: control target
= control target key end

     0   :  { %s868_s9 = smov 0   ;;  %s870_s10 = smov 0   ;;  %s941_s0 = inlined_call_operand.vmem [shape: bf16[2,4,16,256], index: 0, kind: input, shape index: {}]   ;;  %s942_s1 = inlined_call_operand.vmem [shape: bf16[16,256], index: 1, kind: input, shape index: {}]   ;;  %s943_s2 = inlined_call_operand.vmem [shape: bf16[2,16,128], index: 2, kind: output, shape index: {}]  }
   0x1   :  { %s872_s11 = smov 0  }
   0x2 LB: > { %s24_s12 = sadd.s32 1, %s844_s10  ;;  %p680_p0 = scmp.ge.s32.totalorder %s848_s11, 1  ;;  %s848_s11 = sphi %s872_s11, %s12_s11   ;;  %s844_s10 = sphi %s870_s10, %s945_s10   ;;  %s840_s9 = sphi %s868_s9, %s944_s9  }
   0x3   : > { %p26_p1 = scmp.ge.s32.totalorder %s24_s12, 2  ;;  %p138_p2 = scmp.lt.s32.totalorder %s848_s11, 3 }
   0x5   : > { %s947_s12 = smov (%p26_p1, %s24_s12), 0  ;;  %p139_p3 = pnand %p680_p0, %p138_p2 }
   0x6   : > { %p170_p4 = scmp.lt.s32.totalorder (!%p139_p3), %s840_s9, 1  ;;  %s850_s17 = smov (!%p139_p3), 119   ;;  %v821_v8 = vld [vmem:[%s942_s1 + $0x4] ss:$8 sps:$4 sm:$0xff] (!%p139_p3)   ;;  %vm319_vm0 = vcmask (!%p139_p3), 973824   ;;  %vm354_vm1 = vcmask (!%p139_p3), 965632   ;;  %v512_v50 = vlaneseq (!%p139_p3) }
   0x7   : > { %142 = sbr.rel (%p139_p3) target bundleno = 575 (0x23f), region = 28  ;;  %s851_s18 = smov (!%p139_p3), 118   ;;  %503 = vmatprep.mubr.bf16.mxu0 (!%p139_p3), %v821_v8  ;;  %vm230_vm2 = vcmask (!%p139_p3), 1039360   ;;  %v819_v49 = vld [vmem:[%s942_s1] ss:$8 sps:$4 sm:$0xff] (!%p139_p3)  }
   0x8   : > { %s852_s19 = smov (!%p139_p3), 127   ;;  %v513_v51 = vand.u32 (!%p139_p3), 127, %v512_v50 }
   0xa   : > { %v924_v52 = vmul.u32.u64.low (!%p139_p3), 3817748708, %v513_v51  ;;  %v925_v53 = vmul.u32.u64.high 3817748708, %v513_v51, %v924_v52  ;;  %vm531_vm7 = vcmp.lt.s32.totalorder (!%p139_p3), %v513_v51, 72 }
   0xc   : > { %v520_v54 = vshrl.u32 (!%p139_p3), %v925_v53, 3 }
   0xe   : > { %s949_s9 = smov (!%p170_p4, %s840_s9), 1  ;;  %v521_v55 = vmul.u32 9, %v520_v54 }
   0xf   : > { %s743_s13 = sshll.u32 %s949_s9, 6  ;;  %s744_s24 = sshll.u32 %s949_s9, 3 }
  0x10   : > { %s892_s16 = scalar_lea.vmem %s941_s0, %s743_s13  ;;  %v522_v56 = vsub.s32 %v513_v51, %v521_v55  ;;  %s190_s27 = scalar_lea.vmem %s943_s2, %s744_s24 }
  0x11   : > { %v803_v0 = vld [vmem:[%s892_s16 + $0x10] ss:$8 sps:$4 sm:$0xff]   ;;  %v805_v1 = vld [vmem:[%s892_s16 + $0x14] ss:$8 sps:$4 sm:$0xff]   ;;  %v806_v2 = vld [vmem:[%s892_s16] ss:$8 sps:$4 sm:$0xff]  }
  0x12   : > { %333 = vrot.lane.b32.xlu1 %v803_v0, %s850_s17  ;;  %v808_v3 = vld [vmem:[%s892_s16 + $0x4] ss:$8 sps:$4 sm:$0xff]   ;;  %315 = vrot.lane.b32.xlu0 %v806_v2, %s850_s17  ;;  %v811_v5 = vld [vmem:[%s892_s16 + $0x20] ss:$8 sps:$4 sm:$0xff]   ;;  %vm525_vm3 = vcmp.ne.s32.totalorder %v522_v56, 0  ;;  %vm526_vm4 = vcmp.lt.s32.totalorder %v522_v56, 0 }
  0x13   : > { %v809_v4 = vld [vmem:[%s892_s16 + $0x24] ss:$8 sps:$4 sm:$0xff]   ;;  %v812_v6 = vld [vmem:[%s892_s16 + $0x34] ss:$8 sps:$4 sm:$0xff]   ;;  %v814_v7 = vld [vmem:[%s892_s16 + $0x30] ss:$8 sps:$4 sm:$0xff]  }
  0x14   : > { %v815_v12 = vld [vmem:[%s892_s16] ss:$8 sps:$4 sm:$0xff]   ;;  %v816_v17 = vld [vmem:[%s892_s16 + $0x10] ss:$8 sps:$4 sm:$0xff]   ;;  %v528_v57 = vadd.s32 9, %v522_v56  ;;  %vm527_vm5 = vmand %vm526_vm4, %vm525_vm3 }
  0x15   : > { %v817_v30 = vld [vmem:[%s892_s16 + $0x20] ss:$8 sps:$4 sm:$0xff]   ;;  %v818_v34 = vld [vmem:[%s892_s16 + $0x30] ss:$8 sps:$4 sm:$0xff]  }
  0x16   : > { %335 = vrot.lane.b32.xlu1 %v805_v1, %s850_s17  ;;  %317 = vrot.lane.b32.xlu0 %v808_v3, %s850_s17  ;;  %v529_v58 = vsel %vm527_vm5, %v528_v57, %v522_v56 }
  0x17   : > { %vm530_vm6 = vcmp.lt.s32.totalorder %v529_v58, 8 }
  0x18   : > { %vm532_vm8 = vmand %vm530_vm6, %vm531_vm7 }
  0x1a   : > { %352 = vrot.lane.b32.xlu1 %v808_v3, %s851_s18  ;;  %350 = vrot.lane.b32.xlu0 %v806_v2, %s851_s18 }
  0x1e   : > { %228 = vrot.lane.b32.xlu1 %v808_v3, %s852_s19  ;;  %226 = vrot.lane.b32.xlu0 %v806_v2, %s852_s19 }
  0x22   : > { %370 = vrot.lane.b32.xlu1 %v805_v1, %s851_s18  ;;  %368 = vrot.lane.b32.xlu0 %v803_v0, %s851_s18 }
  0x26   : > { %246 = vrot.lane.b32.xlu1 %v805_v1, %s852_s19  ;;  %244 = vrot.lane.b32.xlu0 %v803_v0, %s852_s19 }
  0x2a   : > { %387 = vrot.lane.b32.xlu1 %v809_v4, %s850_s17  ;;  %385 = vrot.lane.b32.xlu0 %v811_v5, %s850_s17 }
  0x2e   : > { %404 = vrot.lane.b32.xlu1 %v812_v6, %s850_s17  ;;  %402 = vrot.lane.b32.xlu0 %v814_v7, %s850_s17 }
  0x32   : > { %421 = vrot.lane.b32.xlu1 %v809_v4, %s851_s18  ;;  %419 = vrot.lane.b32.xlu0 %v811_v5, %s851_s18 }
  0x36   : > { %283 = vrot.lane.b32.xlu1 %v809_v4, %s852_s19  ;;  %281 = vrot.lane.b32.xlu0 %v811_v5, %s852_s19 }
  0x3a   : > { %438 = vrot.lane.b32.xlu1 %v812_v6, %s851_s18  ;;  %436 = vrot.lane.b32.xlu0 %v814_v7, %s851_s18 }
  0x3e   : > { %300 = vrot.lane.b32.xlu1 %v812_v6, %s852_s19  ;;  %298 = vrot.lane.b32.xlu0 %v814_v7, %s852_s19 }
  0x84   : > { %v334_v9 = vpop.permute.xlu1 %333  ;;  %v316_v10 = vpop.permute.xlu0 %315 }
  0x88   : > { %v336_v11 = vpop.permute.xlu1 %335  ;;  %v318_v13 = vpop.permute.xlu0 %317 }
  0x89   : > { %v320_v14 = vsel %vm319_vm0, %v316_v10, %v318_v13  ;;  %v337_v16 = vsel %vm319_vm0, %v334_v9, %v336_v11 }
  0x8a   : > { %752 = vmatprep.subr.bf16.mxu0 %v320_v14 }
  0x8b   : > { %753 = vmatpush3.bf16.msra.mxu0 %v815_v12 }
  0x8c   : > { %v353_v15 = vpop.permute.xlu1 %352  ;;  %v351_v18 = vpop.permute.xlu0 %350  ;;  %754 = vmatprep.subr.bf16.mxu0 %v337_v16 }
  0x8d   : > { %v355_v20 = vsel %vm354_vm1, %v351_v18, %v353_v15 }
  0x8f   : > { %755 = vmatpush3.bf16.msra.mxu0 %v816_v17 }
  0x90   : > { %v229_v19 = vpop.permute.xlu1 %228  ;;  %v227_v21 = vpop.permute.xlu0 %226  ;;  %756 = vmatprep.subr.bf16.mxu0 %v355_v20 }
  0x91   : > { %v231_v22 = vsel %vm230_vm2, %v227_v21, %v229_v19 }
  0x93   : > { %757 = vmatpush3.bf16.msra.mxu0 %v231_v22 }
  0x94   : > { %v371_v23 = vpop.permute.xlu1 %370  ;;  %v369_v24 = vpop.permute.xlu0 %368 }
  0x95   : > { %v372_v25 = vsel %vm354_vm1, %v369_v24, %v371_v23 }
  0x96   : > { %758 = vmatprep.subr.bf16.mxu0 %v372_v25 }
  0x98   : > { %v247_v26 = vpop.permute.xlu1 %246  ;;  %v245_v27 = vpop.permute.xlu0 %244 }
  0x99   : > { %v248_v28 = vsel %vm230_vm2, %v245_v27, %v247_v26 }
  0x9a   : > { %759 = vmatpush3.bf16.msra.mxu0 %v248_v28 }
  0x9c   : > { %v388_v29 = vpop.permute.xlu1 %387  ;;  %v386_v31 = vpop.permute.xlu0 %385 }
  0x9d   : > { %v389_v32 = vsel %vm319_vm0, %v386_v31, %v388_v29 }
  0x9e   : > { %760 = vmatprep.subr.bf16.mxu0 %v389_v32 }
  0x9f   : > { %761 = vmatpush3.bf16.msra.mxu0 %v817_v30 }
  0xa0   : > { %v405_v33 = vpop.permute.xlu1 %404  ;;  %v403_v35 = vpop.permute.xlu0 %402 }
  0xa1   : > { %v406_v36 = vsel %vm319_vm0, %v403_v35, %v405_v33 }
  0xa2   : > { %762 = vmatprep.subr.bf16.mxu0 %v406_v36 }
  0xa3   : > { %763 = vmatpush3.bf16.msra.mxu0 %v818_v34 }
  0xa4   : > { %v422_v37 = vpop.permute.xlu1 %421  ;;  %v420_v38 = vpop.permute.xlu0 %419 }
  0xa5   : > { %v423_v39 = vsel %vm354_vm1, %v420_v38, %v422_v37 }
  0xa6   : > { %764 = vmatprep.subr.bf16.mxu0 %v423_v39 }
  0xa8   : > { %v284_v40 = vpop.permute.xlu1 %283  ;;  %v282_v41 = vpop.permute.xlu0 %281 }
  0xa9   : > { %v285_v42 = vsel %vm230_vm2, %v282_v41, %v284_v40 }
  0xaa   : > { %765 = vmatpush3.bf16.msra.mxu0 %v285_v42 }
  0xac   : > { %v439_v43 = vpop.permute.xlu1 %438  ;;  %v437_v44 = vpop.permute.xlu0 %436 }
  0xad   : > { %v440_v45 = vsel %vm354_vm1, %v437_v44, %v439_v43 }
  0xae   : > { %766 = vmatprep.subr.bf16.mxu0 %v440_v45 }
  0xb0   : > { %v301_v46 = vpop.permute.xlu1 %300  ;;  %v299_v47 = vpop.permute.xlu0 %298 }
  0xb1   : > { %v302_v48 = vsel %vm230_vm2, %v299_v47, %v301_v46 }
  0xb2   : > { %767 = vmatpush3.bf16.msra.mxu0 %v302_v48 }
  0xb5   : > { %504 = vmatmul.mubr.bf16.vlgmr.msra.gmra.mrb[0].mxu0 %v819_v49 }
 0x188   : > { %v768_v59 = vpop.f32.mrb[0].mxu0 }
 0x189   : > { %v769_v60 = vpop.f32.mrb[1].mxu0 }
 0x18a   : > { %v770_v61 = vadd.f32 %v769_v60, %v768_v59  ;;  %v771_v62 = vpop.f32.mrb[2].mxu0 }
 0x18b   : > { %v772_v63 = vpop.f32.mrb[3].mxu0 }
 0x18c   : > { %v773_v0 = vadd.f32 %v772_v63, %v771_v62  ;;  %v535_v1 = vsel %vm532_vm8, %v770_v61, 0.0 }
 0x18d   : > { %537 = vadd.xlane.f32.xlu0 %v535_v1  ;;  %v541_v3 = vmul.f32 %v535_v1, %v535_v1 }
 0x18e   : > { %v536_v2 = vsel %vm532_vm8, %v773_v0, 0.0 }
 0x18f   : > { %539 = vadd.xlane.f32.xlu1 %v536_v2  ;;  %v542_v4 = vmul.f32 %v536_v2, %v536_v2 }
 0x191   : > { %543 = vadd.xlane.f32.xlu0 %v541_v3 }
 0x195   : > { %545 = vadd.xlane.f32.xlu0 %v542_v4 }
 0x21a   : > { %v538_v5 = vpop.xlane.xlu0 %537 }
 0x21b   : > { %v547_v6 = vmul.f32 0.015625, %v538_v5 }
 0x21c   : > { %v540_v7 = vpop.xlane.xlu1 %539 }
 0x21d   : > { %v551_v9 = vmul.f32 %v547_v6, %v547_v6  ;;  %v548_v10 = vmul.f32 0.015625, %v540_v7  ;;  %v557_v21 = vsub.f32 %v770_v61, %v547_v6 }
 0x21e   : > { %v544_v8 = vpop.xlane.xlu0 %543 }
 0x21f   : > { %v549_v11 = vmul.f32 0.015625, %v544_v8  ;;  %v552_v14 = vmul.f32 %v548_v10, %v548_v10  ;;  %v558_v24 = vsub.f32 %v773_v0, %v548_v10 }
 0x221   : > { %v553_v12 = vsub.f32 %v549_v11, %v551_v9 }
 0x222   : > { %v546_v13 = vpop.xlane.xlu0 %545 }
 0x223   : > { %v555_v15 = vmax.f32 %v553_v12, 0.0  ;;  %v550_v16 = vmul.f32 0.015625, %v546_v13 }
 0x225   : > { %v559_v17 = vadd.f32 1e-05, %v555_v15  ;;  %v554_v18 = vsub.f32 %v550_v16, %v552_v14 }
 0x227   : > { %822 = vrsqrt.f32 %v559_v17  ;;  %v556_v19 = vmax.f32 %v554_v18, 0.0 }
 0x229   : > { %v560_v20 = vadd.f32 1e-05, %v556_v19 }
 0x22b   : > { %824 = vrsqrt.f32 %v560_v20 }
 0x231   : > { %v823_v22 = vpop.eup %822 }
 0x232   : > { %v563_v23 = vmul.f32 %v823_v22, %v557_v21 }
 0x234   : > { %v565_v26 = vmul.f32 0.2, %v563_v23 }
 0x235   : > { %v825_v25 = vpop.eup %824 }
 0x236   : > { %v564_v27 = vmul.f32 %v825_v25, %v558_v24  ;;  %v567_v29 = vmax.f32 %v563_v23, %v565_v26 }
 0x238   : > { %v566_v28 = vmul.f32 0.2, %v564_v27 }
 0x23a   : > { %v568_v30 = vmax.f32 %v564_v27, %v566_v28 }
 0x23c   : > { %v750_v31 = vpack.c.bf16 %v568_v30, %v567_v29 }
 0x23e   : > { %751 = vst [vmem:[%s190_s27] sm:$0xff] %v750_v31  }
 0x23f PF: > { %s12_s11 = sadd.s32 1, %s848_s11   ;;  %s944_s9 = smov %s844_s10 }
 0x240   : > { %p9_p5 = scmp.ge.s32.totalorder %s12_s11, 4   ;;  %s945_s10 = smov %s947_s12 }
 0x242   :  { %11 = sbr.rel (!%p9_p5) target bundleno = 2 (0x2), region = 68 }

// kernel: _lambda_.7
= control target key start
LH: loop header
LB: loop body
LE: loop exit
PB: predicated region body
PF: predicated region fallthrough
CT: control target
= control target key end

     0   :  { %s973_s9 = smov 0   ;;  %s975_s10 = smov 0   ;;  %s1080_s0 = inlined_call_operand.vmem [shape: bf16[2,4,16,256], index: 0, kind: input, shape index: {}]   ;;  %s1081_s1 = inlined_call_operand.vmem [shape: bf16[32,256], index: 1, kind: input, shape index: {}]   ;;  %s1082_s2 = inlined_call_operand.vmem [shape: bf16[2,32,128], index: 2, kind: output, shape index: {}]  }
   0x1   :  { %s977_s11 = smov 0  }
   0x2 LB: > { %s24_s12 = sadd.s32 1, %s949_s10  ;;  %p744_p0 = scmp.ge.s32.totalorder %s953_s11, 1  ;;  %s953_s11 = sphi %s977_s11, %s12_s11   ;;  %s949_s10 = sphi %s975_s10, %s1086_s10   ;;  %s945_s9 = sphi %s973_s9, %s1085_s9  }
   0x3   : > { %p26_p1 = scmp.ge.s32.totalorder %s24_s12, 2  ;;  %p138_p2 = scmp.lt.s32.totalorder %s953_s11, 3 }
   0x5   : > { %s1088_s12 = smov (%p26_p1, %s24_s12), 0  ;;  %p139_p3 = pnand %p744_p0, %p138_p2 }
   0x6   : > { %p170_p4 = scmp.lt.s32.totalorder (!%p139_p3), %s945_s9, 1  ;;  %s955_s17 = smov (!%p139_p3), 123   ;;  %v919_v8 = vld [vmem:[%s1081_s1 + $0x4] ss:$8 sps:$4 sm:$0xff] (!%p139_p3)   ;;  %v922_v9 = vld [vmem:[%s1081_s1 + $0x14] ss:$8 sps:$4 sm:$0xff] (!%p139_p3)   ;;  %v532_v52 = vlaneseq (!%p139_p3) }
   0x7   : > { %142 = sbr.rel (%p139_p3) target bundleno = 583 (0x247), region = 28  ;;  %s956_s18 = smov (!%p139_p3), 122   ;;  %515 = vmatprep.mubr.bf16.mxu0 (!%p139_p3), %v919_v8  ;;  %523 = vmatprep.mubr.bf16.mxu1 (!%p139_p3), %v922_v9  ;;  %vm319_vm0 = vcmask (!%p139_p3), 1006592   ;;  %vm354_vm1 = vcmask (!%p139_p3), 998400   ;;  %vm230_vm2 = vcmask (!%p139_p3), 1039360  }
   0x8   : > { %s957_s19 = smov (!%p139_p3), 127   ;;  %v917_v50 = vld [vmem:[%s1081_s1] ss:$8 sps:$4 sm:$0xff] (!%p139_p3)   ;;  %v920_v51 = vld [vmem:[%s1081_s1 + $0x10] ss:$8 sps:$4 sm:$0xff] (!%p139_p3)   ;;  %v533_v53 = vand.u32 (!%p139_p3), 127, %v532_v52 }
   0xa   : > { %v1035_v54 = vmul.u32.u64.low (!%p139_p3), 3435973837, %v533_v53  ;;  %v1036_v55 = vmul.u32.u64.high 3435973837, %v533_v53, %v1035_v54  ;;  %vm551_vm7 = vcmp.lt.s32.totalorder (!%p139_p3), %v533_v53, 20 }
   0xc   : > { %v540_v56 = vshrl.u32 (!%p139_p3), %v1036_v55, 2 }
   0xe   : > { %s1090_s9 = smov (!%p170_p4, %s945_s9), 1  ;;  %v541_v57 = vmul.u32 5, %v540_v56 }
   0xf   : > { %s811_s13 = sshll.u32 %s1090_s9, 6  ;;  %s812_s28 = sshll.u32 %s1090_s9, 4 }
  0x10   : > { %s997_s16 = scalar_lea.vmem %s1080_s0, %s811_s13  ;;  %v542_v58 = vsub.s32 %v533_v53, %v541_v57  ;;  %s190_s3 = scalar_lea.vmem %s1082_s2, %s812_s28 }
  0x11   : > { %v901_v0 = vld [vmem:[%s997_s16 + $0x10] ss:$8 sps:$4 sm:$0xff]   ;;  %v903_v1 = vld [vmem:[%s997_s16 + $0x14] ss:$8 sps:$4 sm:$0xff]   ;;  %v904_v2 = vld [vmem:[%s997_s16] ss:$8 sps:$4 sm:$0xff]  }
  0x12   : > { %333 = vrot.lane.b32.xlu1 %v901_v0, %s955_s17  ;;  %v906_v3 = vld [vmem:[%s997_s16 + $0x4] ss:$8 sps:$4 sm:$0xff]   ;;  %315 = vrot.lane.b32.xlu0 %v904_v2, %s955_s17  ;;  %v909_v5 = vld [vmem:[%s997_s16 + $0x20] ss:$8 sps:$4 sm:$0xff]   ;;  %vm545_vm3 = vcmp.ne.s32.totalorder %v542_v58, 0  ;;  %vm546_vm4 = vcmp.lt.s32.totalorder %v542_v58, 0 }
  0x13   : > { %v907_v4 = vld [vmem:[%s997_s16 + $0x24] ss:$8 sps:$4 sm:$0xff]   ;;  %v910_v6 = vld [vmem:[%s997_s16 + $0x34] ss:$8 sps:$4 sm:$0xff]   ;;  %v912_v7 = vld [vmem:[%s997_s16 + $0x30] ss:$8 sps:$4 sm:$0xff]  }
  0x14   : > { %v913_v13 = vld [vmem:[%s997_s16] ss:$8 sps:$4 sm:$0xff]   ;;  %v914_v18 = vld [vmem:[%s997_s16 + $0x10] ss:$8 sps:$4 sm:$0xff]   ;;  %v548_v59 = vadd.s32 5, %v542_v58  ;;  %vm547_vm5 = vmand %vm546_vm4, %vm545_vm3 }
  0x15   : > { %v915_v31 = vld [vmem:[%s997_s16 + $0x20] ss:$8 sps:$4 sm:$0xff]   ;;  %v916_v35 = vld [vmem:[%s997_s16 + $0x30] ss:$8 sps:$4 sm:$0xff]  }
  0x16   : > { %335 = vrot.lane.b32.xlu1 %v903_v1, %s955_s17  ;;  %317 = vrot.lane.b32.xlu0 %v906_v3, %s955_s17  ;;  %v549_v60 = vsel %vm547_vm5, %v548_v59, %v542_v58 }
  0x17   : > { %vm550_vm6 = vcmp.lt.s32.totalorder %v549_v60, 4 }
  0x18   : > { %vm1039_vm8 = vmand %vm550_vm6, %vm551_vm7 }
  0x1a   : > { %352 = vrot.lane.b32.xlu1 %v906_v3, %s956_s18  ;;  %350 = vrot.lane.b32.xlu0 %v904_v2, %s956_s18 }
  0x1e   : > { %228 = vrot.lane.b32.xlu1 %v906_v3, %s957_s19  ;;  %226 = vrot.lane.b32.xlu0 %v904_v2, %s957_s19 }
  0x22   : > { %370 = vrot.lane.b32.xlu1 %v903_v1, %s956_s18  ;;  %368 = vrot.lane.b32.xlu0 %v901_v0, %s956_s18 }
  0x26   : > { %246 = vrot.lane.b32.xlu1 %v903_v1, %s957_s19  ;;  %244 = vrot.lane.b32.xlu0 %v901_v0, %s957_s19 }
  0x2a   : > { %387 = vrot.lane.b32.xlu1 %v907_v4, %s955_s17  ;;  %385 = vrot.lane.b32.xlu0 %v909_v5, %s955_s17 }
  0x2e   : > { %404 = vrot.lane.b32.xlu1 %v910_v6, %s955_s17  ;;  %402 = vrot.lane.b32.xlu0 %v912_v7, %s955_s17 }
  0x32   : > { %421 = vrot.lane.b32.xlu1 %v907_v4, %s956_s18  ;;  %419 = vrot.lane.b32.xlu0 %v909_v5, %s956_s18 }
  0x36   : > { %283 = vrot.lane.b32.xlu1 %v907_v4, %s957_s19  ;;  %281 = vrot.lane.b32.xlu0 %v909_v5, %s957_s19 }
  0x3a   : > { %438 = vrot.lane.b32.xlu1 %v910_v6, %s956_s18  ;;  %436 = vrot.lane.b32.xlu0 %v912_v7, %s956_s18 }
  0x3e   : > { %300 = vrot.lane.b32.xlu1 %v910_v6, %s957_s19  ;;  %298 = vrot.lane.b32.xlu0 %v912_v7, %s957_s19 }
  0x84   : > { %v334_v10 = vpop.permute.xlu1 %333  ;;  %v316_v11 = vpop.permute.xlu0 %315 }
  0x88   : > { %v336_v12 = vpop.permute.xlu1 %335  ;;  %v318_v14 = vpop.permute.xlu0 %317 }
  0x89   : > { %v320_v15 = vsel %vm319_vm0, %v316_v11, %v318_v14  ;;  %v337_v17 = vsel %vm319_vm0, %v334_v10, %v336_v12 }
  0x8a   : > { %828 = vmatprep.subr.bf16.mxu0 %v320_v15  ;;  %856 = vmatprep.subr.bf16.mxu1 %v320_v15 }
  0x8b   : > { %829 = vmatpush3.bf16.msra.mxu0 %v913_v13  ;;  %864 = vmatpush3.bf16.msra.mxu1 %v913_v13 }
  0x8c   : > { %v353_v16 = vpop.permute.xlu1 %352  ;;  %v351_v19 = vpop.permute.xlu0 %350  ;;  %830 = vmatprep.subr.bf16.mxu0 %v337_v17  ;;  %857 = vmatprep.subr.bf16.mxu1 %v337_v17 }
  0x8d   : > { %v355_v21 = vsel %vm354_vm1, %v351_v19, %v353_v16 }
  0x8f   : > { %831 = vmatpush3.bf16.msra.mxu0 %v914_v18  ;;  %865 = vmatpush3.bf16.msra.mxu1 %v914_v18 }
  0x90   : > { %v229_v20 = vpop.permute.xlu1 %228  ;;  %v227_v22 = vpop.permute.xlu0 %226  ;;  %832 = vmatprep.subr.bf16.mxu0 %v355_v21  ;;  %858 = vmatprep.subr.bf16.mxu1 %v355_v21 }
  0x91   : > { %v231_v23 = vsel %vm230_vm2, %v227_v22, %v229_v20 }
  0x93   : > { %833 = vmatpush3.bf16.msra.mxu0 %v231_v23  ;;  %866 = vmatpush3.bf16.msra.mxu1 %v231_v23 }
  0x94   : > { %v371_v24 = vpop.permute.xlu1 %370  ;;  %v369_v25 = vpop.permute.xlu0 %368 }
  0x95   : > { %v372_v26 = vsel %vm354_vm1, %v369_v25, %v371_v24 }
  0x96   : > { %834 = vmatprep.subr.bf16.mxu0 %v372_v26  ;;  %859 = vmatprep.subr.bf16.mxu1 %v372_v26 }
  0x98   : > { %v247_v27 = vpop.permute.xlu1 %246  ;;  %v245_v28 = vpop.permute.xlu0 %244 }
  0x99   : > { %v248_v29 = vsel %vm230_vm2, %v245_v28, %v247_v27 }
  0x9a   : > { %835 = vmatpush3.bf16.msra.mxu0 %v248_v29  ;;  %867 = vmatpush3.bf16.msra.mxu1 %v248_v29 }
  0x9c   : > { %v388_v30 = vpop.permute.xlu1 %387  ;;  %v386_v32 = vpop.permute.xlu0 %385 }
  0x9d   : > { %v389_v33 = vsel %vm319_vm0, %v386_v32, %v388_v30 }
  0x9e   : > { %836 = vmatprep.subr.bf16.mxu0 %v389_v33  ;;  %860 = vmatprep.subr.bf16.mxu1 %v389_v33 }
  0x9f   : > { %837 = vmatpush3.bf16.msra.mxu0 %v915_v31  ;;  %868 = vmatpush3.bf16.msra.mxu1 %v915_v31 }
  0xa0   : > { %v405_v34 = vpop.permute.xlu1 %404  ;;  %v403_v36 = vpop.permute.xlu0 %402 }
  0xa1   : > { %v406_v37 = vsel %vm319_vm0, %v403_v36, %v405_v34 }
  0xa2   : > { %838 = vmatprep.subr.bf16.mxu0 %v406_v37  ;;  %861 = vmatprep.subr.bf16.mxu1 %v406_v37 }
  0xa3   : > { %839 = vmatpush3.bf16.msra.mxu0 %v916_v35  ;;  %869 = vmatpush3.bf16.msra.mxu1 %v916_v35 }
  0xa4   : > { %v422_v38 = vpop.permute.xlu1 %421  ;;  %v420_v39 = vpop.permute.xlu0 %419 }
  0xa5   : > { %v423_v40 = vsel %vm354_vm1, %v420_v39, %v422_v38 }
  0xa6   : > { %840 = vmatprep.subr.bf16.mxu0 %v423_v40  ;;  %862 = vmatprep.subr.bf16.mxu1 %v423_v40 }
  0xa8   : > { %v284_v41 = vpop.permute.xlu1 %283  ;;  %v282_v42 = vpop.permute.xlu0 %281 }
  0xa9   : > { %v285_v43 = vsel %vm230_vm2, %v282_v42, %v284_v41 }
  0xaa   : > { %841 = vmatpush3.bf16.msra.mxu0 %v285_v43  ;;  %870 = vmatpush3.bf16.msra.mxu1 %v285_v43 }
  0xac   : > { %v439_v44 = vpop.permute.xlu1 %438  ;;  %v437_v45 = vpop.permute.xlu0 %436 }
  0xad   : > { %v440_v46 = vsel %vm354_vm1, %v437_v45, %v439_v44 }
  0xae   : > { %842 = vmatprep.subr.bf16.mxu0 %v440_v46  ;;  %863 = vmatprep.subr.bf16.mxu1 %v440_v46 }
  0xb0   : > { %v301_v47 = vpop.permute.xlu1 %300  ;;  %v299_v48 = vpop.permute.xlu0 %298 }
  0xb1   : > { %v302_v49 = vsel %vm230_vm2, %v299_v48, %v301_v47 }
  0xb2   : > { %843 = vmatpush3.bf16.msra.mxu0 %v302_v49  ;;  %871 = vmatpush3.bf16.msra.mxu1 %v302_v49 }
  0xb5   : > { %516 = vmatmul.mubr.bf16.vlgmr.msra.gmra.mrb[0].mxu0 %v917_v50  ;;  %524 = vmatmul.mubr.bf16.vlgmr.msra.gmra.mrb[0].mxu1 %v920_v51 }
 0x188   : > { %v844_v61 = vpop.f32.mrb[0].mxu0  ;;  %v850_v62 = vpop.f32.mrb[0].mxu1 }
 0x189   : > { %v845_v63 = vpop.f32.mrb[1].mxu0  ;;  %v851_v0 = vpop.f32.mrb[1].mxu1 }
 0x18a   : > { %v1043_v2 = vadd.f32 %v845_v63, %v844_v61  ;;  %v847_v3 = vpop.f32.mrb[2].mxu0  ;;  %v1045_v4 = vadd.f32 %v851_v0, %v850_v62  ;;  %v853_v5 = vpop.f32.mrb[2].mxu1 }
 0x18b   : > { %v848_v6 = vpop.f32.mrb[3].mxu0  ;;  %v854_v7 = vpop.f32.mrb[3].mxu1 }
 0x18c   : > { %v1047_v8 = vadd.f32 %v848_v6, %v847_v3  ;;  %v1049_v9 = vadd.f32 %v854_v7, %v853_v5  ;;  %v555_v10 = vsel %vm1039_vm8, %v1043_v2, 0.0  ;;  %v557_v12 = vsel %vm1039_vm8, %v1045_v4, 0.0 }
 0x18d   : > { %559 = vadd.xlane.f32.xlu0 %v555_v10  ;;  %v567_v13 = vmul.f32 %v555_v10, %v555_v10  ;;  %v569_v15 = vmul.f32 %v557_v12, %v557_v12 }
 0x18e   : > { %v556_v11 = vsel %vm1039_vm8, %v1047_v8, 0.0  ;;  %v558_v14 = vsel %vm1039_vm8, %v1049_v9, 0.0 }
 0x18f   : > { %561 = vadd.xlane.f32.xlu1 %v556_v11  ;;  %v568_v16 = vmul.f32 %v556_v11, %v556_v11  ;;  %v570_v17 = vmul.f32 %v558_v14, %v558_v14 }
 0x191   : > { %563 = vadd.xlane.f32.xlu0 %v557_v12 }
 0x193   : > { %571 = vadd.xlane.f32.xlu1 %v567_v13 }
 0x195   : > { %565 = vadd.xlane.f32.xlu0 %v558_v14 }
 0x197   : > { %575 = vadd.xlane.f32.xlu1 %v569_v15 }
 0x199   : > { %573 = vadd.xlane.f32.xlu0 %v568_v16 }
 0x19d   : > { %577 = vadd.xlane.f32.xlu0 %v570_v17 }
 0x21a   : > { %v560_v18 = vpop.xlane.xlu0 %559 }
 0x21b   : > { %v579_v20 = vmul.f32 0.0625, %v560_v18 }
 0x21c   : > { %v562_v19 = vpop.xlane.xlu1 %561 }
 0x21d   : > { %v587_v23 = vmul.f32 %v579_v20, %v579_v20  ;;  %v580_v26 = vmul.f32 0.0625, %v562_v19  ;;  %v599_v51 = vsub.f32 %v1043_v2, %v579_v20 }
 0x21e   : > { %v564_v21 = vpop.xlane.xlu0 %563 }
 0x21f   : > { %v581_v24 = vmul.f32 0.0625, %v564_v21  ;;  %v588_v33 = vmul.f32 %v580_v26, %v580_v26  ;;  %v600_v54 = vsub.f32 %v1047_v8, %v580_v26 }
 0x220   : > { %v572_v22 = vpop.xlane.xlu1 %571 }
 0x221   : > { %v583_v25 = vmul.f32 0.0625, %v572_v22  ;;  %v589_v30 = vmul.f32 %v581_v24, %v581_v24  ;;  %v601_v55 = vsub.f32 %v1045_v4, %v581_v24 }
 0x222   : > { %v566_v27 = vpop.xlane.xlu0 %565 }
 0x223   : > { %v591_v28 = vsub.f32 %v583_v25, %v587_v23  ;;  %v582_v36 = vmul.f32 0.0625, %v566_v27 }
 0x224   : > { %v576_v29 = vpop.xlane.xlu1 %575 }
 0x225   : > { %v595_v31 = vmax.f32 %v591_v28, 0.0  ;;  %v585_v32 = vmul.f32 0.0625, %v576_v29  ;;  %v590_v42 = vmul.f32 %v582_v36, %v582_v36  ;;  %v602_v60 = vsub.f32 %v1049_v9, %v582_v36 }
 0x226   : > { %v574_v34 = vpop.xlane.xlu0 %573 }
 0x227   : > { %v603_v35 = vadd.f32 1e-05, %v595_v31  ;;  %v593_v37 = vsub.f32 %v585_v32, %v589_v30  ;;  %v584_v38 = vmul.f32 0.0625, %v574_v34 }
 0x229   : > { %923 = vrsqrt.f32 %v603_v35  ;;  %v597_v39 = vmax.f32 %v593_v37, 0.0  ;;  %v592_v40 = vsub.f32 %v584_v38, %v588_v33 }
 0x22a   : > { %v578_v41 = vpop.xlane.xlu0 %577 }
 0x22b   : > { %v605_v43 = vadd.f32 1e-05, %v597_v39  ;;  %v596_v44 = vmax.f32 %v592_v40, 0.0  ;;  %v586_v45 = vmul.f32 0.0625, %v578_v41 }
 0x22d   : > { %925 = vrsqrt.f32 %v605_v43  ;;  %v604_v46 = vadd.f32 1e-05, %v596_v44  ;;  %v594_v47 = vsub.f32 %v586_v45, %v590_v42 }
 0x22f   : > { %927 = vrsqrt.f32 %v604_v46  ;;  %v598_v48 = vmax.f32 %v594_v47, 0.0 }
 0x231   : > { %v606_v49 = vadd.f32 1e-05, %v598_v48 }
 0x233   : > { %v924_v50 = vpop.eup %923  ;;  %929 = vrsqrt.f32 %v606_v49 }
 0x234   : > { %v611_v52 = vmul.f32 %v924_v50, %v599_v51 }
 0x236   : > { %v615_v57 = vmul.f32 0.2, %v611_v52 }
 0x237   : > { %v926_v53 = vpop.eup %925 }
 0x238   : > { %v613_v58 = vmul.f32 %v926_v53, %v601_v55  ;;  %v619_v63 = vmax.f32 %v611_v52, %v615_v57 }
 0x239   : > { %v928_v56 = vpop.eup %927 }
 0x23a   : > { %v612_v59 = vmul.f32 %v928_v56, %v600_v54  ;;  %v617_v0 = vmul.f32 0.2, %v613_v58 }
 0x23c   : > { %v616_v61 = vmul.f32 0.2, %v612_v59  ;;  %v621_v4 = vmax.f32 %v613_v58, %v617_v0 }
 0x23d   : > { %v930_v62 = vpop.eup %929 }
 0x23e   : > { %v620_v1 = vmax.f32 %v612_v59, %v616_v61  ;;  %v614_v3 = vmul.f32 %v930_v62, %v602_v60 }
 0x240   : > { %v820_v2 = vpack.c.bf16 %v620_v1, %v619_v63  ;;  %v618_v5 = vmul.f32 0.2, %v614_v3 }
 0x242   : > { %821 = vst [vmem:[%s190_s3] sm:$0xff] %v820_v2   ;;  %v622_v6 = vmax.f32 %v614_v3, %v618_v5 }
 0x244   : > { %v825_v7 = vpack.c.bf16 %v622_v6, %v621_v4 }
 0x246   : > { %827 = vst [vmem:[%s190_s3 + $0x8] sm:$0xff] %v825_v7  }
 0x247 PF: > { %s12_s11 = sadd.s32 1, %s953_s11   ;;  %s1085_s9 = smov %s949_s10 }
 0x248   : > { %p9_p5 = scmp.ge.s32.totalorder %s12_s11, 4   ;;  %s1086_s10 = smov %s1088_s12 }
 0x24a   :  { %11 = sbr.rel (!%p9_p5) target bundleno = 2 (0x2), region = 68 }

// kernel: _lambda_.8
= control target key start
LH: loop header
LB: loop body
LE: loop exit
PB: predicated region body
PF: predicated region fallthrough
CT: control target
= control target key end

     0   :  { %s1647_s9 = smov 0   ;;  %s1649_s10 = smov 0   ;;  %s1918_s0 = inlined_call_operand.vmem [shape: bf16[2,1,32,256], index: 0, kind: input, shape index: {}]   ;;  %s1919_s1 = inlined_call_operand.vmem [shape: bf16[64,512], index: 1, kind: input, shape index: {}]   ;;  %s1920_s2 = inlined_call_operand.vmem [shape: bf16[2,64,128], index: 2, kind: output, shape index: {}]  }
   0x1   :  { %s1651_s11 = smov 0  }
   0x2 LB: > { %s24_s12 = sadd.s32 1, %s1611_s10  ;;  %p1298_p0 = scmp.ge.s32.totalorder %s1615_s11, 1  ;;  %s1615_s11 = sphi %s1651_s11, %s12_s11   ;;  %s1611_s10 = sphi %s1649_s10, %s1924_s10   ;;  %s1607_s9 = sphi %s1647_s9, %s1923_s9  }
   0x3   : > { %p26_p1 = scmp.ge.s32.totalorder %s24_s12, 2  ;;  %p138_p2 = scmp.lt.s32.totalorder %s1615_s11, 3 }
   0x5   : > { %s1926_s12 = smov (%p26_p1, %s24_s12), 0  ;;  %p139_p3 = pnand %p1298_p0, %p138_p2 }
   0x6   : > { %p170_p4 = scmp.lt.s32.totalorder (!%p139_p3), %s1607_s9, 1  ;;  %s1617_s17 = smov (!%p139_p3), 110   ;;  %v1555_v4 = vld [vmem:[%s1919_s1 + $0x4] ss:$16 sps:$4 sm:$0xff] (!%p139_p3)   ;;  %v1558_v5 = vld [vmem:[%s1919_s1 + $0xc] ss:$16 sps:$4 sm:$0xff] (!%p139_p3)  }
   0x7   : > { %142 = sbr.rel (%p139_p3) target bundleno = 673 (0x2a1), region = 28  ;;  %s1618_s18 = smov (!%p139_p3), 122   ;;  %900 = vmatprep.mubr.bf16.mxu0 (!%p139_p3), %v1555_v4  ;;  %965 = vmatprep.mubr.bf16.mxu1 (!%p139_p3), %v1558_v5  ;;  %vm348_vm0 = vcmask (!%p139_p3), 998400   ;;  %vm628_vm1 = vcmask (!%p139_p3), 900096   ;;  %vm488_vm2 = vcmask (!%p139_p3), 949248   ;;  %vm383_vm3 = vcmask (!%p139_p3), 990208  }
   0x8   : > { %s1619_s19 = smov (!%p139_p3), 116   ;;  %s1620_s20 = smov (!%p139_p3), 121   ;;  %vm663_vm4 = vcmask (!%p139_p3), 891904   ;;  %vm243_vm5 = vcmask (!%p139_p3), 1039360   ;;  %vm523_vm6 = vcmask (!%p139_p3), 941056   ;;  %vm418_vm7 = vcmask (!%p139_p3), 982016  }
   0x9   : > { %s1621_s21 = smov (!%p139_p3), 109   ;;  %s1622_s22 = smov (!%p139_p3), 127   ;;  %vm698_vm8 = vcmask (!%p139_p3), 883712   ;;  %vm278_vm9 = vcmask (!%p139_p3), 1031168   ;;  %vm558_vm10 = vcmask (!%p139_p3), 932864   ;;  %vm453_vm11 = vcmask (!%p139_p3), 973824  }
   0xa   : > { %s1623_s23 = smov (!%p139_p3), 115   ;;  %s1624_s24 = smov (!%p139_p3), 120   ;;  %vm733_vm12 = vcmask (!%p139_p3), 875520   ;;  %vm313_vm13 = vcmask (!%p139_p3), 1022976   ;;  %vm593_vm14 = vcmask (!%p139_p3), 924672  }
   0xb   : > { %s1625_s25 = smov (!%p139_p3), 108   ;;  %s1626_s26 = smov (!%p139_p3), 126  }
   0xc   : > { %s1627_s27 = smov (!%p139_p3), 114   ;;  %s1628_s28 = smov (!%p139_p3), 119  }
   0xd   : > { %s1629_s29 = smov (!%p139_p3), 107   ;;  %s1630_s30 = smov (!%p139_p3), 125  }
   0xe   : > { %s1928_s9 = smov (!%p170_p4, %s1607_s9), 1  ;;  %s1631_s3 = smov 113  }
   0xf   : > { %s1391_s13 = sshll.u32 %s1928_s9, 5 }
  0x10   : > { %s1673_s16 = scalar_lea.vmem %s1918_s0, %s1391_s13 }
  0x11   : > { %v1676_v0 = vld [vmem:[%s1673_s16] ss:$8 sps:$4 sm:$0xff]   ;;  %v1679_v1 = vld [vmem:[%s1673_s16 + $0x4] ss:$8 sps:$4 sm:$0xff]   ;;  %v1688_v2 = vld [vmem:[%s1673_s16 + $0x14] ss:$8 sps:$4 sm:$0xff]  }
  0x12   : > { %620 = vrot.lane.b32.xlu1 %v1676_v0, %s1617_s17  ;;  %340 = vrot.lane.b32.xlu0 %v1676_v0, %s1618_s18  ;;  %v1691_v3 = vld [vmem:[%s1673_s16 + $0x10] ss:$8 sps:$4 sm:$0xff]   ;;  %v1551_v8 = vld [vmem:[%s1673_s16] ss:$8 sps:$4 sm:$0xff]  }
  0x13   : > { %v1552_v16 = vld [vmem:[%s1673_s16 + $0x10] ss:$8 sps:$4 sm:$0xff]  }
  0x16   : > { %622 = vrot.lane.b32.xlu1 %v1679_v1, %s1617_s17  ;;  %342 = vrot.lane.b32.xlu0 %v1679_v1, %s1618_s18 }
  0x1a   : > { %482 = vrot.lane.b32.xlu1 %v1679_v1, %s1619_s19  ;;  %480 = vrot.lane.b32.xlu0 %v1676_v0, %s1619_s19 }
  0x1e   : > { %346 = vrot.lane.b32.xlu1 %v1688_v2, %s1618_s18  ;;  %344 = vrot.lane.b32.xlu0 %v1691_v3, %s1618_s18 }
  0x22   : > { %626 = vrot.lane.b32.xlu1 %v1688_v2, %s1617_s17  ;;  %624 = vrot.lane.b32.xlu0 %v1691_v3, %s1617_s17 }
  0x26   : > { %486 = vrot.lane.b32.xlu1 %v1688_v2, %s1619_s19  ;;  %484 = vrot.lane.b32.xlu0 %v1691_v3, %s1619_s19 }
  0x2a   : > { %377 = vrot.lane.b32.xlu1 %v1679_v1, %s1620_s20  ;;  %375 = vrot.lane.b32.xlu0 %v1676_v0, %s1620_s20 }
  0x2e   : > { %657 = vrot.lane.b32.xlu1 %v1679_v1, %s1621_s21  ;;  %655 = vrot.lane.b32.xlu0 %v1676_v0, %s1621_s21 }
  0x32   : > { %237 = vrot.lane.b32.xlu1 %v1679_v1, %s1622_s22  ;;  %235 = vrot.lane.b32.xlu0 %v1676_v0, %s1622_s22 }
  0x36   : > { %517 = vrot.lane.b32.xlu1 %v1679_v1, %s1623_s23  ;;  %515 = vrot.lane.b32.xlu0 %v1676_v0, %s1623_s23 }
  0x3a   : > { %381 = vrot.lane.b32.xlu1 %v1688_v2, %s1620_s20  ;;  %379 = vrot.lane.b32.xlu0 %v1691_v3, %s1620_s20  ;;  %s1895_s20 = scalar_lea.vmem %s1920_s2, %s1391_s13 }
  0x3e   : > { %661 = vrot.lane.b32.xlu1 %v1688_v2, %s1621_s21  ;;  %659 = vrot.lane.b32.xlu0 %v1691_v3, %s1621_s21 }
  0x42   : > { %241 = vrot.lane.b32.xlu1 %v1688_v2, %s1622_s22  ;;  %239 = vrot.lane.b32.xlu0 %v1691_v3, %s1622_s22 }
  0x46   : > { %521 = vrot.lane.b32.xlu1 %v1688_v2, %s1623_s23  ;;  %519 = vrot.lane.b32.xlu0 %v1691_v3, %s1623_s23 }
  0x4a   : > { %412 = vrot.lane.b32.xlu1 %v1679_v1, %s1624_s24  ;;  %410 = vrot.lane.b32.xlu0 %v1676_v0, %s1624_s24 }
  0x4e   : > { %692 = vrot.lane.b32.xlu1 %v1679_v1, %s1625_s25  ;;  %690 = vrot.lane.b32.xlu0 %v1676_v0, %s1625_s25 }
  0x52   : > { %272 = vrot.lane.b32.xlu1 %v1679_v1, %s1626_s26  ;;  %270 = vrot.lane.b32.xlu0 %v1676_v0, %s1626_s26 }
  0x56   : > { %552 = vrot.lane.b32.xlu1 %v1679_v1, %s1627_s27  ;;  %550 = vrot.lane.b32.xlu0 %v1676_v0, %s1627_s27 }
  0x5a   : > { %416 = vrot.lane.b32.xlu1 %v1688_v2, %s1624_s24  ;;  %414 = vrot.lane.b32.xlu0 %v1691_v3, %s1624_s24 }
  0x5e   : > { %696 = vrot.lane.b32.xlu1 %v1688_v2, %s1625_s25  ;;  %694 = vrot.lane.b32.xlu0 %v1691_v3, %s1625_s25 }
  0x62   : > { %276 = vrot.lane.b32.xlu1 %v1688_v2, %s1626_s26  ;;  %274 = vrot.lane.b32.xlu0 %v1691_v3, %s1626_s26 }
  0x66   : > { %556 = vrot.lane.b32.xlu1 %v1688_v2, %s1627_s27  ;;  %554 = vrot.lane.b32.xlu0 %v1691_v3, %s1627_s27 }
  0x6a   : > { %447 = vrot.lane.b32.xlu1 %v1679_v1, %s1628_s28  ;;  %445 = vrot.lane.b32.xlu0 %v1676_v0, %s1628_s28 }
  0x6e   : > { %727 = vrot.lane.b32.xlu1 %v1679_v1, %s1629_s29  ;;  %725 = vrot.lane.b32.xlu0 %v1676_v0, %s1629_s29 }
  0x72   : > { %307 = vrot.lane.b32.xlu1 %v1679_v1, %s1630_s30  ;;  %305 = vrot.lane.b32.xlu0 %v1676_v0, %s1630_s30 }
  0x76   : > { %587 = vrot.lane.b32.xlu1 %v1679_v1, %s1631_s3  ;;  %585 = vrot.lane.b32.xlu0 %v1676_v0, %s1631_s3 }
  0x7a   : > { %451 = vrot.lane.b32.xlu1 %v1688_v2, %s1628_s28  ;;  %449 = vrot.lane.b32.xlu0 %v1691_v3, %s1628_s28 }
  0x7e   : > { %731 = vrot.lane.b32.xlu1 %v1688_v2, %s1629_s29  ;;  %729 = vrot.lane.b32.xlu0 %v1691_v3, %s1629_s29 }
  0x82   : > { %311 = vrot.lane.b32.xlu1 %v1688_v2, %s1630_s30  ;;  %309 = vrot.lane.b32.xlu0 %v1691_v3, %s1630_s30 }
  0x84   : > { %v621_v6 = vpop.permute.xlu1 %620  ;;  %v341_v7 = vpop.permute.xlu0 %340 }
  0x86   : > { %591 = vrot.lane.b32.xlu1 %v1688_v2, %s1631_s3  ;;  %589 = vrot.lane.b32.xlu0 %v1691_v3, %s1631_s3 }
  0x88   : > { %v623_v9 = vpop.permute.xlu1 %622  ;;  %v343_v10 = vpop.permute.xlu0 %342 }
  0x89   : > { %v349_v11 = vsel %vm348_vm0, %v341_v7, %v343_v10  ;;  %v629_v12 = vsel %vm628_vm1, %v621_v6, %v623_v9 }
  0x8a   : > { %1424 = vmatprep.subr.bf16.mxu0 %v349_v11  ;;  %1464 = vmatprep.subr.bf16.mxu1 %v629_v12 }
  0x8b   : > { %1425 = vmatpush3.bf16.msra.mxu0 %v1551_v8 }
  0x8c   : > { %v483_v13 = vpop.permute.xlu1 %482  ;;  %v481_v14 = vpop.permute.xlu0 %480 }
  0x8d   : > { %v489_v15 = vsel %vm488_vm2, %v481_v14, %v483_v13 }
  0x8e   : > { %1465 = vmatpush3.bf16.msra.mxu1 %v489_v15 }
  0x90   : > { %v347_v17 = vpop.permute.xlu1 %346  ;;  %v345_v18 = vpop.permute.xlu0 %344 }
  0x91   : > { %v350_v19 = vsel %vm348_vm0, %v345_v18, %v347_v17 }
  0x92   : > { %1426 = vmatprep.subr.bf16.mxu0 %v350_v19 }
  0x93   : > { %1427 = vmatpush3.bf16.msra.mxu0 %v1552_v16 }
  0x94   : > { %v627_v20 = vpop.permute.xlu1 %626  ;;  %v625_v21 = vpop.permute.xlu0 %624 }
  0x95   : > { %v630_v22 = vsel %vm628_vm1, %v625_v21, %v627_v20 }
  0x96   : > { %1466 = vmatprep.subr.bf16.mxu1 %v630_v22 }
  0x98   : > { %v487_v23 = vpop.permute.xlu1 %486  ;;  %v485_v24 = vpop.permute.xlu0 %484 }
  0x99   : > { %v490_v25 = vsel %vm488_vm2, %v485_v24, %v487_v23 }
  0x9a   : > { %1467 = vmatpush3.bf16.msra.mxu1 %v490_v25 }
  0x9c   : > { %v378_v26 = vpop.permute.xlu1 %377  ;;  %v376_v27 = vpop.permute.xlu0 %375 }
  0x9d   : > { %v384_v28 = vsel %vm383_vm3, %v376_v27, %v378_v26 }
  0x9e   : > { %1428 = vmatprep.subr.bf16.mxu0 %v384_v28 }
  0xa0   : > { %v658_v29 = vpop.permute.xlu1 %657  ;;  %v656_v30 = vpop.permute.xlu0 %655 }
  0xa1   : > { %v664_v31 = vsel %vm663_vm4, %v656_v30, %v658_v29 }
  0xa2   : > { %1468 = vmatprep.subr.bf16.mxu1 %v664_v31  ;;  %v1553_v31 = vld [vmem:[%s1919_s1] ss:$16 sps:$4 sm:$0xff]  }
  0xa4   : > { %v238_v32 = vpop.permute.xlu1 %237  ;;  %v236_v33 = vpop.permute.xlu0 %235 }
  0xa5   : > { %v244_v34 = vsel %vm243_vm5, %v236_v33, %v238_v32  ;;  %v1559_v32 = vld [vmem:[%s1919_s1 + $0x24] ss:$16 sps:$4 sm:$0xff]  }
  0xa6   : > { %1429 = vmatpush3.bf16.msra.mxu0 %v244_v34 }
  0xa8   : > { %v518_v35 = vpop.permute.xlu1 %517  ;;  %v516_v36 = vpop.permute.xlu0 %515 }
  0xa9   : > { %v524_v37 = vsel %vm523_vm6, %v516_v36, %v518_v35  ;;  %v1556_v36 = vld [vmem:[%s1919_s1 + $0x8] ss:$16 sps:$4 sm:$0xff]  }
  0xaa   : > { %1469 = vmatpush3.bf16.msra.mxu1 %v524_v37  ;;  %v1562_v37 = vld [vmem:[%s1919_s1 + $0x2c] ss:$16 sps:$4 sm:$0xff]  }
  0xac   : > { %v382_v38 = vpop.permute.xlu1 %381  ;;  %v380_v39 = vpop.permute.xlu0 %379 }
  0xad   : > { %v385_v40 = vsel %vm383_vm3, %v380_v39, %v382_v38  ;;  %v1561_v38 = vld [vmem:[%s1919_s1 + $0x20] ss:$16 sps:$4 sm:$0xff]   ;;  %v1565_v39 = vld [vmem:[%s1919_s1 + $0x44] ss:$16 sps:$4 sm:$0xff]  }
  0xae   : > { %1430 = vmatprep.subr.bf16.mxu0 %v385_v40  ;;  %v1564_v40 = vld [vmem:[%s1919_s1 + $0x28] ss:$16 sps:$4 sm:$0xff]  }
  0xb0   : > { %v662_v41 = vpop.permute.xlu1 %661  ;;  %v660_v42 = vpop.permute.xlu0 %659 }
  0xb1   : > { %v665_v43 = vsel %vm663_vm4, %v660_v42, %v662_v41  ;;  %v1568_v41 = vld [vmem:[%s1919_s1 + $0x4c] ss:$16 sps:$4 sm:$0xff]   ;;  %v1567_v42 = vld [vmem:[%s1919_s1 + $0x40] ss:$16 sps:$4 sm:$0xff]  }
  0xb2   : > { %1470 = vmatprep.subr.bf16.mxu1 %v665_v43  ;;  %v1571_v43 = vld [vmem:[%s1919_s1 + $0x64] ss:$16 sps:$4 sm:$0xff]  }
  0xb4   : > { %v242_v44 = vpop.permute.xlu1 %241  ;;  %v240_v45 = vpop.permute.xlu0 %239 }
  0xb5   : > { %v245_v46 = vsel %vm243_vm5, %v240_v45, %v242_v44  ;;  %v1570_v44 = vld [vmem:[%s1919_s1 + $0x48] ss:$16 sps:$4 sm:$0xff]   ;;  %v1574_v45 = vld [vmem:[%s1919_s1 + $0x6c] ss:$16 sps:$4 sm:$0xff]  }
  0xb6   : > { %1431 = vmatpush3.bf16.msra.mxu0 %v245_v46  ;;  %v1573_v46 = vld [vmem:[%s1919_s1 + $0x60] ss:$16 sps:$4 sm:$0xff]  }
  0xb8   : > { %v522_v47 = vpop.permute.xlu1 %521  ;;  %v520_v48 = vpop.permute.xlu0 %519 }
  0xb9   : > { %v525_v49 = vsel %vm523_vm6, %v520_v48, %v522_v47  ;;  %v1576_v47 = vld [vmem:[%s1919_s1 + $0x68] ss:$16 sps:$4 sm:$0xff]   ;;  %v998_v48 = vlaneseq }
  0xba   : > { %1471 = vmatpush3.bf16.msra.mxu1 %v525_v49 }
  0xbb   : > { %v999_v49 = vand.u32 127, %v998_v48 }
  0xbc   : > { %v413_v50 = vpop.permute.xlu1 %412  ;;  %v411_v51 = vpop.permute.xlu0 %410 }
  0xbd   : > { %v419_v52 = vsel %vm418_vm7, %v411_v51, %v413_v50  ;;  %v1827_v50 = vmul.u32.u64.low 2863311531, %v999_v49  ;;  %v1828_v51 = vmul.u32.u64.high 2863311531, %v999_v49, %v1827_v50  ;;  %vm1017_vm3 = vcmp.lt.s32.totalorder %v999_v49, 18 }
  0xbe   : > { %1432 = vmatprep.subr.bf16.mxu0 %v419_v52 }
  0xbf   : > { %v1006_v52 = vshrl.u32 %v1828_v51, 2 }
  0xc0   : > { %v693_v53 = vpop.permute.xlu1 %692  ;;  %v691_v54 = vpop.permute.xlu0 %690 }
  0xc1   : > { %v699_v55 = vsel %vm698_vm8, %v691_v54, %v693_v53  ;;  %v1007_v53 = vmul.u32 6, %v1006_v52 }
  0xc2   : > { %1472 = vmatprep.subr.bf16.mxu1 %v699_v55 }
  0xc3   : > { %v1008_v54 = vsub.s32 %v999_v49, %v1007_v53 }
  0xc4   : > { %v273_v56 = vpop.permute.xlu1 %272  ;;  %v271_v57 = vpop.permute.xlu0 %270 }
  0xc5   : > { %v279_v58 = vsel %vm278_vm9, %v271_v57, %v273_v56  ;;  %vm1011_vm15 = vcmp.ne.s32.totalorder %v1008_v54, 0  ;;  %vm1012_vm0 = vcmp.lt.s32.totalorder %v1008_v54, 0  ;;  %v1014_v55 = vadd.s32 6, %v1008_v54 }
  0xc6   : > { %1433 = vmatpush3.bf16.msra.mxu0 %v279_v58  ;;  %vm1013_vm1 = vmand %vm1012_vm0, %vm1011_vm15 }
  0xc7   : > { %v1015_v58 = vsel %vm1013_vm1, %v1014_v55, %v1008_v54 }
  0xc8   : > { %v553_v59 = vpop.permute.xlu1 %552  ;;  %v551_v60 = vpop.permute.xlu0 %550  ;;  %vm1016_vm2 = vcmp.lt.s32.totalorder %v1015_v58, 3 }
  0xc9   : > { %v559_v61 = vsel %vm558_vm10, %v551_v60, %v553_v59  ;;  %vm1831_vm4 = vmand %vm1016_vm2, %vm1017_vm3 }
  0xca   : > { %1473 = vmatpush3.bf16.msra.mxu1 %v559_v61 }
  0xcc   : > { %v417_v62 = vpop.permute.xlu1 %416  ;;  %v415_v63 = vpop.permute.xlu0 %414 }
  0xcd   : > { %v420_v0 = vsel %vm418_vm7, %v415_v63, %v417_v62 }
  0xce   : > { %1434 = vmatprep.subr.bf16.mxu0 %v420_v0 }
  0xd0   : > { %v697_v1 = vpop.permute.xlu1 %696  ;;  %v695_v2 = vpop.permute.xlu0 %694 }
  0xd1   : > { %v700_v3 = vsel %vm698_vm8, %v695_v2, %v697_v1 }
  0xd2   : > { %1474 = vmatprep.subr.bf16.mxu1 %v700_v3 }
  0xd4   : > { %v277_v4 = vpop.permute.xlu1 %276  ;;  %v275_v5 = vpop.permute.xlu0 %274 }
  0xd5   : > { %v280_v6 = vsel %vm278_vm9, %v275_v5, %v277_v4 }
  0xd6   : > { %1435 = vmatpush3.bf16.msra.mxu0 %v280_v6 }
  0xd8   : > { %v557_v7 = vpop.permute.xlu1 %556  ;;  %v555_v8 = vpop.permute.xlu0 %554 }
  0xd9   : > { %v560_v9 = vsel %vm558_vm10, %v555_v8, %v557_v7 }
  0xda   : > { %1475 = vmatpush3.bf16.msra.mxu1 %v560_v9 }
  0xdc   : > { %v448_v10 = vpop.permute.xlu1 %447  ;;  %v446_v11 = vpop.permute.xlu0 %445 }
  0xdd   : > { %v454_v12 = vsel %vm453_vm11, %v446_v11, %v448_v10 }
  0xde   : > { %1436 = vmatprep.subr.bf16.mxu0 %v454_v12 }
  0xe0   : > { %v728_v13 = vpop.permute.xlu1 %727  ;;  %v726_v14 = vpop.permute.xlu0 %725 }
  0xe1   : > { %v734_v15 = vsel %vm733_vm12, %v726_v14, %v728_v13 }
  0xe2   : > { %1476 = vmatprep.subr.bf16.mxu1 %v734_v15 }
  0xe4   : > { %v308_v16 = vpop.permute.xlu1 %307  ;;  %v306_v17 = vpop.permute.xlu0 %305 }
  0xe5   : > { %v314_v18 = vsel %vm313_vm13, %v306_v17, %v308_v16 }
  0xe6   : > { %1437 = vmatpush3.bf16.msra.mxu0 %v314_v18 }
  0xe8   : > { %v588_v19 = vpop.permute.xlu1 %587  ;;  %v586_v20 = vpop.permute.xlu0 %585 }
  0xe9   : > { %v594_v21 = vsel %vm593_vm14, %v586_v20, %v588_v19 }
  0xea   : > { %1477 = vmatpush3.bf16.msra.mxu1 %v594_v21 }
  0xec   : > { %v452_v22 = vpop.permute.xlu1 %451  ;;  %v450_v23 = vpop.permute.xlu0 %449 }
  0xed   : > { %v455_v24 = vsel %vm453_vm11, %v450_v23, %v452_v22 }
  0xee   : > { %1438 = vmatprep.subr.bf16.mxu0 %v455_v24 }
  0xf0   : > { %v732_v25 = vpop.permute.xlu1 %731  ;;  %v730_v26 = vpop.permute.xlu0 %729 }
  0xf1   : > { %v735_v27 = vsel %vm733_vm12, %v730_v26, %v732_v25 }
  0xf2   : > { %1478 = vmatprep.subr.bf16.mxu1 %v735_v27 }
  0xf4   : > { %v312_v28 = vpop.permute.xlu1 %311  ;;  %v310_v29 = vpop.permute.xlu0 %309 }
  0xf5   : > { %v315_v30 = vsel %vm313_vm13, %v310_v29, %v312_v28 }
  0xf6   : > { %1439 = vmatpush3.bf16.msra.mxu0 %v315_v30 }
  0xf8   : > { %v592_v33 = vpop.permute.xlu1 %591  ;;  %v590_v34 = vpop.permute.xlu0 %589 }
  0xf9   : > { %901 = vmatmul.mubr.bf16.vlgmr.msra.gmra.mrb[0].mxu0 %v1553_v31  ;;  %v595_v35 = vsel %vm593_vm14, %v590_v34, %v592_v33 }
  0xfa   : > { %1479 = vmatpush3.bf16.msra.mxu1 %v595_v35  ;;  %908 = vmatprep.mubr.bf16.mxu0 %v1559_v32 }
  0xfd   : > { %966 = vmatmul.mubr.bf16.vlgmr.msra.gmra.mrb[0].mxu1 %v1556_v36 }
  0xfe   : > { %973 = vmatprep.mubr.bf16.mxu1 %v1562_v37 }
 0x101   : > { %909 = vmatmul.mubr.bf16.gmra.mrb[4].mxu0 %v1561_v38 }
 0x102   : > { %916 = vmatprep.mubr.bf16.mxu0 %v1565_v39 }
 0x105   : > { %974 = vmatmul.mubr.bf16.gmra.mrb[4].mxu1 %v1564_v40 }
 0x106   : > { %981 = vmatprep.mubr.bf16.mxu1 %v1568_v41 }
 0x109   : > { %917 = vmatmul.mubr.bf16.gmra.mrb[8].mxu0 %v1567_v42 }
 0x10a   : > { %924 = vmatprep.mubr.bf16.mxu0 %v1571_v43 }
 0x10d   : > { %982 = vmatmul.mubr.bf16.gmra.mrb[8].mxu1 %v1570_v44 }
 0x10e   : > { %989 = vmatprep.mubr.bf16.mxu1 %v1574_v45 }
 0x111   : > { %925 = vmatmul.mubr.bf16.gmra.mrb[12].mxu0 %v1573_v46 }
 0x115   : > { %990 = vmatmul.mubr.bf16.gmra.mrb[12].mxu1 %v1576_v47 }
 0x1cc   : > { %v1440_v56 = vpop.f32.mrb[0].mxu0 }
 0x1cd   : > { %v1441_v57 = vpop.f32.mrb[1].mxu0 }
 0x1ce   : > { %v1442_v59 = vadd.f32 %v1441_v57, %v1440_v56  ;;  %v1443_v60 = vpop.f32.mrb[2].mxu0 }
 0x1cf   : > { %v1444_v61 = vpop.f32.mrb[3].mxu0 }
 0x1d0   : > { %v1445_v62 = vadd.f32 %v1444_v61, %v1443_v60  ;;  %v1480_v63 = vpop.f32.mrb[0].mxu1 }
 0x1d1   : > { %v1481_v0 = vpop.f32.mrb[1].mxu1 }
 0x1d2   : > { %v1482_v1 = vadd.f32 %v1481_v0, %v1480_v63  ;;  %v1483_v2 = vpop.f32.mrb[2].mxu1 }
 0x1d3   : > { %v1484_v3 = vpop.f32.mrb[3].mxu1 }
 0x1d4   : > { %v1485_v5 = vadd.f32 %v1484_v3, %v1483_v2  ;;  %v1446_v6 = vpop.f32.mrb[4].mxu0  ;;  %v1835_v7 = vadd.f32 %v1482_v1, %v1442_v59 }
 0x1d5   : > { %v1447_v8 = vpop.f32.mrb[5].mxu0 }
 0x1d6   : > { %v1448_v9 = vadd.f32 %v1447_v8, %v1446_v6  ;;  %v1449_v10 = vpop.f32.mrb[6].mxu0  ;;  %v1021_v11 = vsel %vm1831_vm4, %v1835_v7, 0.0  ;;  %v1840_v12 = vadd.f32 %v1485_v5, %v1445_v62 }
 0x1d7   : > { %1029 = vadd.xlane.f32.xlu0 %v1021_v11  ;;  %v1450_v13 = vpop.f32.mrb[7].mxu0  ;;  %v1045_v22 = vmul.f32 %v1021_v11, %v1021_v11 }
 0x1d8   : > { %v1451_v14 = vadd.f32 %v1450_v13, %v1449_v10  ;;  %v1486_v15 = vpop.f32.mrb[4].mxu1  ;;  %v1022_v16 = vsel %vm1831_vm4, %v1840_v12, 0.0 }
 0x1d9   : > { %v1487_v17 = vpop.f32.mrb[5].mxu1  ;;  %1031 = vadd.xlane.f32.xlu1 %v1022_v16  ;;  %v1046_v18 = vmul.f32 %v1022_v16, %v1022_v16 }
 0x1da   : > { %v1488_v19 = vadd.f32 %v1487_v17, %v1486_v15  ;;  %v1489_v20 = vpop.f32.mrb[6].mxu1 }
 0x1db   : > { %v1490_v21 = vpop.f32.mrb[7].mxu1  ;;  %1055 = vadd.xlane.f32.xlu0 %v1046_v18 }
 0x1dc   : > { %v1491_v23 = vadd.f32 %v1490_v21, %v1489_v20  ;;  %v1452_v24 = vpop.f32.mrb[8].mxu0  ;;  %v1845_v25 = vadd.f32 %v1488_v19, %v1448_v9 }
 0x1dd   : > { %1053 = vadd.xlane.f32.xlu1 %v1045_v22  ;;  %v1453_v26 = vpop.f32.mrb[9].mxu0 }
 0x1de   : > { %v1023_v27 = vsel %vm1831_vm4, %v1845_v25, 0.0  ;;  %v1454_v28 = vadd.f32 %v1453_v26, %v1452_v24  ;;  %v1455_v29 = vpop.f32.mrb[10].mxu0  ;;  %v1850_v30 = vadd.f32 %v1491_v23, %v1451_v14 }
 0x1df   : > { %1033 = vadd.xlane.f32.xlu0 %v1023_v27  ;;  %v1047_v31 = vmul.f32 %v1023_v27, %v1023_v27  ;;  %v1456_v32 = vpop.f32.mrb[11].mxu0 }
 0x1e0   : > { %v1492_v33 = vpop.f32.mrb[8].mxu1  ;;  %v1457_v34 = vadd.f32 %v1456_v32, %v1455_v29  ;;  %v1024_v38 = vsel %vm1831_vm4, %v1850_v30, 0.0 }
 0x1e1   : > { %v1493_v35 = vpop.f32.mrb[9].mxu1  ;;  %1057 = vadd.xlane.f32.xlu1 %v1047_v31  ;;  %v1048_v43 = vmul.f32 %v1024_v38, %v1024_v38 }
 0x1e2   : > { %v1494_v36 = vadd.f32 %v1493_v35, %v1492_v33  ;;  %v1495_v37 = vpop.f32.mrb[10].mxu1 }
 0x1e3   : > { %v1496_v39 = vpop.f32.mrb[11].mxu1  ;;  %1035 = vadd.xlane.f32.xlu0 %v1024_v38 }
 0x1e4   : > { %v1497_v40 = vadd.f32 %v1496_v39, %v1495_v37  ;;  %v1458_v41 = vpop.f32.mrb[12].mxu0  ;;  %v1855_v42 = vadd.f32 %v1494_v36, %v1454_v28 }
 0x1e5   : > { %v1459_v44 = vpop.f32.mrb[13].mxu0 }
 0x1e6   : > { %v1025_v45 = vsel %vm1831_vm4, %v1855_v42, 0.0  ;;  %v1460_v46 = vadd.f32 %v1459_v44, %v1458_v41  ;;  %v1461_v47 = vpop.f32.mrb[14].mxu0  ;;  %v1860_v48 = vadd.f32 %v1497_v40, %v1457_v34 }
 0x1e7   : > { %1059 = vadd.xlane.f32.xlu0 %v1048_v43  ;;  %1037 = vadd.xlane.f32.xlu1 %v1025_v45  ;;  %v1462_v49 = vpop.f32.mrb[15].mxu0  ;;  %v1049_v50 = vmul.f32 %v1025_v45, %v1025_v45 }
 0x1e8   : > { %v1498_v51 = vpop.f32.mrb[12].mxu1  ;;  %v1463_v52 = vadd.f32 %v1462_v49, %v1461_v47  ;;  %v1026_v56 = vsel %vm1831_vm4, %v1860_v48, 0.0 }
 0x1e9   : > { %v1499_v53 = vpop.f32.mrb[13].mxu1  ;;  %v1050_v60 = vmul.f32 %v1026_v56, %v1026_v56 }
 0x1ea   : > { %v1500_v54 = vadd.f32 %v1499_v53, %v1498_v51  ;;  %v1501_v55 = vpop.f32.mrb[14].mxu1 }
 0x1eb   : > { %v1502_v57 = vpop.f32.mrb[15].mxu1  ;;  %1039 = vadd.xlane.f32.xlu0 %v1026_v56  ;;  %1061 = vadd.xlane.f32.xlu1 %v1049_v50 }
 0x1ec   : > { %v1503_v58 = vadd.f32 %v1502_v57, %v1501_v55  ;;  %v1865_v59 = vadd.f32 %v1500_v54, %v1460_v46 }
 0x1ee   : > { %v1027_v61 = vsel %vm1831_vm4, %v1865_v59, 0.0  ;;  %v1870_v62 = vadd.f32 %v1503_v58, %v1463_v52 }
 0x1ef   : > { %1063 = vadd.xlane.f32.xlu0 %v1050_v60  ;;  %1041 = vadd.xlane.f32.xlu1 %v1027_v61  ;;  %v1051_v63 = vmul.f32 %v1027_v61, %v1027_v61 }
 0x1f0   : > { %v1028_v0 = vsel %vm1831_vm4, %v1870_v62, 0.0 }
 0x1f1   : > { %v1052_v1 = vmul.f32 %v1028_v0, %v1028_v0 }
 0x1f3   : > { %1043 = vadd.xlane.f32.xlu0 %v1028_v0  ;;  %1065 = vadd.xlane.f32.xlu1 %v1051_v63 }
 0x1f7   : > { %1067 = vadd.xlane.f32.xlu0 %v1052_v1 }
 0x264   : > { %v1030_v2 = vpop.xlane.xlu0 %1029 }
 0x265   : > { %v1069_v5 = vmul.f32 0.11111111, %v1030_v2 }
 0x266   : > { %v1032_v3 = vpop.xlane.xlu1 %1031 }
 0x267   : > { %v1070_v6 = vmul.f32 0.11111111, %v1032_v3  ;;  %v1085_v13 = vmul.f32 %v1069_v5, %v1069_v5  ;;  %v1109_v50 = vsub.f32 %v1835_v7, %v1069_v5 }
 0x268   : > { %v1056_v8 = vpop.xlane.xlu0 %1055 }
 0x269   : > { %v1086_v9 = vmul.f32 %v1070_v6, %v1070_v6  ;;  %v1078_v10 = vmul.f32 0.11111111, %v1056_v8  ;;  %v1110_v45 = vsub.f32 %v1840_v12, %v1070_v6 }
 0x26a   : > { %v1054_v11 = vpop.xlane.xlu1 %1053 }
 0x26b   : > { %v1094_v14 = vsub.f32 %v1078_v10, %v1086_v9  ;;  %v1077_v15 = vmul.f32 0.11111111, %v1054_v11 }
 0x26c   : > { %v1034_v16 = vpop.xlane.xlu0 %1033 }
 0x26d   : > { %v1102_v17 = vmax.f32 %v1094_v14, 0.0  ;;  %v1093_v18 = vsub.f32 %v1077_v15, %v1085_v13  ;;  %v1071_v4 = vmul.f32 0.11111111, %v1034_v16 }
 0x26e   : > { %v1058_v19 = vpop.xlane.xlu1 %1057 }
 0x26f   : > { %v1118_v20 = vadd.f32 1e-05, %v1102_v17  ;;  %v1101_v21 = vmax.f32 %v1093_v18, 0.0  ;;  %v1087_v22 = vmul.f32 %v1071_v4, %v1071_v4  ;;  %v1079_v23 = vmul.f32 0.11111111, %v1058_v19 }
 0x270   : > { %v1036_v24 = vpop.xlane.xlu0 %1035  ;;  %v1111_v11 = vsub.f32 %v1845_v25, %v1071_v4 }
 0x271   : > { %1577 = vrsqrt.f32 %v1118_v20  ;;  %v1117_v26 = vadd.f32 1e-05, %v1101_v21  ;;  %v1875_v27 = vmul.f32 0.11111111, %v1036_v24  ;;  %v1095_v28 = vsub.f32 %v1079_v23, %v1087_v22 }
 0x273   : > { %1579 = vrsqrt.f32 %v1117_v26  ;;  %v1103_v29 = vmax.f32 %v1095_v28, 0.0  ;;  %v1088_v33 = vmul.f32 %v1875_v27, %v1875_v27  ;;  %v1112_v20 = vsub.f32 %v1850_v30, %v1875_v27 }
 0x274   : > { %v1060_v31 = vpop.xlane.xlu0 %1059  ;;  %v1038_v32 = vpop.xlane.xlu1 %1037 }
 0x275   : > { %v1080_v34 = vmul.f32 0.11111111, %v1060_v31  ;;  %v1879_v35 = vmul.f32 0.11111111, %v1038_v32  ;;  %v1119_v36 = vadd.f32 1e-05, %v1103_v29 }
 0x277   : > { %v1096_v37 = vsub.f32 %v1080_v34, %v1088_v33  ;;  %v1089_v38 = vmul.f32 %v1879_v35, %v1879_v35  ;;  %1581 = vrsqrt.f32 %v1119_v36  ;;  %v1113_v29 = vsub.f32 %v1855_v42, %v1879_v35 }
 0x278   : > { %v1040_v39 = vpop.xlane.xlu0 %1039  ;;  %v1062_v40 = vpop.xlane.xlu1 %1061 }
 0x279   : > { %v1104_v41 = vmax.f32 %v1096_v37, 0.0  ;;  %v1883_v43 = vmul.f32 0.11111111, %v1040_v39  ;;  %v1081_v44 = vmul.f32 0.11111111, %v1062_v40 }
 0x27b   : > { %v1578_v46 = vpop.eup %1577  ;;  %v1120_v47 = vadd.f32 1e-05, %v1104_v41  ;;  %v1097_v49 = vsub.f32 %v1081_v44, %v1089_v38  ;;  %v1090_v52 = vmul.f32 %v1883_v43, %v1883_v43  ;;  %v1114_v27 = vsub.f32 %v1860_v48, %v1883_v43 }
 0x27c   : > { %v1134_v51 = vmul.f32 %v1578_v46, %v1110_v45  ;;  %v1064_v53 = vpop.xlane.xlu0 %1063  ;;  %v1042_v54 = vpop.xlane.xlu1 %1041 }
 0x27d   : > { %v1580_v55 = vpop.eup %1579  ;;  %1583 = vrsqrt.f32 %v1120_v47  ;;  %v1105_v56 = vmax.f32 %v1097_v49, 0.0  ;;  %v1082_v57 = vmul.f32 0.11111111, %v1064_v53  ;;  %v1075_v58 = vmul.f32 0.11111111, %v1042_v54 }
 0x27e   : > { %v1142_v60 = vmul.f32 0.2, %v1134_v51  ;;  %v1133_v61 = vmul.f32 %v1580_v55, %v1109_v50 }
 0x27f   : > { %v1121_v12 = vadd.f32 1e-05, %v1105_v56  ;;  %v1098_v63 = vsub.f32 %v1082_v57, %v1090_v52  ;;  %v1091_v1 = vmul.f32 %v1075_v58, %v1075_v58  ;;  %v1115_v42 = vsub.f32 %v1865_v59, %v1075_v58 }
 0x280   : > { %v1141_v0 = vmul.f32 0.2, %v1133_v61  ;;  %v1044_v2 = vpop.xlane.xlu0 %1043  ;;  %v1066_v7 = vpop.xlane.xlu1 %1065  ;;  %v1150_v9 = vmax.f32 %v1134_v51, %v1142_v60 }
 0x281   : > { %1585 = vrsqrt.f32 %v1121_v12  ;;  %v1106_v3 = vmax.f32 %v1098_v63, 0.0  ;;  %v1076_v5 = vmul.f32 0.11111111, %v1044_v2  ;;  %v1083_v6 = vmul.f32 0.11111111, %v1066_v7  ;;  %v1582_v8 = vpop.eup %1581 }
 0x282   : > { %v1149_v10 = vmax.f32 %v1133_v61, %v1141_v0  ;;  %v1135_v15 = vmul.f32 %v1582_v8, %v1111_v11 }
 0x283   : > { %v1122_v13 = vadd.f32 1e-05, %v1106_v3  ;;  %v1099_v16 = vsub.f32 %v1083_v6, %v1091_v1  ;;  %v1092_v18 = vmul.f32 %v1076_v5, %v1076_v5  ;;  %v1116_v47 = vsub.f32 %v1870_v62, %v1076_v5 }
 0x284   : > { %v1404_v14 = vpack.c.bf16 %v1150_v9, %v1149_v10  ;;  %v1068_v17 = vpop.xlane.xlu0 %1067  ;;  %v1143_v22 = vmul.f32 0.2, %v1135_v15 }
 0x285   : > { %1587 = vrsqrt.f32 %v1122_v13  ;;  %v1084_v19 = vmul.f32 0.11111111, %v1068_v17  ;;  %v1107_v25 = vmax.f32 %v1099_v16, 0.0 }
 0x286   : > { %1405 = vst [vmem:[%s1895_s20] sm:$0xff] %v1404_v14   ;;  %v1151_v33 = vmax.f32 %v1135_v15, %v1143_v22 }
 0x287   : > { %v1584_v4 = vpop.eup %1583  ;;  %v1100_v21 = vsub.f32 %v1084_v19, %v1092_v18  ;;  %v1123_v24 = vadd.f32 1e-05, %v1107_v25 }
 0x288   : > { %v1136_v23 = vmul.f32 %v1584_v4, %v1112_v20 }
 0x289   : > { %v1108_v26 = vmax.f32 %v1100_v21, 0.0  ;;  %1589 = vrsqrt.f32 %v1123_v24 }
 0x28a   : > { %v1144_v28 = vmul.f32 0.2, %v1136_v23 }
 0x28b   : > { %v1586_v31 = vpop.eup %1585  ;;  %v1124_v32 = vadd.f32 1e-05, %v1108_v26 }
 0x28c   : > { %v1152_v34 = vmax.f32 %v1136_v23, %v1144_v28  ;;  %v1137_v36 = vmul.f32 %v1586_v31, %v1113_v29 }
 0x28d   : > { %1591 = vrsqrt.f32 %v1124_v32 }
 0x28e   : > { %v1409_v30 = vpack.c.bf16 %v1152_v34, %v1151_v33  ;;  %v1145_v38 = vmul.f32 0.2, %v1137_v36 }
 0x28f   : > { %v1588_v37 = vpop.eup %1587 }
 0x290   : > { %1421 = vst [vmem:[%s1895_s20 + $0x8] sm:$0xff] %v1409_v30   ;;  %v1138_v39 = vmul.f32 %v1588_v37, %v1114_v27  ;;  %v1153_v41 = vmax.f32 %v1137_v36, %v1145_v38 }
 0x292   : > { %v1146_v40 = vmul.f32 0.2, %v1138_v39 }
 0x293   : > { %v1590_v35 = vpop.eup %1589 }
 0x294   : > { %v1154_v44 = vmax.f32 %v1138_v39, %v1146_v40  ;;  %v1139_v45 = vmul.f32 %v1590_v35, %v1115_v42 }
 0x296   : > { %v1414_v46 = vpack.c.bf16 %v1154_v44, %v1153_v41  ;;  %v1147_v50 = vmul.f32 0.2, %v1139_v45 }
 0x297   : > { %v1592_v49 = vpop.eup %1591 }
 0x298   : > { %1422 = vst [vmem:[%s1895_s20 + $0x10] sm:$0xff] %v1414_v46   ;;  %v1140_v51 = vmul.f32 %v1592_v49, %v1116_v47  ;;  %v1155_v43 = vmax.f32 %v1139_v45, %v1147_v50 }
 0x29a   : > { %v1148_v48 = vmul.f32 0.2, %v1140_v51 }
 0x29c   : > { %v1156_v52 = vmax.f32 %v1140_v51, %v1148_v48 }
 0x29e   : > { %v1419_v53 = vpack.c.bf16 %v1156_v52, %v1155_v43 }
 0x2a0   : > { %1423 = vst [vmem:[%s1895_s20 + $0x18] sm:$0xff] %v1419_v53  }
 0x2a1 PF: > { %s12_s11 = sadd.s32 1, %s1615_s11   ;;  %s1923_s9 = smov %s1611_s10 }
 0x2a2   : > { %p9_p5 = scmp.ge.s32.totalorder %s12_s11, 4   ;;  %s1924_s10 = smov %s1926_s12 }
 0x2a4   :  { %11 = sbr.rel (!%p9_p5) target bundleno = 2 (0x2), region = 65 }

// kernel: _lambda_.9
= control target key start
LH: loop header
LB: loop body
LE: loop exit
PB: predicated region body
PF: predicated region fallthrough
CT: control target
= control target key end

     0   :  { %s2093_s12 = smov 0   ;;  %s2095_s13 = smov 0   ;;  %s2494_s0 = inlined_call_operand.vmem [shape: bf16[2,1,64,256], index: 0, kind: input, shape index: {}]   ;;  %s2495_s1 = inlined_call_operand.vmem [shape: bf16[16,1024], index: 1, kind: input, shape index: {}]   ;;  %s2496_s2 = inlined_call_operand.vmem [shape: f32[16,1], index: 2, kind: input, shape index: {}]   ;;  %s2497_s3 = inlined_call_operand.vmem [shape: f32[2,16,128], index: 3, kind: output, shape index: {}]  }
   0x1   :  { %s2097_s14 = smov 0  }
   0x2 LB: > { %s25_s15 = sadd.s32 1, %s2051_s13  ;;  %p1736_p0 = scmp.ge.s32.totalorder %s2055_s14, 1  ;;  %s2055_s14 = sphi %s2097_s14, %s13_s14   ;;  %s2051_s13 = sphi %s2095_s13, %s2499_s13   ;;  %s2047_s12 = sphi %s2093_s12, %s2498_s12  }
   0x3   : > { %p27_p1 = scmp.ge.s32.totalorder %s25_s15, 2  ;;  %p174_p2 = scmp.lt.s32.totalorder %s2055_s14, 3 }
   0x5   : > { %s2501_s15 = smov (%p27_p1, %s25_s15), 0  ;;  %p175_p3 = pnand %p1736_p0, %p174_p2 }
   0x6   : > { %p213_p4 = scmp.lt.s32.totalorder (!%p175_p3), %s2047_s12, 1  ;;  %s2057_s20 = smov (!%p175_p3), 121   ;;  %v2210_v8 = vld [vmem:[%s2495_s1] sm:$0xff] (!%p175_p3)  ;;  %v2232_v12 = vld [vmem:[%s2495_s1 + $0x8] sm:$0xff] (!%p175_p3)  ;;  %vm407_vm0 = vcmask (!%p175_p3), 1031168   ;;  %vm683_vm1 = vcmask (!%p175_p3), 990208  }
   0x7   : > { %178 = sbr.rel (%p175_p3) target bundleno = 620 (0x26c), region = 32  ;;  %s2058_s21 = smov (!%p175_p3), 126   ;;  %v2215_v9 = vld [vmem:[%s2495_s1 + $0x20] sm:$0xff] (!%p175_p3)  ;;  %v2237_v13 = vld [vmem:[%s2495_s1 + $0x28] sm:$0xff] (!%p175_p3)  ;;  %vm545_vm2 = vcmask (!%p175_p3), 1006592   ;;  %vm476_vm3 = vcmask (!%p175_p3), 1022976  }
   0x8   : > { %s2059_s22 = smov (!%p175_p3), 123   ;;  %s2060_s23 = smov (!%p175_p3), 125   ;;  %v1866_v10 = vcombine.high (!%p175_p3), %v2210_v8, %v2215_v9  ;;  %v1865_v11 = vcombine.low (!%p175_p3), %v2210_v8, %v2215_v9  ;;  %v1868_v14 = vcombine.high (!%p175_p3), %v2232_v12, %v2237_v13  ;;  %v1867_v15 = vcombine.low (!%p175_p3), %v2232_v12, %v2237_v13  ;;  %v2411_v8 = vld [vmem:[%s2495_s1 + $0x18] sm:$0xff] (!%p175_p3) }
   0x9   : > { %s2061_s24 = smov (!%p175_p3), 127   ;;  %s2062_s25 = smov (!%p175_p3), 120   ;;  %vm338_vm4 = vcmask (!%p175_p3), 1039360   ;;  %vm752_vm5 = vcmask (!%p175_p3), 982016   ;;  %vm614_vm6 = vcmask (!%p175_p3), 998400   ;;  %vm959_vm7 = vcmask (!%p175_p3), 949248  }
   0xa   : > { %s2063_s26 = smov (!%p175_p3), 122   ;;  %1473 = vmatprep.mubr.bf16.mxu0 (!%p175_p3), %v1866_v10  ;;  %s2064_s8 = smov (!%p175_p3), 116   ;;  %1514 = vmatprep.mubr.bf16.mxu1 (!%p175_p3), %v1868_v14  ;;  %vm821_vm8 = vcmask (!%p175_p3), 965632   ;;  %vm1235_vm9 = vcmask (!%p175_p3), 908288   ;;  %vm1097_vm10 = vcmask (!%p175_p3), 924672   ;;  %vm1028_vm11 = vcmask (!%p175_p3), 941056  }
   0xb   : > { %s2065_s9 = smov (!%p175_p3), 118   ;;  %s2066_s10 = smov (!%p175_p3), 111   ;;  %vm890_vm12 = vcmask (!%p175_p3), 957440   ;;  %vm1304_vm13 = vcmask (!%p175_p3), 900096   ;;  %vm1166_vm14 = vcmask (!%p175_p3), 916480  }
   0xc   : > { %s2067_s11 = smov (!%p175_p3), 113   ;;  %s2069_s17 = smov (!%p175_p3), 117  }
   0xd   : > { %s2070_s18 = smov (!%p175_p3), 110  }
   0xe   : > { %s2503_s12 = smov (!%p213_p4, %s2047_s12), 1 }
   0xf   : > { %s1877_s16 = sshll.u32 %s2503_s12, 6  ;;  %s1878_s5 = sshll.u32 %s2503_s12, 4 }
  0x10   : > { %s2117_s19 = scalar_lea.vmem %s2494_s0, %s1877_s16  ;;  %s2068_s16 = smov 115  }
  0x11   : > { %v2120_v0 = vld [vmem:[%s2117_s19] ss:$8 sps:$4 sm:$0xff]   ;;  %v2123_v1 = vld [vmem:[%s2117_s19 + $0x4] ss:$8 sps:$4 sm:$0xff]   ;;  %v2132_v2 = vld [vmem:[%s2117_s19 + $0x14] ss:$8 sps:$4 sm:$0xff]  }
  0x12   : > { %667 = vrot.lane.b32.xlu1 %v2120_v0, %s2057_s20  ;;  %391 = vrot.lane.b32.xlu0 %v2120_v0, %s2058_s21  ;;  %v2135_v3 = vld [vmem:[%s2117_s19 + $0x10] ss:$8 sps:$4 sm:$0xff]   ;;  %v2144_v4 = vld [vmem:[%s2117_s19 + $0x24] ss:$8 sps:$4 sm:$0xff]  }
  0x13   : > { %v2147_v5 = vld [vmem:[%s2117_s19 + $0x20] ss:$8 sps:$4 sm:$0xff]   ;;  %v2156_v6 = vld [vmem:[%s2117_s19 + $0x34] ss:$8 sps:$4 sm:$0xff]   ;;  %v2159_v7 = vld [vmem:[%s2117_s19 + $0x30] ss:$8 sps:$4 sm:$0xff]  }
  0x14   : > { %v2021_v20 = vld [vmem:[%s2117_s19] ss:$8 sps:$4 sm:$0xff]   ;;  %v2022_v28 = vld [vmem:[%s2117_s19 + $0x10] ss:$8 sps:$4 sm:$0xff]  }
  0x15   : > { %v2023_v38 = vld [vmem:[%s2117_s19 + $0x20] ss:$8 sps:$4 sm:$0xff]   ;;  %v2024_v48 = vld [vmem:[%s2117_s19 + $0x30] ss:$8 sps:$4 sm:$0xff]   ;;  %s2071_s19 = smov 112  }
  0x16   : > { %669 = vrot.lane.b32.xlu1 %v2123_v1, %s2057_s20  ;;  %393 = vrot.lane.b32.xlu0 %v2123_v1, %s2058_s21 }
  0x1a   : > { %531 = vrot.lane.b32.xlu1 %v2123_v1, %s2059_s22  ;;  %529 = vrot.lane.b32.xlu0 %v2120_v0, %s2059_s22 }
  0x1e   : > { %397 = vrot.lane.b32.xlu1 %v2132_v2, %s2058_s21  ;;  %395 = vrot.lane.b32.xlu0 %v2135_v3, %s2058_s21 }
  0x22   : > { %673 = vrot.lane.b32.xlu1 %v2132_v2, %s2057_s20  ;;  %671 = vrot.lane.b32.xlu0 %v2135_v3, %s2057_s20 }
  0x26   : > { %535 = vrot.lane.b32.xlu1 %v2132_v2, %s2059_s22  ;;  %533 = vrot.lane.b32.xlu0 %v2135_v3, %s2059_s22 }
  0x2a   : > { %401 = vrot.lane.b32.xlu1 %v2144_v4, %s2058_s21  ;;  %399 = vrot.lane.b32.xlu0 %v2147_v5, %s2058_s21 }
  0x2e   : > { %677 = vrot.lane.b32.xlu1 %v2144_v4, %s2057_s20  ;;  %675 = vrot.lane.b32.xlu0 %v2147_v5, %s2057_s20 }
  0x32   : > { %539 = vrot.lane.b32.xlu1 %v2144_v4, %s2059_s22  ;;  %537 = vrot.lane.b32.xlu0 %v2147_v5, %s2059_s22 }
  0x36   : > { %405 = vrot.lane.b32.xlu1 %v2156_v6, %s2058_s21  ;;  %403 = vrot.lane.b32.xlu0 %v2159_v7, %s2058_s21 }
  0x3a   : > { %681 = vrot.lane.b32.xlu1 %v2156_v6, %s2057_s20  ;;  %679 = vrot.lane.b32.xlu0 %v2159_v7, %s2057_s20 }
  0x3e   : > { %543 = vrot.lane.b32.xlu1 %v2156_v6, %s2059_s22  ;;  %541 = vrot.lane.b32.xlu0 %v2159_v7, %s2059_s22 }
  0x42   : > { %462 = vrot.lane.b32.xlu1 %v2123_v1, %s2060_s23  ;;  %460 = vrot.lane.b32.xlu0 %v2120_v0, %s2060_s23 }
  0x46   : > { %324 = vrot.lane.b32.xlu1 %v2123_v1, %s2061_s24  ;;  %322 = vrot.lane.b32.xlu0 %v2120_v0, %s2061_s24 }
  0x4a   : > { %738 = vrot.lane.b32.xlu1 %v2123_v1, %s2062_s25  ;;  %736 = vrot.lane.b32.xlu0 %v2120_v0, %s2062_s25 }
  0x4e   : > { %600 = vrot.lane.b32.xlu1 %v2123_v1, %s2063_s26  ;;  %598 = vrot.lane.b32.xlu0 %v2120_v0, %s2063_s26 }
  0x52   : > { %466 = vrot.lane.b32.xlu1 %v2132_v2, %s2060_s23  ;;  %464 = vrot.lane.b32.xlu0 %v2135_v3, %s2060_s23 }
  0x56   : > { %328 = vrot.lane.b32.xlu1 %v2132_v2, %s2061_s24  ;;  %326 = vrot.lane.b32.xlu0 %v2135_v3, %s2061_s24 }
  0x5a   : > { %742 = vrot.lane.b32.xlu1 %v2132_v2, %s2062_s25  ;;  %740 = vrot.lane.b32.xlu0 %v2135_v3, %s2062_s25 }
  0x5e   : > { %604 = vrot.lane.b32.xlu1 %v2132_v2, %s2063_s26  ;;  %602 = vrot.lane.b32.xlu0 %v2135_v3, %s2063_s26 }
  0x62   : > { %470 = vrot.lane.b32.xlu1 %v2144_v4, %s2060_s23  ;;  %468 = vrot.lane.b32.xlu0 %v2147_v5, %s2060_s23 }
  0x66   : > { %332 = vrot.lane.b32.xlu1 %v2144_v4, %s2061_s24  ;;  %330 = vrot.lane.b32.xlu0 %v2147_v5, %s2061_s24 }
  0x6a   : > { %746 = vrot.lane.b32.xlu1 %v2144_v4, %s2062_s25  ;;  %744 = vrot.lane.b32.xlu0 %v2147_v5, %s2062_s25 }
  0x6e   : > { %608 = vrot.lane.b32.xlu1 %v2144_v4, %s2063_s26  ;;  %606 = vrot.lane.b32.xlu0 %v2147_v5, %s2063_s26 }
  0x72   : > { %474 = vrot.lane.b32.xlu1 %v2156_v6, %s2060_s23  ;;  %472 = vrot.lane.b32.xlu0 %v2159_v7, %s2060_s23 }
  0x76   : > { %336 = vrot.lane.b32.xlu1 %v2156_v6, %s2061_s24  ;;  %334 = vrot.lane.b32.xlu0 %v2159_v7, %s2061_s24 }
  0x7a   : > { %750 = vrot.lane.b32.xlu1 %v2156_v6, %s2062_s25  ;;  %748 = vrot.lane.b32.xlu0 %v2159_v7, %s2062_s25 }
  0x7e   : > { %612 = vrot.lane.b32.xlu1 %v2156_v6, %s2063_s26  ;;  %610 = vrot.lane.b32.xlu0 %v2159_v7, %s2063_s26 }
  0x82   : > { %945 = vrot.lane.b32.xlu1 %v2123_v1, %s2064_s8  ;;  %943 = vrot.lane.b32.xlu0 %v2120_v0, %s2064_s8 }
  0x84   : > { %v668_v16 = vpop.permute.xlu1 %667  ;;  %v392_v17 = vpop.permute.xlu0 %391 }
  0x86   : > { %807 = vrot.lane.b32.xlu1 %v2123_v1, %s2065_s9  ;;  %805 = vrot.lane.b32.xlu0 %v2120_v0, %s2065_s9 }
  0x88   : > { %v670_v18 = vpop.permute.xlu1 %669  ;;  %v394_v19 = vpop.permute.xlu0 %393 }
  0x89   : > { %v408_v21 = vsel %vm407_vm0, %v392_v17, %v394_v19  ;;  %v684_v22 = vsel %vm683_vm1, %v668_v16, %v670_v18 }
  0x8a   : > { %1879 = vmatprep.subr.bf16.mxu0 %v408_v21  ;;  %1901 = vmatprep.subr.bf16.mxu1 %v684_v22 }
  0x8b   : > { %1221 = vrot.lane.b32.xlu1 %v2123_v1, %s2066_s10  ;;  %1219 = vrot.lane.b32.xlu0 %v2120_v0, %s2066_s10 }
  0x8c   : > { %v532_v23 = vpop.permute.xlu1 %531  ;;  %v530_v24 = vpop.permute.xlu0 %529  ;;  %1880 = vmatpush3.bf16.msra.mxu0 %v2021_v20 }
  0x8d   : > { %v546_v25 = vsel %vm545_vm2, %v530_v24, %v532_v23 }
  0x8e   : > { %1902 = vmatpush3.bf16.msra.mxu1 %v546_v25 }
  0x8f   : > { %1083 = vrot.lane.b32.xlu1 %v2123_v1, %s2067_s11  ;;  %1081 = vrot.lane.b32.xlu0 %v2120_v0, %s2067_s11 }
  0x90   : > { %v398_v26 = vpop.permute.xlu1 %397  ;;  %v396_v27 = vpop.permute.xlu0 %395 }
  0x91   : > { %v409_v29 = vsel %vm407_vm0, %v396_v27, %v398_v26 }
  0x92   : > { %1881 = vmatprep.subr.bf16.mxu0 %v409_v29 }
  0x93   : > { %949 = vrot.lane.b32.xlu1 %v2132_v2, %s2064_s8  ;;  %947 = vrot.lane.b32.xlu0 %v2135_v3, %s2064_s8 }
  0x94   : > { %v674_v30 = vpop.permute.xlu1 %673  ;;  %v672_v31 = vpop.permute.xlu0 %671  ;;  %1882 = vmatpush3.bf16.msra.mxu0 %v2022_v28 }
  0x95   : > { %v685_v32 = vsel %vm683_vm1, %v672_v31, %v674_v30 }
  0x96   : > { %1903 = vmatprep.subr.bf16.mxu1 %v685_v32 }
  0x97   : > { %811 = vrot.lane.b32.xlu1 %v2132_v2, %s2065_s9  ;;  %809 = vrot.lane.b32.xlu0 %v2135_v3, %s2065_s9 }
  0x98   : > { %v536_v33 = vpop.permute.xlu1 %535  ;;  %v534_v34 = vpop.permute.xlu0 %533 }
  0x99   : > { %v547_v35 = vsel %vm545_vm2, %v534_v34, %v536_v33 }
  0x9a   : > { %1904 = vmatpush3.bf16.msra.mxu1 %v547_v35 }
  0x9b   : > { %1225 = vrot.lane.b32.xlu1 %v2132_v2, %s2066_s10  ;;  %1223 = vrot.lane.b32.xlu0 %v2135_v3, %s2066_s10 }
  0x9c   : > { %v402_v36 = vpop.permute.xlu1 %401  ;;  %v400_v37 = vpop.permute.xlu0 %399 }
  0x9d   : > { %v410_v39 = vsel %vm407_vm0, %v400_v37, %v402_v36 }
  0x9e   : > { %1883 = vmatprep.subr.bf16.mxu0 %v410_v39 }
  0x9f   : > { %1087 = vrot.lane.b32.xlu1 %v2132_v2, %s2067_s11  ;;  %1085 = vrot.lane.b32.xlu0 %v2135_v3, %s2067_s11 }
  0xa0   : > { %v678_v40 = vpop.permute.xlu1 %677  ;;  %v676_v41 = vpop.permute.xlu0 %675  ;;  %1884 = vmatpush3.bf16.msra.mxu0 %v2023_v38 }
  0xa1   : > { %v686_v42 = vsel %vm683_vm1, %v676_v41, %v678_v40 }
  0xa2   : > { %1905 = vmatprep.subr.bf16.mxu1 %v686_v42 }
  0xa3   : > { %953 = vrot.lane.b32.xlu1 %v2144_v4, %s2064_s8  ;;  %951 = vrot.lane.b32.xlu0 %v2147_v5, %s2064_s8 }
  0xa4   : > { %v540_v43 = vpop.permute.xlu1 %539  ;;  %v538_v44 = vpop.permute.xlu0 %537 }
  0xa5   : > { %v548_v45 = vsel %vm545_vm2, %v538_v44, %v540_v43  ;;  %v2384_v44 = vld [vmem:[%s2495_s1 + $0x10] sm:$0xff] }
  0xa6   : > { %1906 = vmatpush3.bf16.msra.mxu1 %v548_v45  ;;  %v2389_v45 = vld [vmem:[%s2495_s1 + $0x30] sm:$0xff] }
  0xa7   : > { %815 = vrot.lane.b32.xlu1 %v2144_v4, %s2065_s9  ;;  %813 = vrot.lane.b32.xlu0 %v2147_v5, %s2065_s9 }
  0xa8   : > { %v406_v46 = vpop.permute.xlu1 %405  ;;  %v404_v47 = vpop.permute.xlu0 %403 }
  0xa9   : > { %v411_v49 = vsel %vm407_vm0, %v404_v47, %v406_v46 }
  0xaa   : > { %1885 = vmatprep.subr.bf16.mxu0 %v411_v49 }
  0xab   : > { %1229 = vrot.lane.b32.xlu1 %v2144_v4, %s2066_s10  ;;  %1227 = vrot.lane.b32.xlu0 %v2147_v5, %s2066_s10 }
  0xac   : > { %v682_v50 = vpop.permute.xlu1 %681  ;;  %v680_v51 = vpop.permute.xlu0 %679  ;;  %1886 = vmatpush3.bf16.msra.mxu0 %v2024_v48  ;;  %v1870_v48 = vcombine.high %v2384_v44, %v2389_v45 }
  0xad   : > { %v687_v52 = vsel %vm683_vm1, %v680_v51, %v682_v50  ;;  %v1869_v50 = vcombine.low %v2384_v44, %v2389_v45 }
  0xae   : > { %1907 = vmatprep.subr.bf16.mxu1 %v687_v52 }
  0xaf   : > { %1091 = vrot.lane.b32.xlu1 %v2144_v4, %s2067_s11  ;;  %1089 = vrot.lane.b32.xlu0 %v2147_v5, %s2067_s11 }
  0xb0   : > { %v544_v53 = vpop.permute.xlu1 %543  ;;  %v542_v54 = vpop.permute.xlu0 %541 }
  0xb1   : > { %v549_v55 = vsel %vm545_vm2, %v542_v54, %v544_v53 }
  0xb2   : > { %1908 = vmatpush3.bf16.msra.mxu1 %v549_v55 }
  0xb3   : > { %957 = vrot.lane.b32.xlu1 %v2156_v6, %s2064_s8  ;;  %955 = vrot.lane.b32.xlu0 %v2159_v7, %s2064_s8  ;;  %s239_s8 = scalar_lea.vmem %s2497_s3, %s1878_s5 }
  0xb4   : > { %v463_v56 = vpop.permute.xlu1 %462  ;;  %v461_v57 = vpop.permute.xlu0 %460 }
  0xb5   : > { %v477_v58 = vsel %vm476_vm3, %v461_v57, %v463_v56 }
  0xb6   : > { %1887 = vmatprep.subr.bf16.mxu0 %v477_v58  ;;  %v2072_v58 = vmov 0  }
  0xb7   : > { %819 = vrot.lane.b32.xlu1 %v2156_v6, %s2065_s9  ;;  %817 = vrot.lane.b32.xlu0 %v2159_v7, %s2065_s9 }
  0xb8   : > { %v325_v59 = vpop.permute.xlu1 %324  ;;  %v323_v60 = vpop.permute.xlu0 %322  ;;  %2008 = vset.pattern.permute.xlu1 %v2072_v58  ;;  %2007 = vset.pattern.permute.xlu0 %v2072_v58 }
  0xb9   : > { %v339_v61 = vsel %vm338_vm4, %v323_v60, %v325_v59  ;;  %v1390_v60 = vld [vmem:[%s2496_s2 + $0x8] sm:$0xff] }
  0xba   : > { %1888 = vmatpush3.bf16.msra.mxu0 %v339_v61 }
  0xbb   : > { %1233 = vrot.lane.b32.xlu1 %v2156_v6, %s2066_s10  ;;  %1231 = vrot.lane.b32.xlu0 %v2159_v7, %s2066_s10 }
  0xbc   : > { %v739_v62 = vpop.permute.xlu1 %738  ;;  %v737_v63 = vpop.permute.xlu0 %736 }
  0xbd   : > { %v753_v10 = vsel %vm752_vm5, %v737_v63, %v739_v62  ;;  %v1389_v63 = vld [vmem:[%s2496_s2] sm:$0xff] }
  0xbe   : > { %1909 = vmatprep.subr.bf16.mxu1 %v753_v10 }
  0xbf   : > { %1095 = vrot.lane.b32.xlu1 %v2156_v6, %s2067_s11  ;;  %1093 = vrot.lane.b32.xlu0 %v2159_v7, %s2067_s11 }
  0xc0   : > { %v601_v14 = vpop.permute.xlu1 %600  ;;  %v599_v16 = vpop.permute.xlu0 %598 }
  0xc1   : > { %v615_v17 = vsel %vm614_vm6, %v599_v16, %v601_v14 }
  0xc2   : > { %1910 = vmatpush3.bf16.msra.mxu1 %v615_v17 }
  0xc3   : > { %1014 = vrot.lane.b32.xlu1 %v2123_v1, %s2068_s16  ;;  %1012 = vrot.lane.b32.xlu0 %v2120_v0, %s2068_s16 }
  0xc4   : > { %v467_v18 = vpop.permute.xlu1 %466  ;;  %v465_v19 = vpop.permute.xlu0 %464 }
  0xc5   : > { %v478_v20 = vsel %vm476_vm3, %v465_v19, %v467_v18 }
  0xc6   : > { %1889 = vmatprep.subr.bf16.mxu0 %v478_v20 }
  0xc7   : > { %876 = vrot.lane.b32.xlu1 %v2123_v1, %s2069_s17  ;;  %874 = vrot.lane.b32.xlu0 %v2120_v0, %s2069_s17 }
  0xc8   : > { %v329_v21 = vpop.permute.xlu1 %328  ;;  %v327_v22 = vpop.permute.xlu0 %326 }
  0xc9   : > { %v340_v23 = vsel %vm338_vm4, %v327_v22, %v329_v21 }
  0xca   : > { %1890 = vmatpush3.bf16.msra.mxu0 %v340_v23 }
  0xcb   : > { %1290 = vrot.lane.b32.xlu1 %v2123_v1, %s2070_s18  ;;  %1288 = vrot.lane.b32.xlu0 %v2120_v0, %s2070_s18 }
  0xcc   : > { %v743_v24 = vpop.permute.xlu1 %742  ;;  %v741_v25 = vpop.permute.xlu0 %740 }
  0xcd   : > { %v754_v26 = vsel %vm752_vm5, %v741_v25, %v743_v24 }
  0xce   : > { %1911 = vmatprep.subr.bf16.mxu1 %v754_v26 }
  0xcf   : > { %1152 = vrot.lane.b32.xlu1 %v2123_v1, %s2071_s19  ;;  %1150 = vrot.lane.b32.xlu0 %v2120_v0, %s2071_s19 }
  0xd0   : > { %v605_v27 = vpop.permute.xlu1 %604  ;;  %v603_v28 = vpop.permute.xlu0 %602 }
  0xd1   : > { %v616_v29 = vsel %vm614_vm6, %v603_v28, %v605_v27 }
  0xd2   : > { %1912 = vmatpush3.bf16.msra.mxu1 %v616_v29 }
  0xd3   : > { %1018 = vrot.lane.b32.xlu1 %v2132_v2, %s2068_s16  ;;  %1016 = vrot.lane.b32.xlu0 %v2135_v3, %s2068_s16 }
  0xd4   : > { %v471_v30 = vpop.permute.xlu1 %470  ;;  %v469_v31 = vpop.permute.xlu0 %468 }
  0xd5   : > { %v479_v32 = vsel %vm476_vm3, %v469_v31, %v471_v30 }
  0xd6   : > { %1891 = vmatprep.subr.bf16.mxu0 %v479_v32 }
  0xd7   : > { %880 = vrot.lane.b32.xlu1 %v2132_v2, %s2069_s17  ;;  %878 = vrot.lane.b32.xlu0 %v2135_v3, %s2069_s17 }
  0xd8   : > { %v333_v0 = vpop.permute.xlu1 %332  ;;  %v331_v1 = vpop.permute.xlu0 %330 }
  0xd9   : > { %v341_v33 = vsel %vm338_vm4, %v331_v1, %v333_v0 }
  0xda   : > { %1892 = vmatpush3.bf16.msra.mxu0 %v341_v33 }
  0xdb   : > { %1294 = vrot.lane.b32.xlu1 %v2132_v2, %s2070_s18  ;;  %1292 = vrot.lane.b32.xlu0 %v2135_v3, %s2070_s18 }
  0xdc   : > { %v747_v34 = vpop.permute.xlu1 %746  ;;  %v745_v35 = vpop.permute.xlu0 %744 }
  0xdd   : > { %v755_v36 = vsel %vm752_vm5, %v745_v35, %v747_v34 }
  0xde   : > { %1913 = vmatprep.subr.bf16.mxu1 %v755_v36 }
  0xdf   : > { %1156 = vrot.lane.b32.xlu1 %v2132_v2, %s2071_s19  ;;  %1154 = vrot.lane.b32.xlu0 %v2135_v3, %s2071_s19 }
  0xe0   : > { %v609_v37 = vpop.permute.xlu1 %608  ;;  %v607_v38 = vpop.permute.xlu0 %606 }
  0xe1   : > { %v617_v39 = vsel %vm614_vm6, %v607_v38, %v609_v37 }
  0xe2   : > { %1914 = vmatpush3.bf16.msra.mxu1 %v617_v39 }
  0xe3   : > { %1022 = vrot.lane.b32.xlu1 %v2144_v4, %s2068_s16  ;;  %1020 = vrot.lane.b32.xlu0 %v2147_v5, %s2068_s16 }
  0xe4   : > { %v475_v40 = vpop.permute.xlu1 %474  ;;  %v473_v41 = vpop.permute.xlu0 %472 }
  0xe5   : > { %v480_v42 = vsel %vm476_vm3, %v473_v41, %v475_v40 }
  0xe6   : > { %1893 = vmatprep.subr.bf16.mxu0 %v480_v42 }
  0xe7   : > { %884 = vrot.lane.b32.xlu1 %v2144_v4, %s2069_s17  ;;  %882 = vrot.lane.b32.xlu0 %v2147_v5, %s2069_s17 }
  0xe8   : > { %v337_v2 = vpop.permute.xlu1 %336  ;;  %v335_v3 = vpop.permute.xlu0 %334 }
  0xe9   : > { %v342_v43 = vsel %vm338_vm4, %v335_v3, %v337_v2 }
  0xea   : > { %1894 = vmatpush3.bf16.msra.mxu0 %v342_v43 }
  0xeb   : > { %1298 = vrot.lane.b32.xlu1 %v2144_v4, %s2070_s18  ;;  %1296 = vrot.lane.b32.xlu0 %v2147_v5, %s2070_s18 }
  0xec   : > { %v751_v46 = vpop.permute.xlu1 %750  ;;  %v749_v47 = vpop.permute.xlu0 %748 }
  0xed   : > { %v756_v49 = vsel %vm752_vm5, %v749_v47, %v751_v46  ;;  %1474 = vmatmul.mubr.bf16.vlgmr.msra.gmra.mrb[0].mxu0 %v1865_v11 }
  0xee   : > { %1915 = vmatprep.subr.bf16.mxu1 %v756_v49  ;;  %1555 = vmatprep.mubr.bf16.mxu0 %v1870_v48 }
  0xef   : > { %1160 = vrot.lane.b32.xlu1 %v2144_v4, %s2071_s19  ;;  %1158 = vrot.lane.b32.xlu0 %v2147_v5, %s2071_s19  ;;  %v2416_v4 = vld [vmem:[%s2495_s1 + $0x38] sm:$0xff] }
  0xf0   : > { %v613_v51 = vpop.permute.xlu1 %612  ;;  %v611_v52 = vpop.permute.xlu0 %610  ;;  %v1871_v11 = vcombine.low %v2411_v8, %v2416_v4  ;;  %v1872_v54 = vcombine.high %v2411_v8, %v2416_v4 }
  0xf1   : > { %v618_v53 = vsel %vm614_vm6, %v611_v52, %v613_v51 }
  0xf2   : > { %1916 = vmatpush3.bf16.msra.mxu1 %v618_v53 }
  0xf3   : > { %1026 = vrot.lane.b32.xlu1 %v2156_v6, %s2068_s16  ;;  %1024 = vrot.lane.b32.xlu0 %v2159_v7, %s2068_s16 }
  0xf4   : > { %v946_v5 = vpop.permute.xlu1 %945  ;;  %v944_v9 = vpop.permute.xlu0 %943 }
  0xf5   : > { %v960_v55 = vsel %vm959_vm7, %v944_v9, %v946_v5  ;;  %1515 = vmatmul.mubr.bf16.vlgmr.msra.gmra.mrb[0].mxu1 %v1867_v15 }
  0xf6   : > { %1923 = vmatprep.subr.bf16.mxu0 %v960_v55  ;;  %1596 = vmatprep.mubr.bf16.mxu1 %v1872_v54 }
  0xf7   : > { %888 = vrot.lane.b32.xlu1 %v2156_v6, %s2069_s17  ;;  %886 = vrot.lane.b32.xlu0 %v2159_v7, %s2069_s17 }
  0xf8   : > { %v808_v56 = vpop.permute.xlu1 %807  ;;  %v806_v57 = vpop.permute.xlu0 %805 }
  0xf9   : > { %v822_v59 = vsel %vm821_vm8, %v806_v57, %v808_v56 }
  0xfa   : > { %1924 = vmatpush3.bf16.msra.mxu0 %v822_v59 }
  0xfb   : > { %1302 = vrot.lane.b32.xlu1 %v2156_v6, %s2070_s18  ;;  %1300 = vrot.lane.b32.xlu0 %v2159_v7, %s2070_s18 }
  0xfd   : > { %v1222_v12 = vpop.permute.xlu1 %1221  ;;  %v1220_v13 = vpop.permute.xlu0 %1219 }
  0xfe   : > { %v1236_v15 = vsel %vm1235_vm9, %v1220_v13, %v1222_v12 }
  0xff   : > { %1164 = vrot.lane.b32.xlu1 %v2156_v6, %s2071_s19  ;;  %1162 = vrot.lane.b32.xlu0 %v2159_v7, %s2071_s19 }
 0x100   : > { %1945 = vmatprep.subr.bf16.mxu1 %v1236_v15 }
 0x101   : > { %v1084_v61 = vpop.permute.xlu1 %1083  ;;  %v1082_v62 = vpop.permute.xlu0 %1081 }
 0x102   : > { %v1098_v10 = vsel %vm1097_vm10, %v1082_v62, %v1084_v61 }
 0x103   : > { %1946 = vmatpush3.bf16.msra.mxu1 %v1098_v10  ;;  %1398 = vperm.xlu1 %2008, %v1390_v60  }
 0x104   : > { %1393 = vperm.xlu0 %2007, %v1389_v63  }
 0x105   : > { %v950_v6 = vpop.permute.xlu1 %949  ;;  %v948_v14 = vpop.permute.xlu0 %947 }
 0x106   : > { %v961_v7 = vsel %vm959_vm7, %v948_v14, %v950_v6 }
 0x107   : > { %1925 = vmatprep.subr.bf16.mxu0 %v961_v7 }
 0x109   : > { %v812_v16 = vpop.permute.xlu1 %811  ;;  %v810_v17 = vpop.permute.xlu0 %809 }
 0x10a   : > { %v823_v18 = vsel %vm821_vm8, %v810_v17, %v812_v16 }
 0x10b   : > { %1926 = vmatpush3.bf16.msra.mxu0 %v823_v18 }
 0x10d   : > { %v1226_v19 = vpop.permute.xlu1 %1225  ;;  %v1224_v20 = vpop.permute.xlu0 %1223 }
 0x10e   : > { %v1237_v21 = vsel %vm1235_vm9, %v1224_v20, %v1226_v19 }
 0x10f   : > { %1947 = vmatprep.subr.bf16.mxu1 %v1237_v21 }
 0x111   : > { %v1088_v22 = vpop.permute.xlu1 %1087  ;;  %v1086_v23 = vpop.permute.xlu0 %1085 }
 0x112   : > { %v1099_v24 = vsel %vm1097_vm10, %v1086_v23, %v1088_v22 }
 0x113   : > { %1948 = vmatpush3.bf16.msra.mxu1 %v1099_v24 }
 0x115   : > { %v954_v25 = vpop.permute.xlu1 %953  ;;  %v952_v26 = vpop.permute.xlu0 %951 }
 0x116   : > { %v962_v27 = vsel %vm959_vm7, %v952_v26, %v954_v25 }
 0x117   : > { %1927 = vmatprep.subr.bf16.mxu0 %v962_v27 }
 0x119   : > { %v816_v28 = vpop.permute.xlu1 %815  ;;  %v814_v29 = vpop.permute.xlu0 %813 }
 0x11a   : > { %v824_v30 = vsel %vm821_vm8, %v814_v29, %v816_v28 }
 0x11b   : > { %1928 = vmatpush3.bf16.msra.mxu0 %v824_v30 }
 0x11d   : > { %v1230_v31 = vpop.permute.xlu1 %1229  ;;  %v1228_v32 = vpop.permute.xlu0 %1227 }
 0x11e   : > { %v1238_v0 = vsel %vm1235_vm9, %v1228_v32, %v1230_v31 }
 0x11f   : > { %1949 = vmatprep.subr.bf16.mxu1 %v1238_v0 }
 0x121   : > { %v1092_v1 = vpop.permute.xlu1 %1091  ;;  %v1090_v33 = vpop.permute.xlu0 %1089 }
 0x122   : > { %v1100_v34 = vsel %vm1097_vm10, %v1090_v33, %v1092_v1 }
 0x123   : > { %1950 = vmatpush3.bf16.msra.mxu1 %v1100_v34 }
 0x125   : > { %v958_v35 = vpop.permute.xlu1 %957  ;;  %v956_v36 = vpop.permute.xlu0 %955 }
 0x126   : > { %v963_v37 = vsel %vm959_vm7, %v956_v36, %v958_v35 }
 0x127   : > { %1929 = vmatprep.subr.bf16.mxu0 %v963_v37 }
 0x129   : > { %v820_v38 = vpop.permute.xlu1 %819  ;;  %v818_v39 = vpop.permute.xlu0 %817 }
 0x12a   : > { %v825_v40 = vsel %vm821_vm8, %v818_v39, %v820_v38 }
 0x12b   : > { %1930 = vmatpush3.bf16.msra.mxu0 %v825_v40 }
 0x12d   : > { %v1234_v41 = vpop.permute.xlu1 %1233  ;;  %v1232_v42 = vpop.permute.xlu0 %1231 }
 0x12e   : > { %v1239_v2 = vsel %vm1235_vm9, %v1232_v42, %v1234_v41 }
 0x12f   : > { %1951 = vmatprep.subr.bf16.mxu1 %v1239_v2 }
 0x131   : > { %v1096_v3 = vpop.permute.xlu1 %1095  ;;  %v1094_v43 = vpop.permute.xlu0 %1093 }
 0x132   : > { %v1101_v46 = vsel %vm1097_vm10, %v1094_v43, %v1096_v3 }
 0x133   : > { %1952 = vmatpush3.bf16.msra.mxu1 %v1101_v46 }
 0x135   : > { %v1015_v47 = vpop.permute.xlu1 %1014  ;;  %v1013_v48 = vpop.permute.xlu0 %1012 }
 0x136   : > { %v1029_v49 = vsel %vm1028_vm11, %v1013_v48, %v1015_v47 }
 0x137   : > { %1931 = vmatprep.subr.bf16.mxu0 %v1029_v49 }
 0x139   : > { %v877_v51 = vpop.permute.xlu1 %876  ;;  %v875_v52 = vpop.permute.xlu0 %874 }
 0x13a   : > { %v891_v53 = vsel %vm890_vm12, %v875_v52, %v877_v51 }
 0x13b   : > { %1932 = vmatpush3.bf16.msra.mxu0 %v891_v53 }
 0x13d   : > { %v1291_v5 = vpop.permute.xlu1 %1290  ;;  %v1289_v9 = vpop.permute.xlu0 %1288 }
 0x13e   : > { %v1305_v54 = vsel %vm1304_vm13, %v1289_v9, %v1291_v5 }
 0x13f   : > { %1953 = vmatprep.subr.bf16.mxu1 %v1305_v54 }
 0x141   : > { %v1153_v55 = vpop.permute.xlu1 %1152  ;;  %v1151_v56 = vpop.permute.xlu0 %1150 }
 0x142   : > { %v1167_v57 = vsel %vm1166_vm14, %v1151_v56, %v1153_v55 }
 0x143   : > { %1954 = vmatpush3.bf16.msra.mxu1 %v1167_v57 }
 0x145   : > { %v1019_v58 = vpop.permute.xlu1 %1018  ;;  %v1017_v59 = vpop.permute.xlu0 %1016 }
 0x146   : > { %v1030_v12 = vsel %vm1028_vm11, %v1017_v59, %v1019_v58 }
 0x147   : > { %1933 = vmatprep.subr.bf16.mxu0 %v1030_v12 }
 0x149   : > { %v881_v13 = vpop.permute.xlu1 %880  ;;  %v879_v15 = vpop.permute.xlu0 %878 }
 0x14a   : > { %v892_v60 = vsel %vm890_vm12, %v879_v15, %v881_v13 }
 0x14b   : > { %1934 = vmatpush3.bf16.msra.mxu0 %v892_v60 }
 0x14d   : > { %v1295_v61 = vpop.permute.xlu1 %1294  ;;  %v1293_v62 = vpop.permute.xlu0 %1292 }
 0x14e   : > { %v1306_v63 = vsel %vm1304_vm13, %v1293_v62, %v1295_v61 }
 0x14f   : > { %1955 = vmatprep.subr.bf16.mxu1 %v1306_v63 }
 0x151   : > { %v1157_v10 = vpop.permute.xlu1 %1156  ;;  %v1155_v6 = vpop.permute.xlu0 %1154 }
 0x152   : > { %v1168_v14 = vsel %vm1166_vm14, %v1155_v6, %v1157_v10 }
 0x153   : > { %1956 = vmatpush3.bf16.msra.mxu1 %v1168_v14 }
 0x155   : > { %v1023_v7 = vpop.permute.xlu1 %1022  ;;  %v1021_v16 = vpop.permute.xlu0 %1020 }
 0x156   : > { %v1031_v17 = vsel %vm1028_vm11, %v1021_v16, %v1023_v7 }
 0x157   : > { %1935 = vmatprep.subr.bf16.mxu0 %v1031_v17 }
 0x159   : > { %v885_v18 = vpop.permute.xlu1 %884  ;;  %v883_v19 = vpop.permute.xlu0 %882 }
 0x15a   : > { %v893_v20 = vsel %vm890_vm12, %v883_v19, %v885_v18 }
 0x15b   : > { %1936 = vmatpush3.bf16.msra.mxu0 %v893_v20 }
 0x15d   : > { %v1299_v21 = vpop.permute.xlu1 %1298  ;;  %v1297_v22 = vpop.permute.xlu0 %1296 }
 0x15e   : > { %v1307_v23 = vsel %vm1304_vm13, %v1297_v22, %v1299_v21 }
 0x15f   : > { %1957 = vmatprep.subr.bf16.mxu1 %v1307_v23 }
 0x161   : > { %v1161_v24 = vpop.permute.xlu1 %1160  ;;  %v1159_v25 = vpop.permute.xlu0 %1158 }
 0x162   : > { %v1169_v26 = vsel %vm1166_vm14, %v1159_v25, %v1161_v24 }
 0x163   : > { %1958 = vmatpush3.bf16.msra.mxu1 %v1169_v26 }
 0x165   : > { %v1027_v27 = vpop.permute.xlu1 %1026  ;;  %v1025_v28 = vpop.permute.xlu0 %1024 }
 0x166   : > { %v1032_v29 = vsel %vm1028_vm11, %v1025_v28, %v1027_v27 }
 0x167   : > { %1937 = vmatprep.subr.bf16.mxu0 %v1032_v29 }
 0x169   : > { %v889_v30 = vpop.permute.xlu1 %888  ;;  %v887_v31 = vpop.permute.xlu0 %886 }
 0x16a   : > { %v894_v32 = vsel %vm890_vm12, %v887_v31, %v889_v30 }
 0x16b   : > { %1938 = vmatpush3.bf16.msra.mxu0 %v894_v32 }
 0x16d   : > { %v1303_v0 = vpop.permute.xlu1 %1302  ;;  %v1301_v1 = vpop.permute.xlu0 %1300 }
 0x16e   : > { %1556 = vmatmul.mubr.bf16.vlgmr.msra.gmra.mrb[4].mxu0 %v1869_v50  ;;  %v1308_v33 = vsel %vm1304_vm13, %v1301_v1, %v1303_v0 }
 0x16f   : > { %1959 = vmatprep.subr.bf16.mxu1 %v1308_v33 }
 0x171   : > { %v1165_v34 = vpop.permute.xlu1 %1164  ;;  %v1163_v35 = vpop.permute.xlu0 %1162 }
 0x172   : > { %v1170_v36 = vsel %vm1166_vm14, %v1163_v35, %v1165_v34 }
 0x173   : > { %1960 = vmatpush3.bf16.msra.mxu1 %v1170_v36 }
 0x176   : > { %1597 = vmatmul.mubr.bf16.vlgmr.msra.gmra.mrb[4].mxu1 %v1871_v11 }
 0x182   : > { %v1399_v45 = vpop.permute.xlu1 %1398 }
 0x183   : > { %v1394_v44 = vpop.permute.xlu0 %1393 }
 0x1c0   : > { %v1895_v37 = vpop.f32.mrb[0].mxu0 }
 0x1c1   : > { %v1896_v38 = vpop.f32.mrb[1].mxu0 }
 0x1c2   : > { %v1897_v39 = vadd.f32 %v1896_v38, %v1895_v37  ;;  %v1898_v40 = vpop.f32.mrb[2].mxu0 }
 0x1c3   : > { %v1899_v41 = vpop.f32.mrb[3].mxu0 }
 0x1c4   : > { %v1900_v42 = vadd.f32 %v1899_v41, %v1898_v40  ;;  %v1476_v2 = vadd.f32 %v1897_v39, %v1394_v44 }
 0x1c6   : > { %v1479_v47 = vadd.f32 %v1900_v42, %v1399_v45 }
 0x1c8   : > { %v1917_v50 = vpop.f32.mrb[0].mxu1 }
 0x1c9   : > { %v1918_v3 = vpop.f32.mrb[1].mxu1 }
 0x1ca   : > { %v1919_v43 = vadd.f32 %v1918_v3, %v1917_v50  ;;  %v1920_v46 = vpop.f32.mrb[2].mxu1 }
 0x1cb   : > { %v1921_v48 = vpop.f32.mrb[3].mxu1 }
 0x1cc   : > { %v1922_v49 = vadd.f32 %v1921_v48, %v1920_v46  ;;  %v1517_v51 = vadd.f32 %v1919_v43, %v1476_v2 }
 0x1ce   : > { %v1520_v52 = vadd.f32 %v1922_v49, %v1479_v47 }
 0x241   : > { %v1939_v8 = vpop.f32.mrb[4].mxu0 }
 0x242   : > { %v1940_v4 = vpop.f32.mrb[5].mxu0 }
 0x243   : > { %v1941_v11 = vadd.f32 %v1940_v4, %v1939_v8  ;;  %v1942_v53 = vpop.f32.mrb[6].mxu0 }
 0x244   : > { %v1943_v5 = vpop.f32.mrb[7].mxu0 }
 0x245   : > { %v1558_v9 = vadd.f32 %v1941_v11, %v1517_v51  ;;  %v1944_v54 = vadd.f32 %v1943_v5, %v1942_v53 }
 0x247   : > { %v1561_v55 = vadd.f32 %v1944_v54, %v1520_v52 }
 0x249   : > { %v1961_v56 = vpop.f32.mrb[4].mxu1 }
 0x24a   : > { %v1962_v57 = vpop.f32.mrb[5].mxu1 }
 0x24b   : > { %v1963_v58 = vadd.f32 %v1962_v57, %v1961_v56  ;;  %v1964_v59 = vpop.f32.mrb[6].mxu1 }
 0x24c   : > { %v1965_v12 = vpop.f32.mrb[7].mxu1 }
 0x24d   : > { %v1599_v13 = vadd.f32 %v1963_v58, %v1558_v9  ;;  %v1966_v15 = vadd.f32 %v1965_v12, %v1964_v59 }
 0x24f   : > { %v1873_v60 = vmul.f32 -1.442695, %v1599_v13  ;;  %v1602_v61 = vadd.f32 %v1966_v15, %v1561_v55 }
 0x251   : > { %2025 = vpow2.f32 %v1873_v60  ;;  %v1874_v62 = vmul.f32 -1.442695, %v1602_v61 }
 0x253   : > { %2027 = vpow2.f32 %v1874_v62 }
 0x25b   : > { %v2026_v63 = vpop.eup %2025 }
 0x25c   : > { %v1611_v10 = vadd.f32 1.0, %v2026_v63 }
 0x25d   : > { %v2028_v6 = vpop.eup %2027 }
 0x25e   : > { %2029 = vrcp.f32 %v1611_v10  ;;  %v1612_v14 = vadd.f32 1.0, %v2028_v6 }
 0x260   : > { %2031 = vrcp.f32 %v1612_v14 }
 0x268   : > { %v2030_v7 = vpop.eup %2029 }
 0x269   : > { %1617 = vst [vmem:[%s239_s8] sm:$0xff] %v2030_v7 }
 0x26a   : > { %v2032_v16 = vpop.eup %2031 }
 0x26b   : > { %1618 = vst [vmem:[%s239_s8 + $0x8] sm:$0xff] %v2032_v16 }
 0x26c PF: > { %s13_s14 = sadd.s32 1, %s2055_s14   ;;  %s2498_s12 = smov %s2051_s13 }
 0x26d   : > { %p10_p5 = scmp.ge.s32.totalorder %s13_s14, 4   ;;  %s2499_s13 = smov %s2501_s15 }
 0x26f   :  { %12 = sbr.rel (!%p10_p5) target bundleno = 2 (0x2), region = 72 }

</bundles_post_ra>
